<compile_context>
chip_gen: v6e
topology: v6e:2x2x1
jax: 0.10.0
libtpu: 0.0.40
codegen_flags: <defaults>
</compile_context>

<pallas_src>
import functools
import math

import jax
import jax.numpy as jnp
from jax.experimental import pallas as pl
from jax.experimental.pallas import tpu as pltpu


# ----------------------------------------------------------------------------
# helpers
# ----------------------------------------------------------------------------
def _pick_block(n, target):
    """Largest block <= target that divides n and is a multiple of 8
    (sublane tile), else the full extent n (always legal)."""
    if n <= target:
        return n
    for cand in range(target, 7, -1):
        if n % cand == 0 and cand % 8 == 0:
            return cand
    return n


def _pick_col_block(dim, head_dim, target=512):
    """Head-aligned output-column block: divides dim and is lane-dense
    (multiple of 128) unless it is the whole dim. Bounds weight VMEM."""
    if dim <= target:
        return dim
    n = max(target // head_dim, 1)
    while n >= 1:
        cb = n * head_dim
        if dim % cb == 0 and cb % 128 == 0:
            return cb
        n -= 1
    return dim


# ----------------------------------------------------------------------------
# kernel 1: fused QKV projection + rotary embedding (column/head-group tiled)
# ----------------------------------------------------------------------------
def _qkv_rope_kernel(x_ref, wq_ref, wk_ref, wv_ref, bq_ref, bk_ref, bv_ref,
                     cos_ref, sin_ref, q_ref, k_ref, v_ref, *,
                     scale, heads_per_block):
    # x_ref: (1, ts, dim)   w*_ref: (dim, cb)   b*_ref: (1, cb)
    # cos/sin_ref: (ts, hd) lane-expanded per-head RoPE tables (sign baked
    # into sin).  Outputs q/k/v: (1, ts, cb) head-group column slabs.
    x = x_ref[0]                                   # native dtype -> MXU fast path
    ts = x.shape[0]
    cb = q_ref.shape[2]

    cos = jnp.tile(cos_ref[...], (1, heads_per_block))      # (ts, cb) f32
    sin = jnp.tile(sin_ref[...], (1, heads_per_block))

    lane = jax.lax.broadcasted_iota(jnp.int32, (ts, cb), 1)
    even = (lane % 2) == 0

    def pair_swap(t):
        # t[:, 2j] <-> t[:, 2j+1] via two XLU lane rolls + parity select
        # (replaces the column-permuted extra matmuls of the old version).
        left = pltpu.roll(t, cb - 1, 1)    # brings lane 2j+1 into lane 2j
        right = pltpu.roll(t, 1, 1)        # brings lane 2j   into lane 2j+1
        return jnp.where(even, left, right)

    def proj(w_ref, b_ref):
        y = jnp.dot(x, w_ref[...], preferred_element_type=jnp.float32)
        return y + b_ref[...].astype(jnp.float32)

    q = proj(wq_ref, bq_ref)
    k = proj(wk_ref, bk_ref)
    v = proj(wv_ref, bv_ref)

    # interleaved RoPE: out[2j] = a*c - b*s ; out[2j+1] = b*c + a*s
    # 1/sqrt(head_dim) folded into q here (cheaper than scaling score tiles).
    q_ref[0] = ((q * cos + pair_swap(q) * sin) * scale).astype(q_ref.dtype)
    k_ref[0] = (k * cos + pair_swap(k) * sin).astype(k_ref.dtype)
    v_ref[0] = v.astype(v_ref.dtype)


# ----------------------------------------------------------------------------
# kernel 2: causal flash attention, all heads per step, lower-tri grid only
# ----------------------------------------------------------------------------
def _flash_attn_kernel(qi_ref, ki_ref, q_ref, k_ref, v_ref, o_ref,
                       m_sc, l_sc, acc_sc, *, num_heads, head_dim):
    t = pl.program_id(1)
    qi = qi_ref[t]                     # block row (prefetched SMEM)
    ki = ki_ref[t]                     # block col (prefetched SMEM), ki <= qi
    block_q = q_ref.shape[1]
    block_kv = k_ref.shape[1]

    @pl.when(ki == 0)
    def _():
        m_sc[...] = jnp.full(m_sc.shape, -1e30, jnp.float32)
        l_sc[...] = jnp.zeros(l_sc.shape, jnp.float32)
        acc_sc[...] = jnp.zeros(acc_sc.shape, jnp.float32)

    def update(masked):
        if masked:
            q_pos = qi * block_q + jax.lax.broadcasted_iota(
                jnp.int32, (block_q, block_kv), 0)
            kv_pos = ki * block_kv + jax.lax.broadcasted_iota(
                jnp.int32, (block_q, block_kv), 1)
            causal = kv_pos <= q_pos
        for h in range(num_heads):
            sl = slice(h * head_dim, (h + 1) * head_dim)
            q_h = q_ref[0, :, sl]                  # (tq, hd), native dtype
            k_h = k_ref[0, :, sl]
            v_h = v_ref[0, :, sl]
            # trans_b matmul; q already carries the 1/sqrt(hd) scale.
            s = jax.lax.dot_general(q_h, k_h, (((1,), (1,)), ((), ())),
                                    preferred_element_type=jnp.float32)
            if masked:
                s = jnp.where(causal, s, -1e30)
            m_prev = m_sc[h]
            m_new = jnp.maximum(m_prev, s.max(axis=-1, keepdims=True))
            alpha = jnp.exp(m_prev - m_new)
            p = jnp.exp(s - m_new)
            l_sc[h] = alpha * l_sc[h] + p.sum(axis=-1, keepdims=True)
            acc_sc[h] = alpha * acc_sc[h] + jnp.dot(
                p.astype(v_h.dtype), v_h, preferred_element_type=jnp.float32)
            m_sc[h] = m_new

    # Strictly-below-diagonal blocks: no mask work at all (fast path).
    @pl.when(ki < qi)
    def _():
        update(False)

    # Diagonal block: apply mask, then finalize (it is the last kv block of
    # this query row, so the lane-dense (tq, dim) output slab is completed).
    @pl.when(ki == qi)
    def _():
        update(True)
        for h in range(num_heads):
            sl = slice(h * head_dim, (h + 1) * head_dim)
            o_ref[0, :, sl] = (acc_sc[h] * pl.reciprocal(
                l_sc[h], approx=True)).astype(o_ref.dtype)


# ----------------------------------------------------------------------------
# kernel 3: output projection (column tiled)
# ----------------------------------------------------------------------------
def _out_proj_kernel(x_ref, w_ref, b_ref, o_ref):
    y = jnp.dot(x_ref[...], w_ref[...], preferred_element_type=jnp.float32)
    o_ref[...] = (y + b_ref[...].astype(jnp.float32)).astype(o_ref.dtype)


# ----------------------------------------------------------------------------
# wrapper
# ----------------------------------------------------------------------------
def attention_forward(x, params, cos, sin, *, num_heads,
                      seq_block=256, token_block=256, col_block=512):
    """x: (bs, seq, dim); cos/sin: (seq, head_dim//2) (== freqs_cis)."""
    wq, bq, wk, bk, wv, bv, wo, bo = params
    bs, seq, dim = x.shape
    assert dim % num_heads == 0
    hd = dim // num_heads
    assert hd % 2 == 0
    n_tokens = bs * seq
    fbytes = jnp.dtype(x.dtype).itemsize
    scale = 1.0 / math.sqrt(hd)

    # Per-head lane-expanded RoPE tables (seq, hd); sign baked into sin:
    #   cos_hd[s,2j] = cos_hd[s,2j+1] = cos[s,j];  sin_hd[s,2j] = -sin[s,j],
    #   sin_hd[s,2j+1] = +sin[s,j].
    cos_hd = jnp.repeat(cos.astype(jnp.float32), 2, axis=-1)
    sign = jnp.tile(jnp.array([-1.0, 1.0], jnp.float32), hd // 2)
    sin_hd = jnp.repeat(sin.astype(jnp.float32), 2, axis=-1) * sign[None, :]

    # ---------------- kernel 1: QKV projection + RoPE ----------------
    ts = _pick_block(seq, seq_block)
    cb = _pick_col_block(dim, hd, col_block)      # head-aligned column block
    hpb = cb // hd
    n_cg = dim // cb
    n_st = seq // ts

    # Column-group axis outermost so the (dim, cb) weight blocks stay
    # resident across the whole (b, s) sweep (no per-tile weight re-DMA).
    xspec = pl.BlockSpec((1, ts, dim), lambda g, b, s: (b, s, 0))
    wspec = pl.BlockSpec((dim, cb), lambda g, b, s: (0, g))
    bspec = pl.BlockSpec((1, cb), lambda g, b, s: (0, g))
    rspec = pl.BlockSpec((ts, hd), lambda g, b, s: (s, 0))
    ospec = pl.BlockSpec((1, ts, cb), lambda g, b, s: (b, s, g))

    q, k, v = pl.pallas_call(
        functools.partial(_qkv_rope_kernel, scale=scale, heads_per_block=hpb),
        out_shape=tuple(jax.ShapeDtypeStruct((bs, seq, dim), x.dtype)
                        for _ in range(3)),
        grid=(n_cg, bs, n_st),
        in_specs=[xspec, wspec, wspec, wspec, bspec, bspec, bspec,
                  rspec, rspec],
        out_specs=[ospec, ospec, ospec],
        compiler_params=pltpu.CompilerParams(
            dimension_semantics=("parallel", "parallel", "parallel"),
            vmem_limit_bytes=64 * 1024 * 1024),
        cost_estimate=pl.CostEstimate(
            flops=2 * n_tokens * dim * dim * 3,
            transcendentals=0,
            bytes_accessed=fbytes * (n_cg * n_tokens * dim + 3 * dim * dim
                                     + 3 * n_tokens * dim)),
    )(x, wq, wk, wv,
      bq.reshape(1, dim), bk.reshape(1, dim), bv.reshape(1, dim),
      cos_hd, sin_hd)

    # ---------------- kernel 2: causal flash attention ----------------
    tq = _pick_block(seq, seq_block)          # == tkv (diagonal = last block)
    nq = seq // tq
    # Only lower-triangular (qi, ki) block pairs are scheduled: dead blocks
    # are never DMA'd (grid-level causal skip via scalar prefetch).
    pairs = [(qi, ki) for qi in range(nq) for ki in range(qi + 1)]
    qi_map = jnp.array([p[0] for p in pairs], dtype=jnp.int32)
    ki_map = jnp.array([p[1] for p in pairs], dtype=jnp.int32)
    n_pairs = len(pairs)

    qspec = pl.BlockSpec((1, tq, dim), lambda b, t, qi_m, ki_m: (b, qi_m[t], 0))
    kvspec = pl.BlockSpec((1, tq, dim), lambda b, t, qi_m, ki_m: (b, ki_m[t], 0))
    fospec = pl.BlockSpec((1, tq, dim), lambda b, t, qi_m, ki_m: (b, qi_m[t], 0))

    attn = pl.pallas_call(
        functools.partial(_flash_attn_kernel, num_heads=num_heads,
                          head_dim=hd),
        out_shape=jax.ShapeDtypeStruct((bs, seq, dim), x.dtype),
        grid_spec=pltpu.PrefetchScalarGridSpec(
            num_scalar_prefetch=2,
            grid=(bs, n_pairs),
            in_specs=[qspec, kvspec, kvspec],
            out_specs=fospec,
            scratch_shapes=[
                pltpu.VMEM((num_heads, tq, 1), jnp.float32),   # running max
                pltpu.VMEM((num_heads, tq, 1), jnp.float32),   # running denom
                pltpu.VMEM((num_heads, tq, hd), jnp.float32),  # accumulator
            ]),
        compiler_params=pltpu.CompilerParams(
            dimension_semantics=("parallel", "arbitrary"),
            vmem_limit_bytes=64 * 1024 * 1024),
        cost_estimate=pl.CostEstimate(
            flops=2 * bs * num_heads * seq * seq * hd,   # causal-halved 4x
            transcendentals=bs * num_heads * seq * seq // 2,
            bytes_accessed=fbytes * (nq + 3) * bs * seq * dim),
    )(qi_map, ki_map, q, k, v)

    # ---------------- kernel 3: output projection ----------------
    attn2d = attn.reshape(n_tokens, dim)      # free reshape, no transpose
    tn = _pick_block(n_tokens, token_block)

    out2d = pl.pallas_call(
        _out_proj_kernel,
        out_shape=jax.ShapeDtypeStruct((n_tokens, dim), x.dtype),
        grid=(n_cg, n_tokens // tn),
        in_specs=[
            pl.BlockSpec((tn, dim), lambda g, i: (i, 0)),
            pl.BlockSpec((dim, cb), lambda g, i: (0, g)),
            pl.BlockSpec((1, cb), lambda g, i: (0, g)),
        ],
        out_specs=pl.BlockSpec((tn, cb), lambda g, i: (i, g)),
        compiler_params=pltpu.CompilerParams(
            dimension_semantics=("parallel", "parallel"),
            vmem_limit_bytes=64 * 1024 * 1024),
        cost_estimate=pl.CostEstimate(
            flops=2 * n_tokens * dim * dim,
            transcendentals=0,
            bytes_accessed=fbytes * (n_cg * n_tokens * dim + dim * dim
                                     + n_tokens * dim)),
    )(attn2d, wo, bo.reshape(1, dim))

    # attn_drop / proj_drop with p=0.0 are identities.
    # TODO(synk): for dropout p>0 in training, draw masks in-kernel with
    # pltpu.prng_seed + pltpu.prng_random_bits and scale by 1/(1-p).
    return out2d.reshape(bs, seq, dim)


# ----------------------------------------------------------------------------
# parameters / reference
# ----------------------------------------------------------------------------
def init_attention_params(key, dim, dtype=jnp.float32):
    """Mimics nn.Linear init; weights stored as (in, out) so y = x @ W + b.
    (wq,bq,wk,bk,wv,bv) are the three chunks of torch's qkv_proj."""
    ks = jax.random.split(key, 8)
    bound = 1.0 / math.sqrt(dim)

    def lin(kw, kb):
        w = jax.random.uniform(kw, (dim, dim), dtype, -bound, bound)
        b = jax.random.uniform(kb, (dim,), dtype, -bound, bound)
        return w, b

    wq, bq = lin(ks[0], ks[1])
    wk, bk = lin(ks[2], ks[3])
    wv, bv = lin(ks[4], ks[5])
    wo, bo = lin(ks[6], ks[7])
    return (wq, bq, wk, bk, wv, bv, wo, bo)


def attention_reference(x, params, cos, sin, num_heads):
    wq, bq, wk, bk, wv, bv, wo, bo = params
    bs, seq, dim = x.shape
    hd = dim // num_heads
    q = (x @ wq + bq).reshape(bs, seq, num_heads, hd)
    k = (x @ wk + bk).reshape(bs, seq, num_heads, hd)
    v = (x @ wv + bv).reshape(bs, seq, num_heads, hd)

    def rope(t):
        t2 = t.reshape(bs, seq, num_heads, hd // 2, 2)
        a, b = t2[..., 0], t2[..., 1]
        c = cos[None, :, None, :]
        s = sin[None, :, None, :]
        out = jnp.stack([a * c - b * s, b * c + a * s], axis=-1)
        return out.reshape(bs, seq, num_heads, hd)

    q, k = rope(q), rope(k)
    q, k, v = (t.transpose(0, 2, 1, 3) for t in (q, k, v))
    scores = jnp.einsum('bhqd,bhkd->bhqk', q, k) / math.sqrt(hd)
    mask = jnp.tril(jnp.ones((seq, seq), dtype=bool))
    scores = jnp.where(mask[None, None], scores, -jnp.inf)
    w = jax.nn.softmax(scores, axis=-1)
    o = jnp.einsum('bhqk,bhkd->bhqd', w, v)
    o = o.transpose(0, 2, 1, 3).reshape(bs, seq, dim)
    return o @ wo + bo


# ----------------------------------------------------------------------------
# demo / self-test
# ----------------------------------------------------------------------------
if __name__ == "__main__":
    key = jax.random.PRNGKey(0)
    kx, kp = jax.random.split(key)

    batch, seq, dim, num_heads = 2, 16, 128, 8
    head_dim = dim // num_heads            # 16

    x = jax.random.normal(kx, (batch, seq, dim), jnp.float32)
    params = init_attention_params(kp, dim)

    # freqs_cis equivalent: cos/sin of shape (seq, head_dim // 2)
    inv_freq = 1.0 / (10000.0 ** (jnp.arange(0, head_dim, 2,
                                             dtype=jnp.float32) / head_dim))
    angles = jnp.arange(seq, dtype=jnp.float32)[:, None] * inv_freq[None, :]
    cos, sin = jnp.cos(angles), jnp.sin(angles)

    # seq_block=8 -> 2 query blocks / 3 lower-tri (qi, ki) pairs, exercising
    # init / accumulate / masked-diagonal / finalize paths of the flash grid.
    fwd = jax.jit(functools.partial(attention_forward, num_heads=num_heads,
                                    seq_block=8, token_block=32))
    out = jax.block_until_ready(fwd(x, params, cos, sin))

    ref = attention_reference(x, params, cos, sin, num_heads)
    assert out.shape == (batch, seq, dim)
    err = jnp.max(jnp.abs(out - ref))
    assert jnp.allclose(out, ref, atol=5e-3, rtol=5e-3), (
        f"mismatch vs reference, max abs err = {err}")

    print("KERNEL_OK")
</pallas_src>

<mosaic_0001>
module attributes {stable_mosaic.version = 11 : i64} {
  func.func @_out_proj_kernel(%arg0: i32, %arg1: i32, %arg2: memref<32x128xf32, #tpu.memory_space<vmem>>, %arg3: memref<128x128xf32, #tpu.memory_space<vmem>>, %arg4: memref<1x128xf32, #tpu.memory_space<vmem>>, %arg5: memref<32x128xf32, #tpu.memory_space<vmem>>) attributes {dimension_semantics = [#tpu.dimension_semantics<parallel>, #tpu.dimension_semantics<parallel>], iteration_bounds = array<i64: 1, 1>, scalar_prefetch = 0 : i64, scratch_operands = 0 : i64, tpu.core_type = #tpu.core_type<tc>, window_params = [{transform_indices = @transform_0, window_bounds = array<i64: 32, 128>}, {transform_indices = @transform_1, window_bounds = array<i64: 128, 128>}, {transform_indices = @transform_2, window_bounds = array<i64: 1, 128>}, {transform_indices = @transform_3, window_bounds = array<i64: 32, 128>}]} {
    %c0 = arith.constant 0 : index
    %c0_0 = arith.constant 0 : index
    %0 = vector.load %arg2[%c0, %c0_0] : memref<32x128xf32, #tpu.memory_space<vmem>>, vector<32x128xf32>
    %c0_1 = arith.constant 0 : index
    %c0_2 = arith.constant 0 : index
    %1 = vector.load %arg3[%c0_1, %c0_2] : memref<128x128xf32, #tpu.memory_space<vmem>>, vector<128x128xf32>
    %cst = arith.constant dense<0.000000e+00> : vector<32x128xf32>
    %2 = tpu.matmul %0, %1, %cst {dimension_numbers = #tpu.dot_dimension_numbers<[1], [0], [0], [1], [0, 0, 1, 1], [], []>} : vector<32x128xf32>, vector<128x128xf32>, vector<32x128xf32> -> vector<32x128xf32>
    %c0_3 = arith.constant 0 : index
    %c0_4 = arith.constant 0 : index
    %3 = vector.load %arg4[%c0_3, %c0_4] : memref<1x128xf32, #tpu.memory_space<vmem>>, vector<1x128xf32>
    %4 = vector.broadcast %3 : vector<1x128xf32> to vector<32x128xf32>
    %5 = arith.addf %2, %4 : vector<32x128xf32>
    %c0_5 = arith.constant 0 : index
    %c0_6 = arith.constant 0 : index
    %6 = vector.load %arg5[%c0_5, %c0_6] : memref<32x128xf32, #tpu.memory_space<vmem>>, vector<32x128xf32>
    tpu.vector_store %arg5[%c0_5, %c0_6], %5 {strides = array<i32>} : memref<32x128xf32, #tpu.memory_space<vmem>>, vector<32x128xf32>,
    return
  }
  func.func @transform_0(%arg0: i32, %arg1: i32) -> (i32, i32) {
    %c0_i32 = arith.constant 0 : i32
    %c0_i32_0 = arith.constant 0 : i32
    return %arg1, %c0_i32 : i32, i32
  }
  func.func @transform_1(%arg0: i32, %arg1: i32) -> (i32, i32) {
    %c0_i32 = arith.constant 0 : i32
    %c0_i32_0 = arith.constant 0 : i32
    return %c0_i32, %arg0 : i32, i32
  }
  func.func @transform_2(%arg0: i32, %arg1: i32) -> (i32, i32) {
    %c0_i32 = arith.constant 0 : i32
    %c0_i32_0 = arith.constant 0 : i32
    return %c0_i32, %arg0 : i32, i32
  }
  func.func @transform_3(%arg0: i32, %arg1: i32) -> (i32, i32) {
    %c0_i32 = arith.constant 0 : i32
    return %arg1, %arg0 : i32, i32
  }
}

module attributes {stable_mosaic.version = 11 : i64} {
  func.func @_qkv_rope_kernel(%arg0: i32, %arg1: i32, %arg2: i32, %arg3: memref<1x8x128xf32, #tpu.memory_space<vmem>>, %arg4: memref<128x128xf32, #tpu.memory_space<vmem>>, %arg5: memref<128x128xf32, #tpu.memory_space<vmem>>, %arg6: memref<128x128xf32, #tpu.memory_space<vmem>>, %arg7: memref<1x128xf32, #tpu.memory_space<vmem>>, %arg8: memref<1x128xf32, #tpu.memory_space<vmem>>, %arg9: memref<1x128xf32, #tpu.memory_space<vmem>>, %arg10: memref<8x16xf32, #tpu.memory_space<vmem>>, %arg11: memref<8x16xf32, #tpu.memory_space<vmem>>, %arg12: memref<1x8x128xf32, #tpu.memory_space<vmem>>, %arg13: memref<1x8x128xf32, #tpu.memory_space<vmem>>, %arg14: memref<1x8x128xf32, #tpu.memory_space<vmem>>) attributes {dimension_semantics = [#tpu.dimension_semantics<parallel>, #tpu.dimension_semantics<parallel>, #tpu.dimension_semantics<parallel>], iteration_bounds = array<i64: 1, 2, 2>, scalar_prefetch = 0 : i64, scratch_operands = 0 : i64, tpu.core_type = #tpu.core_type<tc>, window_params = [{transform_indices = @transform_0, window_bounds = array<i64: 1, 8, 128>}, {transform_indices = @transform_1, window_bounds = array<i64: 128, 128>}, {transform_indices = @transform_2, window_bounds = array<i64: 128, 128>}, {transform_indices = @transform_3, window_bounds = array<i64: 128, 128>}, {transform_indices = @transform_4, window_bounds = array<i64: 1, 128>}, {transform_indices = @transform_5, window_bounds = array<i64: 1, 128>}, {transform_indices = @transform_6, window_bounds = array<i64: 1, 128>}, {transform_indices = @transform_7, window_bounds = array<i64: 8, 16>}, {transform_indices = @transform_8, window_bounds = array<i64: 8, 16>}, {transform_indices = @transform_9, window_bounds = array<i64: 1, 8, 128>}, {transform_indices = @transform_10, window_bounds = array<i64: 1, 8, 128>}, {transform_indices = @transform_11, window_bounds = array<i64: 1, 8, 128>}]} {
    %c0 = arith.constant 0 : index
    %c0_0 = arith.constant 0 : index
    %c0_1 = arith.constant 0 : index
    %0 = vector.load %arg3[%c0, %c0_0, %c0_1] : memref<1x8x128xf32, #tpu.memory_space<vmem>>, vector<1x8x128xf32>
    %1 = vector.shape_cast %0 : vector<1x8x128xf32> to vector<8x128xf32>
    %c0_2 = arith.constant 0 : index
    %c0_3 = arith.constant 0 : index
    %2 = vector.load %arg10[%c0_2, %c0_3] : memref<8x16xf32, #tpu.memory_space<vmem>>, vector<8x16xf32>
    %3 = tpu.concatenate %2, %2, %2, %2, %2, %2, %2, %2 in 1 : vector<8x16xf32>, vector<8x16xf32>, vector<8x16xf32>, vector<8x16xf32>, vector<8x16xf32>, vector<8x16xf32>, vector<8x16xf32>, vector<8x16xf32> -> vector<8x128xf32>
    %c0_4 = arith.constant 0 : index
    %c0_5 = arith.constant 0 : index
    %4 = vector.load %arg11[%c0_4, %c0_5] : memref<8x16xf32, #tpu.memory_space<vmem>>, vector<8x16xf32>
    %5 = tpu.concatenate %4, %4, %4, %4, %4, %4, %4, %4 in 1 : vector<8x16xf32>, vector<8x16xf32>, vector<8x16xf32>, vector<8x16xf32>, vector<8x16xf32>, vector<8x16xf32>, vector<8x16xf32>, vector<8x16xf32> -> vector<8x128xf32>
    %6 = tpu.iota {dimensions = array<i32: 1>} : vector<8x128xi32>
    %c2_i32 = arith.constant 2 : i32
    %c0_i32 = arith.constant 0 : i32
    %7 = arith.cmpi eq, %c2_i32, %c0_i32 : i32
    %c1_i32 = arith.constant 1 : i32
    %8 = arith.select %7, %c1_i32, %c2_i32 : i32
    %9 = vector.broadcast %8 : i32 to vector<8x128xi32>
    %10 = arith.remsi %6, %9 : vector<8x128xi32>
    %c0_i32_6 = arith.constant 0 : i32
    %11 = vector.broadcast %c0_i32_6 : i32 to vector<8x128xi32>
    %12 = arith.cmpi ne, %10, %11 : vector<8x128xi32>
    %c0_i32_7 = arith.constant 0 : i32
    %13 = vector.broadcast %c0_i32_7 : i32 to vector<8x128xi32>
    %14 = arith.cmpi slt, %10, %13 : vector<8x128xi32>
    %c0_i32_8 = arith.constant 0 : i32
    %15 = arith.cmpi slt, %8, %c0_i32_8 : i32
    %16 = vector.broadcast %15 : i1 to vector<8x128xi1>
    %17 = vector.broadcast %16 : vector<8x128xi1> to vector<8x128xi1>
    %18 = arith.xori %14, %17 : vector<8x128xi1>
    %19 = arith.andi %18, %12 : vector<8x128xi1>
    %20 = vector.broadcast %8 : i32 to vector<8x128xi32>
    %21 = arith.addi %10, %20 : vector<8x128xi32>
    %22 = arith.select %19, %21, %10 : vector<8x128xi1>, vector<8x128xi32>
    %c0_i32_9 = arith.constant 0 : i32
    %23 = vector.broadcast %c0_i32_9 : i32 to vector<8x128xi32>
    %24 = arith.cmpi eq, %22, %23 : vector<8x128xi32>
    %c0_10 = arith.constant 0 : index
    %c0_11 = arith.constant 0 : index
    %25 = vector.load %arg4[%c0_10, %c0_11] : memref<128x128xf32, #tpu.memory_space<vmem>>, vector<128x128xf32>
    %cst = arith.constant dense<0.000000e+00> : vector<8x128xf32>
    %26 = tpu.matmul %1, %25, %cst {dimension_numbers = #tpu.dot_dimension_numbers<[1], [0], [0], [1], [0, 0, 1, 1], [], []>} : vector<8x128xf32>, vector<128x128xf32>, vector<8x128xf32> -> vector<8x128xf32>
    %c0_12 = arith.constant 0 : index
    %c0_13 = arith.constant 0 : index
    %27 = vector.load %arg7[%c0_12, %c0_13] : memref<1x128xf32, #tpu.memory_space<vmem>>, vector<1x128xf32>
    %28 = vector.broadcast %27 : vector<1x128xf32> to vector<8x128xf32>
    %29 = arith.addf %26, %28 : vector<8x128xf32>
    %c0_14 = arith.constant 0 : index
    %c0_15 = arith.constant 0 : index
    %30 = vector.load %arg5[%c0_14, %c0_15] : memref<128x128xf32, #tpu.memory_space<vmem>>, vector<128x128xf32>
    %cst_16 = arith.constant dense<0.000000e+00> : vector<8x128xf32>
    %31 = tpu.matmul %1, %30, %cst_16 {dimension_numbers = #tpu.dot_dimension_numbers<[1], [0], [0], [1], [0, 0, 1, 1], [], []>} : vector<8x128xf32>, vector<128x128xf32>, vector<8x128xf32> -> vector<8x128xf32>
    %c0_17 = arith.constant 0 : index
    %c0_18 = arith.constant 0 : index
    %32 = vector.load %arg8[%c0_17, %c0_18] : memref<1x128xf32, #tpu.memory_space<vmem>>, vector<1x128xf32>
    %33 = vector.broadcast %32 : vector<1x128xf32> to vector<8x128xf32>
    %34 = arith.addf %31, %33 : vector<8x128xf32>
    %c0_19 = arith.constant 0 : index
    %c0_20 = arith.constant 0 : index
    %35 = vector.load %arg6[%c0_19, %c0_20] : memref<128x128xf32, #tpu.memory_space<vmem>>, vector<128x128xf32>
    %cst_21 = arith.constant dense<0.000000e+00> : vector<8x128xf32>
    %36 = tpu.matmul %1, %35, %cst_21 {dimension_numbers = #tpu.dot_dimension_numbers<[1], [0], [0], [1], [0, 0, 1, 1], [], []>} : vector<8x128xf32>, vector<128x128xf32>, vector<8x128xf32> -> vector<8x128xf32>
    %c0_22 = arith.constant 0 : index
    %c0_23 = arith.constant 0 : index
    %37 = vector.load %arg9[%c0_22, %c0_23] : memref<1x128xf32, #tpu.memory_space<vmem>>, vector<1x128xf32>
    %38 = vector.broadcast %37 : vector<1x128xf32> to vector<8x128xf32>
    %39 = arith.addf %36, %38 : vector<8x128xf32>
    %40 = arith.mulf %29, %3 : vector<8x128xf32>
    %c127_i32 = arith.constant 127 : i32
    %41 = tpu.dynamic_rotate %29 by %c127_i32 dim 1 : vector<8x128xf32>, i32 -> vector<8x128xf32>
    %c1_i32_24 = arith.constant 1 : i32
    %42 = tpu.dynamic_rotate %29 by %c1_i32_24 dim 1 : vector<8x128xf32>, i32 -> vector<8x128xf32>
    %43 = arith.select %24, %41, %42 : vector<8x128xi1>, vector<8x128xf32>
    %44 = arith.mulf %43, %5 : vector<8x128xf32>
    %45 = arith.addf %40, %44 : vector<8x128xf32>
    %cst_25 = arith.constant 2.500000e-01 : f32
    %46 = vector.broadcast %cst_25 : f32 to vector<8x128xf32>
    %47 = arith.mulf %45, %46 : vector<8x128xf32>
    %c0_26 = arith.constant 0 : index
    %c0_27 = arith.constant 0 : index
    %c0_28 = arith.constant 0 : index
    %48 = vector.load %arg12[%c0_26, %c0_27, %c0_28] : memref<1x8x128xf32, #tpu.memory_space<vmem>>, vector<1x8x128xf32>
    %49 = vector.shape_cast %48 : vector<1x8x128xf32> to vector<8x128xf32>
    %50 = vector.shape_cast %47 : vector<8x128xf32> to vector<1x8x128xf32>
    tpu.vector_store %arg12[%c0_26, %c0_27, %c0_28], %50 {strides = array<i32>} : memref<1x8x128xf32, #tpu.memory_space<vmem>>, vector<1x8x128xf32>,
    %51 = arith.mulf %34, %3 : vector<8x128xf32>
    %c127_i32_29 = arith.constant 127 : i32
    %52 = tpu.dynamic_rotate %34 by %c127_i32_29 dim 1 : vector<8x128xf32>, i32 -> vector<8x128xf32>
    %c1_i32_30 = arith.constant 1 : i32
    %53 = tpu.dynamic_rotate %34 by %c1_i32_30 dim 1 : vector<8x128xf32>, i32 -> vector<8x128xf32>
    %54 = arith.select %24, %52, %53 : vector<8x128xi1>, vector<8x128xf32>
    %55 = arith.mulf %54, %5 : vector<8x128xf32>
    %56 = arith.addf %51, %55 : vector<8x128xf32>
    %c0_31 = arith.constant 0 : index
    %c0_32 = arith.constant 0 : index
    %c0_33 = arith.constant 0 : index
    %57 = vector.load %arg13[%c0_31, %c0_32, %c0_33] : memref<1x8x128xf32, #tpu.memory_space<vmem>>, vector<1x8x128xf32>
    %58 = vector.shape_cast %57 : vector<1x8x128xf32> to vector<8x128xf32>
    %59 = vector.shape_cast %56 : vector<8x128xf32> to vector<1x8x128xf32>
    tpu.vector_store %arg13[%c0_31, %c0_32, %c0_33], %59 {strides = array<i32>} : memref<1x8x128xf32, #tpu.memory_space<vmem>>, vector<1x8x128xf32>,
    %c0_34 = arith.constant 0 : index
    %c0_35 = arith.constant 0 : index
    %c0_36 = arith.constant 0 : index
    %60 = vector.load %arg14[%c0_34, %c0_35, %c0_36] : memref<1x8x128xf32, #tpu.memory_space<vmem>>, vector<1x8x128xf32>
    %61 = vector.shape_cast %60 : vector<1x8x128xf32> to vector<8x128xf32>
    %62 = vector.shape_cast %39 : vector<8x128xf32> to vector<1x8x128xf32>
    tpu.vector_store %arg14[%c0_34, %c0_35, %c0_36], %62 {strides = array<i32>} : memref<1x8x128xf32, #tpu.memory_space<vmem>>, vector<1x8x128xf32>,
    return
  }
  func.func @transform_0(%arg0: i32, %arg1: i32, %arg2: i32) -> (i32, i32, i32) {
    %c0_i32 = arith.constant 0 : i32
    %c0_i32_0 = arith.constant 0 : i32
    return %arg1, %arg2, %c0_i32 : i32, i32, i32
  }
  func.func @transform_1(%arg0: i32, %arg1: i32, %arg2: i32) -> (i32, i32) {
    %c0_i32 = arith.constant 0 : i32
    %c0_i32_0 = arith.constant 0 : i32
    return %c0_i32, %arg0 : i32, i32
  }
  func.func @transform_2(%arg0: i32, %arg1: i32, %arg2: i32) -> (i32, i32) {
    %c0_i32 = arith.constant 0 : i32
    %c0_i32_0 = arith.constant 0 : i32
    return %c0_i32, %arg0 : i32, i32
  }
  func.func @transform_3(%arg0: i32, %arg1: i32, %arg2: i32) -> (i32, i32) {
    %c0_i32 = arith.constant 0 : i32
    %c0_i32_0 = arith.constant 0 : i32
    return %c0_i32, %arg0 : i32, i32
  }
  func.func @transform_4(%arg0: i32, %arg1: i32, %arg2: i32) -> (i32, i32) {
    %c0_i32 = arith.constant 0 : i32
    %c0_i32_0 = arith.constant 0 : i32
    return %c0_i32, %arg0 : i32, i32
  }
  func.func @transform_5(%arg0: i32, %arg1: i32, %arg2: i32) -> (i32, i32) {
    %c0_i32 = arith.constant 0 : i32
    %c0_i32_0 = arith.constant 0 : i32
    return %c0_i32, %arg0 : i32, i32
  }
  func.func @transform_6(%arg0: i32, %arg1: i32, %arg2: i32) -> (i32, i32) {
    %c0_i32 = arith.constant 0 : i32
    %c0_i32_0 = arith.constant 0 : i32
    return %c0_i32, %arg0 : i32, i32
  }
  func.func @transform_7(%arg0: i32, %arg1: i32, %arg2: i32) -> (i32, i32) {
    %c0_i32 = arith.constant 0 : i32
    %c0_i32_0 = arith.constant 0 : i32
    return %arg2, %c0_i32 : i32, i32
  }
  func.func @transform_8(%arg0: i32, %arg1: i32, %arg2: i32) -> (i32, i32) {
    %c0_i32 = arith.constant 0 : i32
    %c0_i32_0 = arith.constant 0 : i32
    return %arg2, %c0_i32 : i32, i32
  }
  func.func @transform_9(%arg0: i32, %arg1: i32, %arg2: i32) -> (i32, i32, i32) {
    %c0_i32 = arith.constant 0 : i32
    return %arg1, %arg2, %arg0 : i32, i32, i32
  }
  func.func @transform_10(%arg0: i32, %arg1: i32, %arg2: i32) -> (i32, i32, i32) {
    %c0_i32 = arith.constant 0 : i32
    return %arg1, %arg2, %arg0 : i32, i32, i32
  }
  func.func @transform_11(%arg0: i32, %arg1: i32, %arg2: i32) -> (i32, i32, i32) {
    %c0_i32 = arith.constant 0 : i32
    return %arg1, %arg2, %arg0 : i32, i32, i32
  }
}

module attributes {stable_mosaic.version = 11 : i64} {
  func.func @_flash_attn_kernel(%arg0: i32, %arg1: i32, %arg2: memref<3xi32, #tpu.memory_space<smem>>, %arg3: memref<3xi32, #tpu.memory_space<smem>>, %arg4: memref<1x8x128xf32, #tpu.memory_space<vmem>>, %arg5: memref<1x8x128xf32, #tpu.memory_space<vmem>>, %arg6: memref<1x8x128xf32, #tpu.memory_space<vmem>>, %arg7: memref<1x8x128xf32, #tpu.memory_space<vmem>>, %arg8: memref<8x8x1xf32, #tpu.memory_space<vmem>>, %arg9: memref<8x8x1xf32, #tpu.memory_space<vmem>>, %arg10: memref<8x8x16xf32, #tpu.memory_space<vmem>>) attributes {dimension_semantics = [#tpu.dimension_semantics<parallel>, #tpu.dimension_semantics<arbitrary>], iteration_bounds = array<i64: 2, 3>, scalar_prefetch = 2 : i64, scratch_operands = 3 : i64, tpu.core_type = #tpu.core_type<tc>, window_params = [{transform_indices = @transform_0, window_bounds = array<i64: 1, 8, 128>}, {transform_indices = @transform_1, window_bounds = array<i64: 1, 8, 128>}, {transform_indices = @transform_2, window_bounds = array<i64: 1, 8, 128>}, {transform_indices = @transform_3, window_bounds = array<i64: 1, 8, 128>}]} {
    %0 = arith.index_cast %arg1 : i32 to index
    %1 = memref.load %arg2[%0] : memref<3xi32, #tpu.memory_space<smem>>
    %2 = arith.index_cast %arg1 : i32 to index
    %3 = memref.load %arg3[%2] : memref<3xi32, #tpu.memory_space<smem>>
    %c0_i32 = arith.constant 0 : i32
    %4 = arith.cmpi eq, %3, %c0_i32 : i32
    %5 = arith.extui %4 : i1 to i32
    %c0_i32_0 = arith.constant 0 : i32
    %6 = arith.cmpi ne, %5, %c0_i32_0 : i32
    scf.if %6 {
      %cst = arith.constant -1.000000e+30 : f32
      %13 = vector.broadcast %cst : f32 to vector<8x8x1xf32>
      %c0 = arith.constant 0 : index
      %c0_3 = arith.constant 0 : index
      %c0_4 = arith.constant 0 : index
      %14 = vector.load %arg8[%c0, %c0_3, %c0_4] : memref<8x8x1xf32, #tpu.memory_space<vmem>>, vector<8x8x1xf32>
      tpu.vector_store %arg8[%c0, %c0_3, %c0_4], %13 {strides = array<i32>} : memref<8x8x1xf32, #tpu.memory_space<vmem>>, vector<8x8x1xf32>,
      %cst_5 = arith.constant 0.000000e+00 : f32
      %15 = vector.broadcast %cst_5 : f32 to vector<8x8x1xf32>
      %c0_6 = arith.constant 0 : index
      %c0_7 = arith.constant 0 : index
      %c0_8 = arith.constant 0 : index
      %16 = vector.load %arg9[%c0_6, %c0_7, %c0_8] : memref<8x8x1xf32, #tpu.memory_space<vmem>>, vector<8x8x1xf32>
      tpu.vector_store %arg9[%c0_6, %c0_7, %c0_8], %15 {strides = array<i32>} : memref<8x8x1xf32, #tpu.memory_space<vmem>>, vector<8x8x1xf32>,
      %cst_9 = arith.constant 0.000000e+00 : f32
      %17 = vector.broadcast %cst_9 : f32 to vector<8x8x16xf32>
      %c0_10 = arith.constant 0 : index
      %c0_11 = arith.constant 0 : index
      %c0_12 = arith.constant 0 : index
      %18 = vector.load %arg10[%c0_10, %c0_11, %c0_12] : memref<8x8x16xf32, #tpu.memory_space<vmem>>, vector<8x8x16xf32>
      tpu.vector_store %arg10[%c0_10, %c0_11, %c0_12], %17 {strides = array<i32>} : memref<8x8x16xf32, #tpu.memory_space<vmem>>, vector<8x8x16xf32>,
    } else {
    }
    %7 = arith.cmpi slt, %3, %1 : i32
    %8 = arith.extui %7 : i1 to i32
    %c0_i32_1 = arith.constant 0 : i32
    %9 = arith.cmpi ne, %8, %c0_i32_1 : i32
    scf.if %9 {
      %c0 = arith.constant 0 : index
      %c0_3 = arith.constant 0 : index
      %c0_4 = arith.constant 0 : index
      %13 = vector.load %arg4[%c0, %c0_3, %c0_4] : memref<1x8x128xf32, #tpu.memory_space<vmem>>, vector<1x8x16xf32>
      %14 = vector.shape_cast %13 : vector<1x8x16xf32> to vector<8x16xf32>
      %c0_5 = arith.constant 0 : index
      %c0_6 = arith.constant 0 : index
      %c0_7 = arith.constant 0 : index
      %15 = vector.load %arg5[%c0_5, %c0_6, %c0_7] : memref<1x8x128xf32, #tpu.memory_space<vmem>>, vector<1x8x16xf32>
      %16 = vector.shape_cast %15 : vector<1x8x16xf32> to vector<8x16xf32>
      %c0_8 = arith.constant 0 : index
      %c0_9 = arith.constant 0 : index
      %c0_10 = arith.constant 0 : index
      %17 = vector.load %arg6[%c0_8, %c0_9, %c0_10] : memref<1x8x128xf32, #tpu.memory_space<vmem>>, vector<1x8x16xf32>
      %18 = vector.shape_cast %17 : vector<1x8x16xf32> to vector<8x16xf32>
      %cst = arith.constant dense<0.000000e+00> : vector<8x8xf32>
      %19 = tpu.matmul %14, %16, %cst {dimension_numbers = #tpu.dot_dimension_numbers<[1], [1], [0], [0], [0, 0, 1, 0], [], []>} : vector<8x16xf32>, vector<8x16xf32>, vector<8x8xf32> -> vector<8x8xf32>
      %c0_11 = arith.constant 0 : index
      %c0_12 = arith.constant 0 : index
      %c0_13 = arith.constant 0 : index
      %20 = vector.load %arg8[%c0_11, %c0_12, %c0_13] : memref<8x8x1xf32, #tpu.memory_space<vmem>>, vector<1x8x1xf32>
      %21 = vector.shape_cast %20 : vector<1x8x1xf32> to vector<8x1xf32>
      %cst_14 = arith.constant dense<0xFF800000> : vector<8xf32>
      %22 = vector.multi_reduction <maximumf>, %19, %cst_14 [1] : vector<8x8xf32> to vector<8xf32>
      %23 = vector.shape_cast %22 : vector<8xf32> to vector<8x1xf32>
      %24 = arith.maximumf %21, %23 : vector<8x1xf32>
      %25 = arith.subf %21, %24 : vector<8x1xf32>
      %26 = math.exp %25 : vector<8x1xf32>
      %27 = vector.broadcast %24 : vector<8x1xf32> to vector<8x8xf32>
      %28 = arith.subf %19, %27 : vector<8x8xf32>
      %29 = math.exp %28 : vector<8x8xf32>
      %c0_15 = arith.constant 0 : index
      %c0_16 = arith.constant 0 : index
      %c0_17 = arith.constant 0 : index
      %30 = vector.load %arg9[%c0_15, %c0_16, %c0_17] : memref<8x8x1xf32, #tpu.memory_space<vmem>>, vector<1x8x1xf32>
      %31 = vector.shape_cast %30 : vector<1x8x1xf32> to vector<8x1xf32>
      %32 = arith.mulf %26, %31 : vector<8x1xf32>
      %cst_18 = arith.constant dense<0.000000e+00> : vector<8xf32>
      %33 = vector.multi_reduction <add>, %29, %cst_18 [1] : vector<8x8xf32> to vector<8xf32>
      %34 = vector.shape_cast %33 : vector<8xf32> to vector<8x1xf32>
      %35 = arith.addf %32, %34 : vector<8x1xf32>
      %c0_19 = arith.constant 0 : index
      %c0_20 = arith.constant 0 : index
      %c0_21 = arith.constant 0 : index
      %36 = vector.load %arg9[%c0_19, %c0_20, %c0_21] : memref<8x8x1xf32, #tpu.memory_space<vmem>>, vector<1x8x1xf32>
      %37 = vector.shape_cast %36 : vector<1x8x1xf32> to vector<8x1xf32>
      %38 = vector.shape_cast %35 : vector<8x1xf32> to vector<1x8x1xf32>
      tpu.vector_store %arg9[%c0_19, %c0_20, %c0_21], %38 {strides = array<i32>} : memref<8x8x1xf32, #tpu.memory_space<vmem>>, vector<1x8x1xf32>,
      %c0_22 = arith.constant 0 : index
      %c0_23 = arith.constant 0 : index
      %c0_24 = arith.constant 0 : index
      %39 = vector.load %arg10[%c0_22, %c0_23, %c0_24] : memref<8x8x16xf32, #tpu.memory_space<vmem>>, vector<1x8x16xf32>
      %40 = vector.shape_cast %39 : vector<1x8x16xf32> to vector<8x16xf32>
      %41 = vector.broadcast %26 : vector<8x1xf32> to vector<8x16xf32>
      %42 = arith.mulf %41, %40 : vector<8x16xf32>
      %cst_25 = arith.constant dense<0.000000e+00> : vector<8x16xf32>
      %43 = tpu.matmul %29, %18, %cst_25 {dimension_numbers = #tpu.dot_dimension_numbers<[1], [0], [0], [1], [0, 0, 1, 1], [], []>} : vector<8x8xf32>, vector<8x16xf32>, vector<8x16xf32> -> vector<8x16xf32>
      %44 = arith.addf %42, %43 : vector<8x16xf32>
      %c0_26 = arith.constant 0 : index
      %c0_27 = arith.constant 0 : index
      %c0_28 = arith.constant 0 : index
      %45 = vector.load %arg10[%c0_26, %c0_27, %c0_28] : memref<8x8x16xf32, #tpu.memory_space<vmem>>, vector<1x8x16xf32>
      %46 = vector.shape_cast %45 : vector<1x8x16xf32> to vector<8x16xf32>
      %47 = vector.shape_cast %44 : vector<8x16xf32> to vector<1x8x16xf32>
      tpu.vector_store %arg10[%c0_26, %c0_27, %c0_28], %47 {strides = array<i32>} : memref<8x8x16xf32, #tpu.memory_space<vmem>>, vector<1x8x16xf32>,
      %c0_29 = arith.constant 0 : index
      %c0_30 = arith.constant 0 : index
      %c0_31 = arith.constant 0 : index
      %48 = vector.load %arg8[%c0_29, %c0_30, %c0_31] : memref<8x8x1xf32, #tpu.memory_space<vmem>>, vector<1x8x1xf32>
      %49 = vector.shape_cast %48 : vector<1x8x1xf32> to vector<8x1xf32>
      %50 = vector.shape_cast %24 : vector<8x1xf32> to vector<1x8x1xf32>
      tpu.vector_store %arg8[%c0_29, %c0_30, %c0_31], %50 {strides = array<i32>} : memref<8x8x1xf32, #tpu.memory_space<vmem>>, vector<1x8x1xf32>,
      %c0_32 = arith.constant 0 : index
      %c0_33 = arith.constant 0 : index
      %c16 = arith.constant 16 : index
      %51 = vector.load %arg4[%c0_32, %c0_33, %c16] : memref<1x8x128xf32, #tpu.memory_space<vmem>>, vector<1x8x16xf32>
      %52 = vector.shape_cast %51 : vector<1x8x16xf32> to vector<8x16xf32>
      %c0_34 = arith.constant 0 : index
      %c0_35 = arith.constant 0 : index
      %c16_36 = arith.constant 16 : index
      %53 = vector.load %arg5[%c0_34, %c0_35, %c16_36] : memref<1x8x128xf32, #tpu.memory_space<vmem>>, vector<1x8x16xf32>
      %54 = vector.shape_cast %53 : vector<1x8x16xf32> to vector<8x16xf32>
      %c0_37 = arith.constant 0 : index
      %c0_38 = arith.constant 0 : index
      %c16_39 = arith.constant 16 : index
      %55 = vector.load %arg6[%c0_37, %c0_38, %c16_39] : memref<1x8x128xf32, #tpu.memory_space<vmem>>, vector<1x8x16xf32>
      %56 = vector.shape_cast %55 : vector<1x8x16xf32> to vector<8x16xf32>
      %cst_40 = arith.constant dense<0.000000e+00> : vector<8x8xf32>
      %57 = tpu.matmul %52, %54, %cst_40 {dimension_numbers = #tpu.dot_dimension_numbers<[1], [1], [0], [0], [0, 0, 1, 0], [], []>} : vector<8x16xf32>, vector<8x16xf32>, vector<8x8xf32> -> vector<8x8xf32>
      %c1 = arith.constant 1 : index
      %c0_41 = arith.constant 0 : index
      %c0_42 = arith.constant 0 : index
      %58 = vector.load %arg8[%c1, %c0_41, %c0_42] : memref<8x8x1xf32, #tpu.memory_space<vmem>>, vector<1x8x1xf32>
      %59 = vector.shape_cast %58 : vector<1x8x1xf32> to vector<8x1xf32>
      %cst_43 = arith.constant dense<0xFF800000> : vector<8xf32>
      %60 = vector.multi_reduction <maximumf>, %57, %cst_43 [1] : vector<8x8xf32> to vector<8xf32>
      %61 = vector.shape_cast %60 : vector<8xf32> to vector<8x1xf32>
      %62 = arith.maximumf %59, %61 : vector<8x1xf32>
      %63 = arith.subf %59, %62 : vector<8x1xf32>
      %64 = math.exp %63 : vector<8x1xf32>
      %65 = vector.broadcast %62 : vector<8x1xf32> to vector<8x8xf32>
      %66 = arith.subf %57, %65 : vector<8x8xf32>
      %67 = math.exp %66 : vector<8x8xf32>
      %c1_44 = arith.constant 1 : index
      %c0_45 = arith.constant 0 : index
      %c0_46 = arith.constant 0 : index
      %68 = vector.load %arg9[%c1_44, %c0_45, %c0_46] : memref<8x8x1xf32, #tpu.memory_space<vmem>>, vector<1x8x1xf32>
      %69 = vector.shape_cast %68 : vector<1x8x1xf32> to vector<8x1xf32>
      %70 = arith.mulf %64, %69 : vector<8x1xf32>
      %cst_47 = arith.constant dense<0.000000e+00> : vector<8xf32>
      %71 = vector.multi_reduction <add>, %67, %cst_47 [1] : vector<8x8xf32> to vector<8xf32>
      %72 = vector.shape_cast %71 : vector<8xf32> to vector<8x1xf32>
      %73 = arith.addf %70, %72 : vector<8x1xf32>
      %c1_48 = arith.constant 1 : index
      %c0_49 = arith.constant 0 : index
      %c0_50 = arith.constant 0 : index
      %74 = vector.load %arg9[%c1_48, %c0_49, %c0_50] : memref<8x8x1xf32, #tpu.memory_space<vmem>>, vector<1x8x1xf32>
      %75 = vector.shape_cast %74 : vector<1x8x1xf32> to vector<8x1xf32>
      %76 = vector.shape_cast %73 : vector<8x1xf32> to vector<1x8x1xf32>
      tpu.vector_store %arg9[%c1_48, %c0_49, %c0_50], %76 {strides = array<i32>} : memref<8x8x1xf32, #tpu.memory_space<vmem>>, vector<1x8x1xf32>,
      %c1_51 = arith.constant 1 : index
      %c0_52 = arith.constant 0 : index
      %c0_53 = arith.constant 0 : index
      %77 = vector.load %arg10[%c1_51, %c0_52, %c0_53] : memref<8x8x16xf32, #tpu.memory_space<vmem>>, vector<1x8x16xf32>
      %78 = vector.shape_cast %77 : vector<1x8x16xf32> to vector<8x16xf32>
      %79 = vector.broadcast %64 : vector<8x1xf32> to vector<8x16xf32>
      %80 = arith.mulf %79, %78 : vector<8x16xf32>
      %cst_54 = arith.constant dense<0.000000e+00> : vector<8x16xf32>
      %81 = tpu.matmul %67, %56, %cst_54 {dimension_numbers = #tpu.dot_dimension_numbers<[1], [0], [0], [1], [0, 0, 1, 1], [], []>} : vector<8x8xf32>, vector<8x16xf32>, vector<8x16xf32> -> vector<8x16xf32>
      %82 = arith.addf %80, %81 : vector<8x16xf32>
      %c1_55 = arith.constant 1 : index
      %c0_56 = arith.constant 0 : index
      %c0_57 = arith.constant 0 : index
      %83 = vector.load %arg10[%c1_55, %c0_56, %c0_57] : memref<8x8x16xf32, #tpu.memory_space<vmem>>, vector<1x8x16xf32>
      %84 = vector.shape_cast %83 : vector<1x8x16xf32> to vector<8x16xf32>
      %85 = vector.shape_cast %82 : vector<8x16xf32> to vector<1x8x16xf32>
      tpu.vector_store %arg10[%c1_55, %c0_56, %c0_57], %85 {strides = array<i32>} : memref<8x8x16xf32, #tpu.memory_space<vmem>>, vector<1x8x16xf32>,
      %c1_58 = arith.constant 1 : index
      %c0_59 = arith.constant 0 : index
      %c0_60 = arith.constant 0 : index
      %86 = vector.load %arg8[%c1_58, %c0_59, %c0_60] : memref<8x8x1xf32, #tpu.memory_space<vmem>>, vector<1x8x1xf32>
      %87 = vector.shape_cast %86 : vector<1x8x1xf32> to vector<8x1xf32>
      %88 = vector.shape_cast %62 : vector<8x1xf32> to vector<1x8x1xf32>
      tpu.vector_store %arg8[%c1_58, %c0_59, %c0_60], %88 {strides = array<i32>} : memref<8x8x1xf32, #tpu.memory_space<vmem>>, vector<1x8x1xf32>,
      %c0_61 = arith.constant 0 : index
      %c0_62 = arith.constant 0 : index
      %c32 = arith.constant 32 : index
      %89 = vector.load %arg4[%c0_61, %c0_62, %c32] : memref<1x8x128xf32, #tpu.memory_space<vmem>>, vector<1x8x16xf32>
      %90 = vector.shape_cast %89 : vector<1x8x16xf32> to vector<8x16xf32>
      %c0_63 = arith.constant 0 : index
      %c0_64 = arith.constant 0 : index
      %c32_65 = arith.constant 32 : index
      %91 = vector.load %arg5[%c0_63, %c0_64, %c32_65] : memref<1x8x128xf32, #tpu.memory_space<vmem>>, vector<1x8x16xf32>
      %92 = vector.shape_cast %91 : vector<1x8x16xf32> to vector<8x16xf32>
      %c0_66 = arith.constant 0 : index
      %c0_67 = arith.constant 0 : index
      %c32_68 = arith.constant 32 : index
      %93 = vector.load %arg6[%c0_66, %c0_67, %c32_68] : memref<1x8x128xf32, #tpu.memory_space<vmem>>, vector<1x8x16xf32>
      %94 = vector.shape_cast %93 : vector<1x8x16xf32> to vector<8x16xf32>
      %cst_69 = arith.constant dense<0.000000e+00> : vector<8x8xf32>
      %95 = tpu.matmul %90, %92, %cst_69 {dimension_numbers = #tpu.dot_dimension_numbers<[1], [1], [0], [0], [0, 0, 1, 0], [], []>} : vector<8x16xf32>, vector<8x16xf32>, vector<8x8xf32> -> vector<8x8xf32>
      %c2 = arith.constant 2 : index
      %c0_70 = arith.constant 0 : index
      %c0_71 = arith.constant 0 : index
      %96 = vector.load %arg8[%c2, %c0_70, %c0_71] : memref<8x8x1xf32, #tpu.memory_space<vmem>>, vector<1x8x1xf32>
      %97 = vector.shape_cast %96 : vector<1x8x1xf32> to vector<8x1xf32>
      %cst_72 = arith.constant dense<0xFF800000> : vector<8xf32>
      %98 = vector.multi_reduction <maximumf>, %95, %cst_72 [1] : vector<8x8xf32> to vector<8xf32>
      %99 = vector.shape_cast %98 : vector<8xf32> to vector<8x1xf32>
      %100 = arith.maximumf %97, %99 : vector<8x1xf32>
      %101 = arith.subf %97, %100 : vector<8x1xf32>
      %102 = math.exp %101 : vector<8x1xf32>
      %103 = vector.broadcast %100 : vector<8x1xf32> to vector<8x8xf32>
      %104 = arith.subf %95, %103 : vector<8x8xf32>
      %105 = math.exp %104 : vector<8x8xf32>
      %c2_73 = arith.constant 2 : index
      %c0_74 = arith.constant 0 : index
      %c0_75 = arith.constant 0 : index
      %106 = vector.load %arg9[%c2_73, %c0_74, %c0_75] : memref<8x8x1xf32, #tpu.memory_space<vmem>>, vector<1x8x1xf32>
      %107 = vector.shape_cast %106 : vector<1x8x1xf32> to vector<8x1xf32>
      %108 = arith.mulf %102, %107 : vector<8x1xf32>
      %cst_76 = arith.constant dense<0.000000e+00> : vector<8xf32>
      %109 = vector.multi_reduction <add>, %105, %cst_76 [1] : vector<8x8xf32> to vector<8xf32>
      %110 = vector.shape_cast %109 : vector<8xf32> to vector<8x1xf32>
      %111 = arith.addf %108, %110 : vector<8x1xf32>
      %c2_77 = arith.constant 2 : index
      %c0_78 = arith.constant 0 : index
      %c0_79 = arith.constant 0 : index
      %112 = vector.load %arg9[%c2_77, %c0_78, %c0_79] : memref<8x8x1xf32, #tpu.memory_space<vmem>>, vector<1x8x1xf32>
      %113 = vector.shape_cast %112 : vector<1x8x1xf32> to vector<8x1xf32>
      %114 = vector.shape_cast %111 : vector<8x1xf32> to vector<1x8x1xf32>
      tpu.vector_store %arg9[%c2_77, %c0_78, %c0_79], %114 {strides = array<i32>} : memref<8x8x1xf32, #tpu.memory_space<vmem>>, vector<1x8x1xf32>,
      %c2_80 = arith.constant 2 : index
      %c0_81 = arith.constant 0 : index
      %c0_82 = arith.constant 0 : index
      %115 = vector.load %arg10[%c2_80, %c0_81, %c0_82] : memref<8x8x16xf32, #tpu.memory_space<vmem>>, vector<1x8x16xf32>
      %116 = vector.shape_cast %115 : vector<1x8x16xf32> to vector<8x16xf32>
      %117 = vector.broadcast %102 : vector<8x1xf32> to vector<8x16xf32>
      %118 = arith.mulf %117, %116 : vector<8x16xf32>
      %cst_83 = arith.constant dense<0.000000e+00> : vector<8x16xf32>
      %119 = tpu.matmul %105, %94, %cst_83 {dimension_numbers = #tpu.dot_dimension_numbers<[1], [0], [0], [1], [0, 0, 1, 1], [], []>} : vector<8x8xf32>, vector<8x16xf32>, vector<8x16xf32> -> vector<8x16xf32>
      %120 = arith.addf %118, %119 : vector<8x16xf32>
      %c2_84 = arith.constant 2 : index
      %c0_85 = arith.constant 0 : index
      %c0_86 = arith.constant 0 : index
      %121 = vector.load %arg10[%c2_84, %c0_85, %c0_86] : memref<8x8x16xf32, #tpu.memory_space<vmem>>, vector<1x8x16xf32>
      %122 = vector.shape_cast %121 : vector<1x8x16xf32> to vector<8x16xf32>
      %123 = vector.shape_cast %120 : vector<8x16xf32> to vector<1x8x16xf32>
      tpu.vector_store %arg10[%c2_84, %c0_85, %c0_86], %123 {strides = array<i32>} : memref<8x8x16xf32, #tpu.memory_space<vmem>>, vector<1x8x16xf32>,
      %c2_87 = arith.constant 2 : index
      %c0_88 = arith.constant 0 : index
      %c0_89 = arith.constant 0 : index
      %124 = vector.load %arg8[%c2_87, %c0_88, %c0_89] : memref<8x8x1xf32, #tpu.memory_space<vmem>>, vector<1x8x1xf32>
      %125 = vector.shape_cast %124 : vector<1x8x1xf32> to vector<8x1xf32>
      %126 = vector.shape_cast %100 : vector<8x1xf32> to vector<1x8x1xf32>
      tpu.vector_store %arg8[%c2_87, %c0_88, %c0_89], %126 {strides = array<i32>} : memref<8x8x1xf32, #tpu.memory_space<vmem>>, vector<1x8x1xf32>,
      %c0_90 = arith.constant 0 : index
      %c0_91 = arith.constant 0 : index
      %c48 = arith.constant 48 : index
      %127 = vector.load %arg4[%c0_90, %c0_91, %c48] : memref<1x8x128xf32, #tpu.memory_space<vmem>>, vector<1x8x16xf32>
      %128 = vector.shape_cast %127 : vector<1x8x16xf32> to vector<8x16xf32>
      %c0_92 = arith.constant 0 : index
      %c0_93 = arith.constant 0 : index
      %c48_94 = arith.constant 48 : index
      %129 = vector.load %arg5[%c0_92, %c0_93, %c48_94] : memref<1x8x128xf32, #tpu.memory_space<vmem>>, vector<1x8x16xf32>
      %130 = vector.shape_cast %129 : vector<1x8x16xf32> to vector<8x16xf32>
      %c0_95 = arith.constant 0 : index
      %c0_96 = arith.constant 0 : index
      %c48_97 = arith.constant 48 : index
      %131 = vector.load %arg6[%c0_95, %c0_96, %c48_97] : memref<1x8x128xf32, #tpu.memory_space<vmem>>, vector<1x8x16xf32>
      %132 = vector.shape_cast %131 : vector<1x8x16xf32> to vector<8x16xf32>
      %cst_98 = arith.constant dense<0.000000e+00> : vector<8x8xf32>
      %133 = tpu.matmul %128, %130, %cst_98 {dimension_numbers = #tpu.dot_dimension_numbers<[1], [1], [0], [0], [0, 0, 1, 0], [], []>} : vector<8x16xf32>, vector<8x16xf32>, vector<8x8xf32> -> vector<8x8xf32>
      %c3 = arith.constant 3 : index
      %c0_99 = arith.constant 0 : index
      %c0_100 = arith.constant 0 : index
      %134 = vector.load %arg8[%c3, %c0_99, %c0_100] : memref<8x8x1xf32, #tpu.memory_space<vmem>>, vector<1x8x1xf32>
      %135 = vector.shape_cast %134 : vector<1x8x1xf32> to vector<8x1xf32>
      %cst_101 = arith.constant dense<0xFF800000> : vector<8xf32>
      %136 = vector.multi_reduction <maximumf>, %133, %cst_101 [1] : vector<8x8xf32> to vector<8xf32>
      %137 = vector.shape_cast %136 : vector<8xf32> to vector<8x1xf32>
      %138 = arith.maximumf %135, %137 : vector<8x1xf32>
      %139 = arith.subf %135, %138 : vector<8x1xf32>
      %140 = math.exp %139 : vector<8x1xf32>
      %141 = vector.broadcast %138 : vector<8x1xf32> to vector<8x8xf32>
      %142 = arith.subf %133, %141 : vector<8x8xf32>
      %143 = math.exp %142 : vector<8x8xf32>
      %c3_102 = arith.constant 3 : index
      %c0_103 = arith.constant 0 : index
      %c0_104 = arith.constant 0 : index
      %144 = vector.load %arg9[%c3_102, %c0_103, %c0_104] : memref<8x8x1xf32, #tpu.memory_space<vmem>>, vector<1x8x1xf32>
      %145 = vector.shape_cast %144 : vector<1x8x1xf32> to vector<8x1xf32>
      %146 = arith.mulf %140, %145 : vector<8x1xf32>
      %cst_105 = arith.constant dense<0.000000e+00> : vector<8xf32>
      %147 = vector.multi_reduction <add>, %143, %cst_105 [1] : vector<8x8xf32> to vector<8xf32>
      %148 = vector.shape_cast %147 : vector<8xf32> to vector<8x1xf32>
      %149 = arith.addf %146, %148 : vector<8x1xf32>
      %c3_106 = arith.constant 3 : index
      %c0_107 = arith.constant 0 : index
      %c0_108 = arith.constant 0 : index
      %150 = vector.load %arg9[%c3_106, %c0_107, %c0_108] : memref<8x8x1xf32, #tpu.memory_space<vmem>>, vector<1x8x1xf32>
      %151 = vector.shape_cast %150 : vector<1x8x1xf32> to vector<8x1xf32>
      %152 = vector.shape_cast %149 : vector<8x1xf32> to vector<1x8x1xf32>
      tpu.vector_store %arg9[%c3_106, %c0_107, %c0_108], %152 {strides = array<i32>} : memref<8x8x1xf32, #tpu.memory_space<vmem>>, vector<1x8x1xf32>,
      %c3_109 = arith.constant 3 : index
      %c0_110 = arith.constant 0 : index
      %c0_111 = arith.constant 0 : index
      %153 = vector.load %arg10[%c3_109, %c0_110, %c0_111] : memref<8x8x16xf32, #tpu.memory_space<vmem>>, vector<1x8x16xf32>
      %154 = vector.shape_cast %153 : vector<1x8x16xf32> to vector<8x16xf32>
      %155 = vector.broadcast %140 : vector<8x1xf32> to vector<8x16xf32>
      %156 = arith.mulf %155, %154 : vector<8x16xf32>
      %cst_112 = arith.constant dense<0.000000e+00> : vector<8x16xf32>
      %157 = tpu.matmul %143, %132, %cst_112 {dimension_numbers = #tpu.dot_dimension_numbers<[1], [0], [0], [1], [0, 0, 1, 1], [], []>} : vector<8x8xf32>, vector<8x16xf32>, vector<8x16xf32> -> vector<8x16xf32>
      %158 = arith.addf %156, %157 : vector<8x16xf32>
      %c3_113 = arith.constant 3 : index
      %c0_114 = arith.constant 0 : index
      %c0_115 = arith.constant 0 : index
      %159 = vector.load %arg10[%c3_113, %c0_114, %c0_115] : memref<8x8x16xf32, #tpu.memory_space<vmem>>, vector<1x8x16xf32>
      %160 = vector.shape_cast %159 : vector<1x8x16xf32> to vector<8x16xf32>
      %161 = vector.shape_cast %158 : vector<8x16xf32> to vector<1x8x16xf32>
      tpu.vector_store %arg10[%c3_113, %c0_114, %c0_115], %161 {strides = array<i32>} : memref<8x8x16xf32, #tpu.memory_space<vmem>>, vector<1x8x16xf32>,
      %c3_116 = arith.constant 3 : index
      %c0_117 = arith.constant 0 : index
      %c0_118 = arith.constant 0 : index
      %162 = vector.load %arg8[%c3_116, %c0_117, %c0_118] : memref<8x8x1xf32, #tpu.memory_space<vmem>>, vector<1x8x1xf32>
      %163 = vector.shape_cast %162 : vector<1x8x1xf32> to vector<8x1xf32>
      %164 = vector.shape_cast %138 : vector<8x1xf32> to vector<1x8x1xf32>
      tpu.vector_store %arg8[%c3_116, %c0_117, %c0_118], %164 {strides = array<i32>} : memref<8x8x1xf32, #tpu.memory_space<vmem>>, vector<1x8x1xf32>,
      %c0_119 = arith.constant 0 : index
      %c0_120 = arith.constant 0 : index
      %c64 = arith.constant 64 : index
      %165 = vector.load %arg4[%c0_119, %c0_120, %c64] : memref<1x8x128xf32, #tpu.memory_space<vmem>>, vector<1x8x16xf32>
      %166 = vector.shape_cast %165 : vector<1x8x16xf32> to vector<8x16xf32>
      %c0_121 = arith.constant 0 : index
      %c0_122 = arith.constant 0 : index
      %c64_123 = arith.constant 64 : index
      %167 = vector.load %arg5[%c0_121, %c0_122, %c64_123] : memref<1x8x128xf32, #tpu.memory_space<vmem>>, vector<1x8x16xf32>
      %168 = vector.shape_cast %167 : vector<1x8x16xf32> to vector<8x16xf32>
      %c0_124 = arith.constant 0 : index
      %c0_125 = arith.constant 0 : index
      %c64_126 = arith.constant 64 : index
      %169 = vector.load %arg6[%c0_124, %c0_125, %c64_126] : memref<1x8x128xf32, #tpu.memory_space<vmem>>, vector<1x8x16xf32>
      %170 = vector.shape_cast %169 : vector<1x8x16xf32> to vector<8x16xf32>
      %cst_127 = arith.constant dense<0.000000e+00> : vector<8x8xf32>
      %171 = tpu.matmul %166, %168, %cst_127 {dimension_numbers = #tpu.dot_dimension_numbers<[1], [1], [0], [0], [0, 0, 1, 0], [], []>} : vector<8x16xf32>, vector<8x16xf32>, vector<8x8xf32> -> vector<8x8xf32>
      %c4 = arith.constant 4 : index
      %c0_128 = arith.constant 0 : index
      %c0_129 = arith.constant 0 : index
      %172 = vector.load %arg8[%c4, %c0_128, %c0_129] : memref<8x8x1xf32, #tpu.memory_space<vmem>>, vector<1x8x1xf32>
      %173 = vector.shape_cast %172 : vector<1x8x1xf32> to vector<8x1xf32>
      %cst_130 = arith.constant dense<0xFF800000> : vector<8xf32>
      %174 = vector.multi_reduction <maximumf>, %171, %cst_130 [1] : vector<8x8xf32> to vector<8xf32>
      %175 = vector.shape_cast %174 : vector<8xf32> to vector<8x1xf32>
      %176 = arith.maximumf %173, %175 : vector<8x1xf32>
      %177 = arith.subf %173, %176 : vector<8x1xf32>
      %178 = math.exp %177 : vector<8x1xf32>
      %179 = vector.broadcast %176 : vector<8x1xf32> to vector<8x8xf32>
      %180 = arith.subf %171, %179 : vector<8x8xf32>
      %181 = math.exp %180 : vector<8x8xf32>
      %c4_131 = arith.constant 4 : index
      %c0_132 = arith.constant 0 : index
      %c0_133 = arith.constant 0 : index
      %182 = vector.load %arg9[%c4_131, %c0_132, %c0_133] : memref<8x8x1xf32, #tpu.memory_space<vmem>>, vector<1x8x1xf32>
      %183 = vector.shape_cast %182 : vector<1x8x1xf32> to vector<8x1xf32>
      %184 = arith.mulf %178, %183 : vector<8x1xf32>
      %cst_134 = arith.constant dense<0.000000e+00> : vector<8xf32>
      %185 = vector.multi_reduction <add>, %181, %cst_134 [1] : vector<8x8xf32> to vector<8xf32>
      %186 = vector.shape_cast %185 : vector<8xf32> to vector<8x1xf32>
      %187 = arith.addf %184, %186 : vector<8x1xf32>
      %c4_135 = arith.constant 4 : index
      %c0_136 = arith.constant 0 : index
      %c0_137 = arith.constant 0 : index
      %188 = vector.load %arg9[%c4_135, %c0_136, %c0_137] : memref<8x8x1xf32, #tpu.memory_space<vmem>>, vector<1x8x1xf32>
      %189 = vector.shape_cast %188 : vector<1x8x1xf32> to vector<8x1xf32>
      %190 = vector.shape_cast %187 : vector<8x1xf32> to vector<1x8x1xf32>
      tpu.vector_store %arg9[%c4_135, %c0_136, %c0_137], %190 {strides = array<i32>} : memref<8x8x1xf32, #tpu.memory_space<vmem>>, vector<1x8x1xf32>,
      %c4_138 = arith.constant 4 : index
      %c0_139 = arith.constant 0 : index
      %c0_140 = arith.constant 0 : index
      %191 = vector.load %arg10[%c4_138, %c0_139, %c0_140] : memref<8x8x16xf32, #tpu.memory_space<vmem>>, vector<1x8x16xf32>
      %192 = vector.shape_cast %191 : vector<1x8x16xf32> to vector<8x16xf32>
      %193 = vector.broadcast %178 : vector<8x1xf32> to vector<8x16xf32>
      %194 = arith.mulf %193, %192 : vector<8x16xf32>
      %cst_141 = arith.constant dense<0.000000e+00> : vector<8x16xf32>
      %195 = tpu.matmul %181, %170, %cst_141 {dimension_numbers = #tpu.dot_dimension_numbers<[1], [0], [0], [1], [0, 0, 1, 1], [], []>} : vector<8x8xf32>, vector<8x16xf32>, vector<8x16xf32> -> vector<8x16xf32>
      %196 = arith.addf %194, %195 : vector<8x16xf32>
      %c4_142 = arith.constant 4 : index
      %c0_143 = arith.constant 0 : index
      %c0_144 = arith.constant 0 : index
      %197 = vector.load %arg10[%c4_142, %c0_143, %c0_144] : memref<8x8x16xf32, #tpu.memory_space<vmem>>, vector<1x8x16xf32>
      %198 = vector.shape_cast %197 : vector<1x8x16xf32> to vector<8x16xf32>
      %199 = vector.shape_cast %196 : vector<8x16xf32> to vector<1x8x16xf32>
      tpu.vector_store %arg10[%c4_142, %c0_143, %c0_144], %199 {strides = array<i32>} : memref<8x8x16xf32, #tpu.memory_space<vmem>>, vector<1x8x16xf32>,
      %c4_145 = arith.constant 4 : index
      %c0_146 = arith.constant 0 : index
      %c0_147 = arith.constant 0 : index
      %200 = vector.load %arg8[%c4_145, %c0_146, %c0_147] : memref<8x8x1xf32, #tpu.memory_space<vmem>>, vector<1x8x1xf32>
      %201 = vector.shape_cast %200 : vector<1x8x1xf32> to vector<8x1xf32>
      %202 = vector.shape_cast %176 : vector<8x1xf32> to vector<1x8x1xf32>
      tpu.vector_store %arg8[%c4_145, %c0_146, %c0_147], %202 {strides = array<i32>} : memref<8x8x1xf32, #tpu.memory_space<vmem>>, vector<1x8x1xf32>,
      %c0_148 = arith.constant 0 : index
      %c0_149 = arith.constant 0 : index
      %c80 = arith.constant 80 : index
      %203 = vector.load %arg4[%c0_148, %c0_149, %c80] : memref<1x8x128xf32, #tpu.memory_space<vmem>>, vector<1x8x16xf32>
      %204 = vector.shape_cast %203 : vector<1x8x16xf32> to vector<8x16xf32>
      %c0_150 = arith.constant 0 : index
      %c0_151 = arith.constant 0 : index
      %c80_152 = arith.constant 80 : index
      %205 = vector.load %arg5[%c0_150, %c0_151, %c80_152] : memref<1x8x128xf32, #tpu.memory_space<vmem>>, vector<1x8x16xf32>
      %206 = vector.shape_cast %205 : vector<1x8x16xf32> to vector<8x16xf32>
      %c0_153 = arith.constant 0 : index
      %c0_154 = arith.constant 0 : index
      %c80_155 = arith.constant 80 : index
      %207 = vector.load %arg6[%c0_153, %c0_154, %c80_155] : memref<1x8x128xf32, #tpu.memory_space<vmem>>, vector<1x8x16xf32>
      %208 = vector.shape_cast %207 : vector<1x8x16xf32> to vector<8x16xf32>
      %cst_156 = arith.constant dense<0.000000e+00> : vector<8x8xf32>
      %209 = tpu.matmul %204, %206, %cst_156 {dimension_numbers = #tpu.dot_dimension_numbers<[1], [1], [0], [0], [0, 0, 1, 0], [], []>} : vector<8x16xf32>, vector<8x16xf32>, vector<8x8xf32> -> vector<8x8xf32>
      %c5 = arith.constant 5 : index
      %c0_157 = arith.constant 0 : index
      %c0_158 = arith.constant 0 : index
      %210 = vector.load %arg8[%c5, %c0_157, %c0_158] : memref<8x8x1xf32, #tpu.memory_space<vmem>>, vector<1x8x1xf32>
      %211 = vector.shape_cast %210 : vector<1x8x1xf32> to vector<8x1xf32>
      %cst_159 = arith.constant dense<0xFF800000> : vector<8xf32>
      %212 = vector.multi_reduction <maximumf>, %209, %cst_159 [1] : vector<8x8xf32> to vector<8xf32>
      %213 = vector.shape_cast %212 : vector<8xf32> to vector<8x1xf32>
      %214 = arith.maximumf %211, %213 : vector<8x1xf32>
      %215 = arith.subf %211, %214 : vector<8x1xf32>
      %216 = math.exp %215 : vector<8x1xf32>
      %217 = vector.broadcast %214 : vector<8x1xf32> to vector<8x8xf32>
      %218 = arith.subf %209, %217 : vector<8x8xf32>
      %219 = math.exp %218 : vector<8x8xf32>
      %c5_160 = arith.constant 5 : index
      %c0_161 = arith.constant 0 : index
      %c0_162 = arith.constant 0 : index
      %220 = vector.load %arg9[%c5_160, %c0_161, %c0_162] : memref<8x8x1xf32, #tpu.memory_space<vmem>>, vector<1x8x1xf32>
      %221 = vector.shape_cast %220 : vector<1x8x1xf32> to vector<8x1xf32>
      %222 = arith.mulf %216, %221 : vector<8x1xf32>
      %cst_163 = arith.constant dense<0.000000e+00> : vector<8xf32>
      %223 = vector.multi_reduction <add>, %219, %cst_163 [1] : vector<8x8xf32> to vector<8xf32>
      %224 = vector.shape_cast %223 : vector<8xf32> to vector<8x1xf32>
      %225 = arith.addf %222, %224 : vector<8x1xf32>
      %c5_164 = arith.constant 5 : index
      %c0_165 = arith.constant 0 : index
      %c0_166 = arith.constant 0 : index
      %226 = vector.load %arg9[%c5_164, %c0_165, %c0_166] : memref<8x8x1xf32, #tpu.memory_space<vmem>>, vector<1x8x1xf32>
      %227 = vector.shape_cast %226 : vector<1x8x1xf32> to vector<8x1xf32>
      %228 = vector.shape_cast %225 : vector<8x1xf32> to vector<1x8x1xf32>
      tpu.vector_store %arg9[%c5_164, %c0_165, %c0_166], %228 {strides = array<i32>} : memref<8x8x1xf32, #tpu.memory_space<vmem>>, vector<1x8x1xf32>,
      %c5_167 = arith.constant 5 : index
      %c0_168 = arith.constant 0 : index
      %c0_169 = arith.constant 0 : index
      %229 = vector.load %arg10[%c5_167, %c0_168, %c0_169] : memref<8x8x16xf32, #tpu.memory_space<vmem>>, vector<1x8x16xf32>
      %230 = vector.shape_cast %229 : vector<1x8x16xf32> to vector<8x16xf32>
      %231 = vector.broadcast %216 : vector<8x1xf32> to vector<8x16xf32>
      %232 = arith.mulf %231, %230 : vector<8x16xf32>
      %cst_170 = arith.constant dense<0.000000e+00> : vector<8x16xf32>
      %233 = tpu.matmul %219, %208, %cst_170 {dimension_numbers = #tpu.dot_dimension_numbers<[1], [0], [0], [1], [0, 0, 1, 1], [], []>} : vector<8x8xf32>, vector<8x16xf32>, vector<8x16xf32> -> vector<8x16xf32>
      %234 = arith.addf %232, %233 : vector<8x16xf32>
      %c5_171 = arith.constant 5 : index
      %c0_172 = arith.constant 0 : index
      %c0_173 = arith.constant 0 : index
      %235 = vector.load %arg10[%c5_171, %c0_172, %c0_173] : memref<8x8x16xf32, #tpu.memory_space<vmem>>, vector<1x8x16xf32>
      %236 = vector.shape_cast %235 : vector<1x8x16xf32> to vector<8x16xf32>
      %237 = vector.shape_cast %234 : vector<8x16xf32> to vector<1x8x16xf32>
      tpu.vector_store %arg10[%c5_171, %c0_172, %c0_173], %237 {strides = array<i32>} : memref<8x8x16xf32, #tpu.memory_space<vmem>>, vector<1x8x16xf32>,
      %c5_174 = arith.constant 5 : index
      %c0_175 = arith.constant 0 : index
      %c0_176 = arith.constant 0 : index
      %238 = vector.load %arg8[%c5_174, %c0_175, %c0_176] : memref<8x8x1xf32, #tpu.memory_space<vmem>>, vector<1x8x1xf32>
      %239 = vector.shape_cast %238 : vector<1x8x1xf32> to vector<8x1xf32>
      %240 = vector.shape_cast %214 : vector<8x1xf32> to vector<1x8x1xf32>
      tpu.vector_store %arg8[%c5_174, %c0_175, %c0_176], %240 {strides = array<i32>} : memref<8x8x1xf32, #tpu.memory_space<vmem>>, vector<1x8x1xf32>,
      %c0_177 = arith.constant 0 : index
      %c0_178 = arith.constant 0 : index
      %c96 = arith.constant 96 : index
      %241 = vector.load %arg4[%c0_177, %c0_178, %c96] : memref<1x8x128xf32, #tpu.memory_space<vmem>>, vector<1x8x16xf32>
      %242 = vector.shape_cast %241 : vector<1x8x16xf32> to vector<8x16xf32>
      %c0_179 = arith.constant 0 : index
      %c0_180 = arith.constant 0 : index
      %c96_181 = arith.constant 96 : index
      %243 = vector.load %arg5[%c0_179, %c0_180, %c96_181] : memref<1x8x128xf32, #tpu.memory_space<vmem>>, vector<1x8x16xf32>
      %244 = vector.shape_cast %243 : vector<1x8x16xf32> to vector<8x16xf32>
      %c0_182 = arith.constant 0 : index
      %c0_183 = arith.constant 0 : index
      %c96_184 = arith.constant 96 : index
      %245 = vector.load %arg6[%c0_182, %c0_183, %c96_184] : memref<1x8x128xf32, #tpu.memory_space<vmem>>, vector<1x8x16xf32>
      %246 = vector.shape_cast %245 : vector<1x8x16xf32> to vector<8x16xf32>
      %cst_185 = arith.constant dense<0.000000e+00> : vector<8x8xf32>
      %247 = tpu.matmul %242, %244, %cst_185 {dimension_numbers = #tpu.dot_dimension_numbers<[1], [1], [0], [0], [0, 0, 1, 0], [], []>} : vector<8x16xf32>, vector<8x16xf32>, vector<8x8xf32> -> vector<8x8xf32>
      %c6 = arith.constant 6 : index
      %c0_186 = arith.constant 0 : index
      %c0_187 = arith.constant 0 : index
      %248 = vector.load %arg8[%c6, %c0_186, %c0_187] : memref<8x8x1xf32, #tpu.memory_space<vmem>>, vector<1x8x1xf32>
      %249 = vector.shape_cast %248 : vector<1x8x1xf32> to vector<8x1xf32>
      %cst_188 = arith.constant dense<0xFF800000> : vector<8xf32>
      %250 = vector.multi_reduction <maximumf>, %247, %cst_188 [1] : vector<8x8xf32> to vector<8xf32>
      %251 = vector.shape_cast %250 : vector<8xf32> to vector<8x1xf32>
      %252 = arith.maximumf %249, %251 : vector<8x1xf32>
      %253 = arith.subf %249, %252 : vector<8x1xf32>
      %254 = math.exp %253 : vector<8x1xf32>
      %255 = vector.broadcast %252 : vector<8x1xf32> to vector<8x8xf32>
      %256 = arith.subf %247, %255 : vector<8x8xf32>
      %257 = math.exp %256 : vector<8x8xf32>
      %c6_189 = arith.constant 6 : index
      %c0_190 = arith.constant 0 : index
      %c0_191 = arith.constant 0 : index
      %258 = vector.load %arg9[%c6_189, %c0_190, %c0_191] : memref<8x8x1xf32, #tpu.memory_space<vmem>>, vector<1x8x1xf32>
      %259 = vector.shape_cast %258 : vector<1x8x1xf32> to vector<8x1xf32>
      %260 = arith.mulf %254, %259 : vector<8x1xf32>
      %cst_192 = arith.constant dense<0.000000e+00> : vector<8xf32>
      %261 = vector.multi_reduction <add>, %257, %cst_192 [1] : vector<8x8xf32> to vector<8xf32>
      %262 = vector.shape_cast %261 : vector<8xf32> to vector<8x1xf32>
      %263 = arith.addf %260, %262 : vector<8x1xf32>
      %c6_193 = arith.constant 6 : index
      %c0_194 = arith.constant 0 : index
      %c0_195 = arith.constant 0 : index
      %264 = vector.load %arg9[%c6_193, %c0_194, %c0_195] : memref<8x8x1xf32, #tpu.memory_space<vmem>>, vector<1x8x1xf32>
      %265 = vector.shape_cast %264 : vector<1x8x1xf32> to vector<8x1xf32>
      %266 = vector.shape_cast %263 : vector<8x1xf32> to vector<1x8x1xf32>
      tpu.vector_store %arg9[%c6_193, %c0_194, %c0_195], %266 {strides = array<i32>} : memref<8x8x1xf32, #tpu.memory_space<vmem>>, vector<1x8x1xf32>,
      %c6_196 = arith.constant 6 : index
      %c0_197 = arith.constant 0 : index
      %c0_198 = arith.constant 0 : index
      %267 = vector.load %arg10[%c6_196, %c0_197, %c0_198] : memref<8x8x16xf32, #tpu.memory_space<vmem>>, vector<1x8x16xf32>
      %268 = vector.shape_cast %267 : vector<1x8x16xf32> to vector<8x16xf32>
      %269 = vector.broadcast %254 : vector<8x1xf32> to vector<8x16xf32>
      %270 = arith.mulf %269, %268 : vector<8x16xf32>
      %cst_199 = arith.constant dense<0.000000e+00> : vector<8x16xf32>
      %271 = tpu.matmul %257, %246, %cst_199 {dimension_numbers = #tpu.dot_dimension_numbers<[1], [0], [0], [1], [0, 0, 1, 1], [], []>} : vector<8x8xf32>, vector<8x16xf32>, vector<8x16xf32> -> vector<8x16xf32>
      %272 = arith.addf %270, %271 : vector<8x16xf32>
      %c6_200 = arith.constant 6 : index
      %c0_201 = arith.constant 0 : index
      %c0_202 = arith.constant 0 : index
      %273 = vector.load %arg10[%c6_200, %c0_201, %c0_202] : memref<8x8x16xf32, #tpu.memory_space<vmem>>, vector<1x8x16xf32>
      %274 = vector.shape_cast %273 : vector<1x8x16xf32> to vector<8x16xf32>
      %275 = vector.shape_cast %272 : vector<8x16xf32> to vector<1x8x16xf32>
      tpu.vector_store %arg10[%c6_200, %c0_201, %c0_202], %275 {strides = array<i32>} : memref<8x8x16xf32, #tpu.memory_space<vmem>>, vector<1x8x16xf32>,
      %c6_203 = arith.constant 6 : index
      %c0_204 = arith.constant 0 : index
      %c0_205 = arith.constant 0 : index
      %276 = vector.load %arg8[%c6_203, %c0_204, %c0_205] : memref<8x8x1xf32, #tpu.memory_space<vmem>>, vector<1x8x1xf32>
      %277 = vector.shape_cast %276 : vector<1x8x1xf32> to vector<8x1xf32>
      %278 = vector.shape_cast %252 : vector<8x1xf32> to vector<1x8x1xf32>
      tpu.vector_store %arg8[%c6_203, %c0_204, %c0_205], %278 {strides = array<i32>} : memref<8x8x1xf32, #tpu.memory_space<vmem>>, vector<1x8x1xf32>,
      %c0_206 = arith.constant 0 : index
      %c0_207 = arith.constant 0 : index
      %c112 = arith.constant 112 : index
      %279 = vector.load %arg4[%c0_206, %c0_207, %c112] : memref<1x8x128xf32, #tpu.memory_space<vmem>>, vector<1x8x16xf32>
      %280 = vector.shape_cast %279 : vector<1x8x16xf32> to vector<8x16xf32>
      %c0_208 = arith.constant 0 : index
      %c0_209 = arith.constant 0 : index
      %c112_210 = arith.constant 112 : index
      %281 = vector.load %arg5[%c0_208, %c0_209, %c112_210] : memref<1x8x128xf32, #tpu.memory_space<vmem>>, vector<1x8x16xf32>
      %282 = vector.shape_cast %281 : vector<1x8x16xf32> to vector<8x16xf32>
      %c0_211 = arith.constant 0 : index
      %c0_212 = arith.constant 0 : index
      %c112_213 = arith.constant 112 : index
      %283 = vector.load %arg6[%c0_211, %c0_212, %c112_213] : memref<1x8x128xf32, #tpu.memory_space<vmem>>, vector<1x8x16xf32>
      %284 = vector.shape_cast %283 : vector<1x8x16xf32> to vector<8x16xf32>
      %cst_214 = arith.constant dense<0.000000e+00> : vector<8x8xf32>
      %285 = tpu.matmul %280, %282, %cst_214 {dimension_numbers = #tpu.dot_dimension_numbers<[1], [1], [0], [0], [0, 0, 1, 0], [], []>} : vector<8x16xf32>, vector<8x16xf32>, vector<8x8xf32> -> vector<8x8xf32>
      %c7 = arith.constant 7 : index
      %c0_215 = arith.constant 0 : index
      %c0_216 = arith.constant 0 : index
      %286 = vector.load %arg8[%c7, %c0_215, %c0_216] : memref<8x8x1xf32, #tpu.memory_space<vmem>>, vector<1x8x1xf32>
      %287 = vector.shape_cast %286 : vector<1x8x1xf32> to vector<8x1xf32>
      %cst_217 = arith.constant dense<0xFF800000> : vector<8xf32>
      %288 = vector.multi_reduction <maximumf>, %285, %cst_217 [1] : vector<8x8xf32> to vector<8xf32>
      %289 = vector.shape_cast %288 : vector<8xf32> to vector<8x1xf32>
      %290 = arith.maximumf %287, %289 : vector<8x1xf32>
      %291 = arith.subf %287, %290 : vector<8x1xf32>
      %292 = math.exp %291 : vector<8x1xf32>
      %293 = vector.broadcast %290 : vector<8x1xf32> to vector<8x8xf32>
      %294 = arith.subf %285, %293 : vector<8x8xf32>
      %295 = math.exp %294 : vector<8x8xf32>
      %c7_218 = arith.constant 7 : index
      %c0_219 = arith.constant 0 : index
      %c0_220 = arith.constant 0 : index
      %296 = vector.load %arg9[%c7_218, %c0_219, %c0_220] : memref<8x8x1xf32, #tpu.memory_space<vmem>>, vector<1x8x1xf32>
      %297 = vector.shape_cast %296 : vector<1x8x1xf32> to vector<8x1xf32>
      %298 = arith.mulf %292, %297 : vector<8x1xf32>
      %cst_221 = arith.constant dense<0.000000e+00> : vector<8xf32>
      %299 = vector.multi_reduction <add>, %295, %cst_221 [1] : vector<8x8xf32> to vector<8xf32>
      %300 = vector.shape_cast %299 : vector<8xf32> to vector<8x1xf32>
      %301 = arith.addf %298, %300 : vector<8x1xf32>
      %c7_222 = arith.constant 7 : index
      %c0_223 = arith.constant 0 : index
      %c0_224 = arith.constant 0 : index
      %302 = vector.load %arg9[%c7_222, %c0_223, %c0_224] : memref<8x8x1xf32, #tpu.memory_space<vmem>>, vector<1x8x1xf32>
      %303 = vector.shape_cast %302 : vector<1x8x1xf32> to vector<8x1xf32>
      %304 = vector.shape_cast %301 : vector<8x1xf32> to vector<1x8x1xf32>
      tpu.vector_store %arg9[%c7_222, %c0_223, %c0_224], %304 {strides = array<i32>} : memref<8x8x1xf32, #tpu.memory_space<vmem>>, vector<1x8x1xf32>,
      %c7_225 = arith.constant 7 : index
      %c0_226 = arith.constant 0 : index
      %c0_227 = arith.constant 0 : index
      %305 = vector.load %arg10[%c7_225, %c0_226, %c0_227] : memref<8x8x16xf32, #tpu.memory_space<vmem>>, vector<1x8x16xf32>
      %306 = vector.shape_cast %305 : vector<1x8x16xf32> to vector<8x16xf32>
      %307 = vector.broadcast %292 : vector<8x1xf32> to vector<8x16xf32>
      %308 = arith.mulf %307, %306 : vector<8x16xf32>
      %cst_228 = arith.constant dense<0.000000e+00> : vector<8x16xf32>
      %309 = tpu.matmul %295, %284, %cst_228 {dimension_numbers = #tpu.dot_dimension_numbers<[1], [0], [0], [1], [0, 0, 1, 1], [], []>} : vector<8x8xf32>, vector<8x16xf32>, vector<8x16xf32> -> vector<8x16xf32>
      %310 = arith.addf %308, %309 : vector<8x16xf32>
      %c7_229 = arith.constant 7 : index
      %c0_230 = arith.constant 0 : index
      %c0_231 = arith.constant 0 : index
      %311 = vector.load %arg10[%c7_229, %c0_230, %c0_231] : memref<8x8x16xf32, #tpu.memory_space<vmem>>, vector<1x8x16xf32>
      %312 = vector.shape_cast %311 : vector<1x8x16xf32> to vector<8x16xf32>
      %313 = vector.shape_cast %310 : vector<8x16xf32> to vector<1x8x16xf32>
      tpu.vector_store %arg10[%c7_229, %c0_230, %c0_231], %313 {strides = array<i32>} : memref<8x8x16xf32, #tpu.memory_space<vmem>>, vector<1x8x16xf32>,
      %c7_232 = arith.constant 7 : index
      %c0_233 = arith.constant 0 : index
      %c0_234 = arith.constant 0 : index
      %314 = vector.load %arg8[%c7_232, %c0_233, %c0_234] : memref<8x8x1xf32, #tpu.memory_space<vmem>>, vector<1x8x1xf32>
      %315 = vector.shape_cast %314 : vector<1x8x1xf32> to vector<8x1xf32>
      %316 = vector.shape_cast %290 : vector<8x1xf32> to vector<1x8x1xf32>
      tpu.vector_store %arg8[%c7_232, %c0_233, %c0_234], %316 {strides = array<i32>} : memref<8x8x1xf32, #tpu.memory_space<vmem>>, vector<1x8x1xf32>,
    } else {
    }
    %10 = arith.cmpi eq, %3, %1 : i32
    %11 = arith.extui %10 : i1 to i32
    %c0_i32_2 = arith.constant 0 : i32
    %12 = arith.cmpi ne, %11, %c0_i32_2 : i32
    scf.if %12 {
      %c8_i32 = arith.constant 8 : i32
      %13 = arith.muli %1, %c8_i32 : i32
      %14 = tpu.iota {dimensions = array<i32: 0>} : vector<8x8xi32>
      %15 = vector.broadcast %13 : i32 to vector<8x8xi32>
      %16 = arith.addi %15, %14 : vector<8x8xi32>
      %c8_i32_3 = arith.constant 8 : i32
      %17 = arith.muli %3, %c8_i32_3 : i32
      %18 = tpu.iota {dimensions = array<i32: 1>} : vector<8x8xi32>
      %19 = vector.broadcast %17 : i32 to vector<8x8xi32>
      %20 = arith.addi %19, %18 : vector<8x8xi32>
      %21 = arith.cmpi sle, %20, %16 : vector<8x8xi32>
      %c0 = arith.constant 0 : index
      %c0_4 = arith.constant 0 : index
      %c0_5 = arith.constant 0 : index
      %22 = vector.load %arg4[%c0, %c0_4, %c0_5] : memref<1x8x128xf32, #tpu.memory_space<vmem>>, vector<1x8x16xf32>
      %23 = vector.shape_cast %22 : vector<1x8x16xf32> to vector<8x16xf32>
      %c0_6 = arith.constant 0 : index
      %c0_7 = arith.constant 0 : index
      %c0_8 = arith.constant 0 : index
      %24 = vector.load %arg5[%c0_6, %c0_7, %c0_8] : memref<1x8x128xf32, #tpu.memory_space<vmem>>, vector<1x8x16xf32>
      %25 = vector.shape_cast %24 : vector<1x8x16xf32> to vector<8x16xf32>
      %c0_9 = arith.constant 0 : index
      %c0_10 = arith.constant 0 : index
      %c0_11 = arith.constant 0 : index
      %26 = vector.load %arg6[%c0_9, %c0_10, %c0_11] : memref<1x8x128xf32, #tpu.memory_space<vmem>>, vector<1x8x16xf32>
      %27 = vector.shape_cast %26 : vector<1x8x16xf32> to vector<8x16xf32>
      %cst = arith.constant dense<0.000000e+00> : vector<8x8xf32>
      %28 = tpu.matmul %23, %25, %cst {dimension_numbers = #tpu.dot_dimension_numbers<[1], [1], [0], [0], [0, 0, 1, 0], [], []>} : vector<8x16xf32>, vector<8x16xf32>, vector<8x8xf32> -> vector<8x8xf32>
      %cst_12 = arith.constant -1.000000e+30 : f32
      %29 = vector.broadcast %cst_12 : f32 to vector<8x8xf32>
      %30 = arith.select %21, %28, %29 : vector<8x8xi1>, vector<8x8xf32>
      %c0_13 = arith.constant 0 : index
      %c0_14 = arith.constant 0 : index
      %c0_15 = arith.constant 0 : index
      %31 = vector.load %arg8[%c0_13, %c0_14, %c0_15] : memref<8x8x1xf32, #tpu.memory_space<vmem>>, vector<1x8x1xf32>
      %32 = vector.shape_cast %31 : vector<1x8x1xf32> to vector<8x1xf32>
      %cst_16 = arith.constant dense<0xFF800000> : vector<8xf32>
      %33 = vector.multi_reduction <maximumf>, %30, %cst_16 [1] : vector<8x8xf32> to vector<8xf32>
      %34 = vector.shape_cast %33 : vector<8xf32> to vector<8x1xf32>
      %35 = arith.maximumf %32, %34 : vector<8x1xf32>
      %36 = arith.subf %32, %35 : vector<8x1xf32>
      %37 = math.exp %36 : vector<8x1xf32>
      %38 = vector.broadcast %35 : vector<8x1xf32> to vector<8x8xf32>
      %39 = arith.subf %30, %38 : vector<8x8xf32>
      %40 = math.exp %39 : vector<8x8xf32>
      %c0_17 = arith.constant 0 : index
      %c0_18 = arith.constant 0 : index
      %c0_19 = arith.constant 0 : index
      %41 = vector.load %arg9[%c0_17, %c0_18, %c0_19] : memref<8x8x1xf32, #tpu.memory_space<vmem>>, vector<1x8x1xf32>
      %42 = vector.shape_cast %41 : vector<1x8x1xf32> to vector<8x1xf32>
      %43 = arith.mulf %37, %42 : vector<8x1xf32>
      %cst_20 = arith.constant dense<0.000000e+00> : vector<8xf32>
      %44 = vector.multi_reduction <add>, %40, %cst_20 [1] : vector<8x8xf32> to vector<8xf32>
      %45 = vector.shape_cast %44 : vector<8xf32> to vector<8x1xf32>
      %46 = arith.addf %43, %45 : vector<8x1xf32>
      %c0_21 = arith.constant 0 : index
      %c0_22 = arith.constant 0 : index
      %c0_23 = arith.constant 0 : index
      %47 = vector.load %arg9[%c0_21, %c0_22, %c0_23] : memref<8x8x1xf32, #tpu.memory_space<vmem>>, vector<1x8x1xf32>
      %48 = vector.shape_cast %47 : vector<1x8x1xf32> to vector<8x1xf32>
      %49 = vector.shape_cast %46 : vector<8x1xf32> to vector<1x8x1xf32>
      tpu.vector_store %arg9[%c0_21, %c0_22, %c0_23], %49 {strides = array<i32>} : memref<8x8x1xf32, #tpu.memory_space<vmem>>, vector<1x8x1xf32>,
      %c0_24 = arith.constant 0 : index
      %c0_25 = arith.constant 0 : index
      %c0_26 = arith.constant 0 : index
      %50 = vector.load %arg10[%c0_24, %c0_25, %c0_26] : memref<8x8x16xf32, #tpu.memory_space<vmem>>, vector<1x8x16xf32>
      %51 = vector.shape_cast %50 : vector<1x8x16xf32> to vector<8x16xf32>
      %52 = vector.broadcast %37 : vector<8x1xf32> to vector<8x16xf32>
      %53 = arith.mulf %52, %51 : vector<8x16xf32>
      %cst_27 = arith.constant dense<0.000000e+00> : vector<8x16xf32>
      %54 = tpu.matmul %40, %27, %cst_27 {dimension_numbers = #tpu.dot_dimension_numbers<[1], [0], [0], [1], [0, 0, 1, 1], [], []>} : vector<8x8xf32>, vector<8x16xf32>, vector<8x16xf32> -> vector<8x16xf32>
      %55 = arith.addf %53, %54 : vector<8x16xf32>
      %c0_28 = arith.constant 0 : index
      %c0_29 = arith.constant 0 : index
      %c0_30 = arith.constant 0 : index
      %56 = vector.load %arg10[%c0_28, %c0_29, %c0_30] : memref<8x8x16xf32, #tpu.memory_space<vmem>>, vector<1x8x16xf32>
      %57 = vector.shape_cast %56 : vector<1x8x16xf32> to vector<8x16xf32>
      %58 = vector.shape_cast %55 : vector<8x16xf32> to vector<1x8x16xf32>
      tpu.vector_store %arg10[%c0_28, %c0_29, %c0_30], %58 {strides = array<i32>} : memref<8x8x16xf32, #tpu.memory_space<vmem>>, vector<1x8x16xf32>,
      %c0_31 = arith.constant 0 : index
      %c0_32 = arith.constant 0 : index
      %c0_33 = arith.constant 0 : index
      %59 = vector.load %arg8[%c0_31, %c0_32, %c0_33] : memref<8x8x1xf32, #tpu.memory_space<vmem>>, vector<1x8x1xf32>
      %60 = vector.shape_cast %59 : vector<1x8x1xf32> to vector<8x1xf32>
      %61 = vector.shape_cast %35 : vector<8x1xf32> to vector<1x8x1xf32>
      tpu.vector_store %arg8[%c0_31, %c0_32, %c0_33], %61 {strides = array<i32>} : memref<8x8x1xf32, #tpu.memory_space<vmem>>, vector<1x8x1xf32>,
      %c0_34 = arith.constant 0 : index
      %c0_35 = arith.constant 0 : index
      %c16 = arith.constant 16 : index
      %62 = vector.load %arg4[%c0_34, %c0_35, %c16] : memref<1x8x128xf32, #tpu.memory_space<vmem>>, vector<1x8x16xf32>
      %63 = vector.shape_cast %62 : vector<1x8x16xf32> to vector<8x16xf32>
      %c0_36 = arith.constant 0 : index
      %c0_37 = arith.constant 0 : index
      %c16_38 = arith.constant 16 : index
      %64 = vector.load %arg5[%c0_36, %c0_37, %c16_38] : memref<1x8x128xf32, #tpu.memory_space<vmem>>, vector<1x8x16xf32>
      %65 = vector.shape_cast %64 : vector<1x8x16xf32> to vector<8x16xf32>
      %c0_39 = arith.constant 0 : index
      %c0_40 = arith.constant 0 : index
      %c16_41 = arith.constant 16 : index
      %66 = vector.load %arg6[%c0_39, %c0_40, %c16_41] : memref<1x8x128xf32, #tpu.memory_space<vmem>>, vector<1x8x16xf32>
      %67 = vector.shape_cast %66 : vector<1x8x16xf32> to vector<8x16xf32>
      %cst_42 = arith.constant dense<0.000000e+00> : vector<8x8xf32>
      %68 = tpu.matmul %63, %65, %cst_42 {dimension_numbers = #tpu.dot_dimension_numbers<[1], [1], [0], [0], [0, 0, 1, 0], [], []>} : vector<8x16xf32>, vector<8x16xf32>, vector<8x8xf32> -> vector<8x8xf32>
      %cst_43 = arith.constant -1.000000e+30 : f32
      %69 = vector.broadcast %cst_43 : f32 to vector<8x8xf32>
      %70 = arith.select %21, %68, %69 : vector<8x8xi1>, vector<8x8xf32>
      %c1 = arith.constant 1 : index
      %c0_44 = arith.constant 0 : index
      %c0_45 = arith.constant 0 : index
      %71 = vector.load %arg8[%c1, %c0_44, %c0_45] : memref<8x8x1xf32, #tpu.memory_space<vmem>>, vector<1x8x1xf32>
      %72 = vector.shape_cast %71 : vector<1x8x1xf32> to vector<8x1xf32>
      %cst_46 = arith.constant dense<0xFF800000> : vector<8xf32>
      %73 = vector.multi_reduction <maximumf>, %70, %cst_46 [1] : vector<8x8xf32> to vector<8xf32>
      %74 = vector.shape_cast %73 : vector<8xf32> to vector<8x1xf32>
      %75 = arith.maximumf %72, %74 : vector<8x1xf32>
      %76 = arith.subf %72, %75 : vector<8x1xf32>
      %77 = math.exp %76 : vector<8x1xf32>
      %78 = vector.broadcast %75 : vector<8x1xf32> to vector<8x8xf32>
      %79 = arith.subf %70, %78 : vector<8x8xf32>
      %80 = math.exp %79 : vector<8x8xf32>
      %c1_47 = arith.constant 1 : index
      %c0_48 = arith.constant 0 : index
      %c0_49 = arith.constant 0 : index
      %81 = vector.load %arg9[%c1_47, %c0_48, %c0_49] : memref<8x8x1xf32, #tpu.memory_space<vmem>>, vector<1x8x1xf32>
      %82 = vector.shape_cast %81 : vector<1x8x1xf32> to vector<8x1xf32>
      %83 = arith.mulf %77, %82 : vector<8x1xf32>
      %cst_50 = arith.constant dense<0.000000e+00> : vector<8xf32>
      %84 = vector.multi_reduction <add>, %80, %cst_50 [1] : vector<8x8xf32> to vector<8xf32>
      %85 = vector.shape_cast %84 : vector<8xf32> to vector<8x1xf32>
      %86 = arith.addf %83, %85 : vector<8x1xf32>
      %c1_51 = arith.constant 1 : index
      %c0_52 = arith.constant 0 : index
      %c0_53 = arith.constant 0 : index
      %87 = vector.load %arg9[%c1_51, %c0_52, %c0_53] : memref<8x8x1xf32, #tpu.memory_space<vmem>>, vector<1x8x1xf32>
      %88 = vector.shape_cast %87 : vector<1x8x1xf32> to vector<8x1xf32>
      %89 = vector.shape_cast %86 : vector<8x1xf32> to vector<1x8x1xf32>
      tpu.vector_store %arg9[%c1_51, %c0_52, %c0_53], %89 {strides = array<i32>} : memref<8x8x1xf32, #tpu.memory_space<vmem>>, vector<1x8x1xf32>,
      %c1_54 = arith.constant 1 : index
      %c0_55 = arith.constant 0 : index
      %c0_56 = arith.constant 0 : index
      %90 = vector.load %arg10[%c1_54, %c0_55, %c0_56] : memref<8x8x16xf32, #tpu.memory_space<vmem>>, vector<1x8x16xf32>
      %91 = vector.shape_cast %90 : vector<1x8x16xf32> to vector<8x16xf32>
      %92 = vector.broadcast %77 : vector<8x1xf32> to vector<8x16xf32>
      %93 = arith.mulf %92, %91 : vector<8x16xf32>
      %cst_57 = arith.constant dense<0.000000e+00> : vector<8x16xf32>
      %94 = tpu.matmul %80, %67, %cst_57 {dimension_numbers = #tpu.dot_dimension_numbers<[1], [0], [0], [1], [0, 0, 1, 1], [], []>} : vector<8x8xf32>, vector<8x16xf32>, vector<8x16xf32> -> vector<8x16xf32>
      %95 = arith.addf %93, %94 : vector<8x16xf32>
      %c1_58 = arith.constant 1 : index
      %c0_59 = arith.constant 0 : index
      %c0_60 = arith.constant 0 : index
      %96 = vector.load %arg10[%c1_58, %c0_59, %c0_60] : memref<8x8x16xf32, #tpu.memory_space<vmem>>, vector<1x8x16xf32>
      %97 = vector.shape_cast %96 : vector<1x8x16xf32> to vector<8x16xf32>
      %98 = vector.shape_cast %95 : vector<8x16xf32> to vector<1x8x16xf32>
      tpu.vector_store %arg10[%c1_58, %c0_59, %c0_60], %98 {strides = array<i32>} : memref<8x8x16xf32, #tpu.memory_space<vmem>>, vector<1x8x16xf32>,
      %c1_61 = arith.constant 1 : index
      %c0_62 = arith.constant 0 : index
      %c0_63 = arith.constant 0 : index
      %99 = vector.load %arg8[%c1_61, %c0_62, %c0_63] : memref<8x8x1xf32, #tpu.memory_space<vmem>>, vector<1x8x1xf32>
      %100 = vector.shape_cast %99 : vector<1x8x1xf32> to vector<8x1xf32>
      %101 = vector.shape_cast %75 : vector<8x1xf32> to vector<1x8x1xf32>
      tpu.vector_store %arg8[%c1_61, %c0_62, %c0_63], %101 {strides = array<i32>} : memref<8x8x1xf32, #tpu.memory_space<vmem>>, vector<1x8x1xf32>,
      %c0_64 = arith.constant 0 : index
      %c0_65 = arith.constant 0 : index
      %c32 = arith.constant 32 : index
      %102 = vector.load %arg4[%c0_64, %c0_65, %c32] : memref<1x8x128xf32, #tpu.memory_space<vmem>>, vector<1x8x16xf32>
      %103 = vector.shape_cast %102 : vector<1x8x16xf32> to vector<8x16xf32>
      %c0_66 = arith.constant 0 : index
      %c0_67 = arith.constant 0 : index
      %c32_68 = arith.constant 32 : index
      %104 = vector.load %arg5[%c0_66, %c0_67, %c32_68] : memref<1x8x128xf32, #tpu.memory_space<vmem>>, vector<1x8x16xf32>
      %105 = vector.shape_cast %104 : vector<1x8x16xf32> to vector<8x16xf32>
      %c0_69 = arith.constant 0 : index
      %c0_70 = arith.constant 0 : index
      %c32_71 = arith.constant 32 : index
      %106 = vector.load %arg6[%c0_69, %c0_70, %c32_71] : memref<1x8x128xf32, #tpu.memory_space<vmem>>, vector<1x8x16xf32>
      %107 = vector.shape_cast %106 : vector<1x8x16xf32> to vector<8x16xf32>
      %cst_72 = arith.constant dense<0.000000e+00> : vector<8x8xf32>
      %108 = tpu.matmul %103, %105, %cst_72 {dimension_numbers = #tpu.dot_dimension_numbers<[1], [1], [0], [0], [0, 0, 1, 0], [], []>} : vector<8x16xf32>, vector<8x16xf32>, vector<8x8xf32> -> vector<8x8xf32>
      %cst_73 = arith.constant -1.000000e+30 : f32
      %109 = vector.broadcast %cst_73 : f32 to vector<8x8xf32>
      %110 = arith.select %21, %108, %109 : vector<8x8xi1>, vector<8x8xf32>
      %c2 = arith.constant 2 : index
      %c0_74 = arith.constant 0 : index
      %c0_75 = arith.constant 0 : index
      %111 = vector.load %arg8[%c2, %c0_74, %c0_75] : memref<8x8x1xf32, #tpu.memory_space<vmem>>, vector<1x8x1xf32>
      %112 = vector.shape_cast %111 : vector<1x8x1xf32> to vector<8x1xf32>
      %cst_76 = arith.constant dense<0xFF800000> : vector<8xf32>
      %113 = vector.multi_reduction <maximumf>, %110, %cst_76 [1] : vector<8x8xf32> to vector<8xf32>
      %114 = vector.shape_cast %113 : vector<8xf32> to vector<8x1xf32>
      %115 = arith.maximumf %112, %114 : vector<8x1xf32>
      %116 = arith.subf %112, %115 : vector<8x1xf32>
      %117 = math.exp %116 : vector<8x1xf32>
      %118 = vector.broadcast %115 : vector<8x1xf32> to vector<8x8xf32>
      %119 = arith.subf %110, %118 : vector<8x8xf32>
      %120 = math.exp %119 : vector<8x8xf32>
      %c2_77 = arith.constant 2 : index
      %c0_78 = arith.constant 0 : index
      %c0_79 = arith.constant 0 : index
      %121 = vector.load %arg9[%c2_77, %c0_78, %c0_79] : memref<8x8x1xf32, #tpu.memory_space<vmem>>, vector<1x8x1xf32>
      %122 = vector.shape_cast %121 : vector<1x8x1xf32> to vector<8x1xf32>
      %123 = arith.mulf %117, %122 : vector<8x1xf32>
      %cst_80 = arith.constant dense<0.000000e+00> : vector<8xf32>
      %124 = vector.multi_reduction <add>, %120, %cst_80 [1] : vector<8x8xf32> to vector<8xf32>
      %125 = vector.shape_cast %124 : vector<8xf32> to vector<8x1xf32>
      %126 = arith.addf %123, %125 : vector<8x1xf32>
      %c2_81 = arith.constant 2 : index
      %c0_82 = arith.constant 0 : index
      %c0_83 = arith.constant 0 : index
      %127 = vector.load %arg9[%c2_81, %c0_82, %c0_83] : memref<8x8x1xf32, #tpu.memory_space<vmem>>, vector<1x8x1xf32>
      %128 = vector.shape_cast %127 : vector<1x8x1xf32> to vector<8x1xf32>
      %129 = vector.shape_cast %126 : vector<8x1xf32> to vector<1x8x1xf32>
      tpu.vector_store %arg9[%c2_81, %c0_82, %c0_83], %129 {strides = array<i32>} : memref<8x8x1xf32, #tpu.memory_space<vmem>>, vector<1x8x1xf32>,
      %c2_84 = arith.constant 2 : index
      %c0_85 = arith.constant 0 : index
      %c0_86 = arith.constant 0 : index
      %130 = vector.load %arg10[%c2_84, %c0_85, %c0_86] : memref<8x8x16xf32, #tpu.memory_space<vmem>>, vector<1x8x16xf32>
      %131 = vector.shape_cast %130 : vector<1x8x16xf32> to vector<8x16xf32>
      %132 = vector.broadcast %117 : vector<8x1xf32> to vector<8x16xf32>
      %133 = arith.mulf %132, %131 : vector<8x16xf32>
      %cst_87 = arith.constant dense<0.000000e+00> : vector<8x16xf32>
      %134 = tpu.matmul %120, %107, %cst_87 {dimension_numbers = #tpu.dot_dimension_numbers<[1], [0], [0], [1], [0, 0, 1, 1], [], []>} : vector<8x8xf32>, vector<8x16xf32>, vector<8x16xf32> -> vector<8x16xf32>
      %135 = arith.addf %133, %134 : vector<8x16xf32>
      %c2_88 = arith.constant 2 : index
      %c0_89 = arith.constant 0 : index
      %c0_90 = arith.constant 0 : index
      %136 = vector.load %arg10[%c2_88, %c0_89, %c0_90] : memref<8x8x16xf32, #tpu.memory_space<vmem>>, vector<1x8x16xf32>
      %137 = vector.shape_cast %136 : vector<1x8x16xf32> to vector<8x16xf32>
      %138 = vector.shape_cast %135 : vector<8x16xf32> to vector<1x8x16xf32>
      tpu.vector_store %arg10[%c2_88, %c0_89, %c0_90], %138 {strides = array<i32>} : memref<8x8x16xf32, #tpu.memory_space<vmem>>, vector<1x8x16xf32>,
      %c2_91 = arith.constant 2 : index
      %c0_92 = arith.constant 0 : index
      %c0_93 = arith.constant 0 : index
      %139 = vector.load %arg8[%c2_91, %c0_92, %c0_93] : memref<8x8x1xf32, #tpu.memory_space<vmem>>, vector<1x8x1xf32>
      %140 = vector.shape_cast %139 : vector<1x8x1xf32> to vector<8x1xf32>
      %141 = vector.shape_cast %115 : vector<8x1xf32> to vector<1x8x1xf32>
      tpu.vector_store %arg8[%c2_91, %c0_92, %c0_93], %141 {strides = array<i32>} : memref<8x8x1xf32, #tpu.memory_space<vmem>>, vector<1x8x1xf32>,
      %c0_94 = arith.constant 0 : index
      %c0_95 = arith.constant 0 : index
      %c48 = arith.constant 48 : index
      %142 = vector.load %arg4[%c0_94, %c0_95, %c48] : memref<1x8x128xf32, #tpu.memory_space<vmem>>, vector<1x8x16xf32>
      %143 = vector.shape_cast %142 : vector<1x8x16xf32> to vector<8x16xf32>
      %c0_96 = arith.constant 0 : index
      %c0_97 = arith.constant 0 : index
      %c48_98 = arith.constant 48 : index
      %144 = vector.load %arg5[%c0_96, %c0_97, %c48_98] : memref<1x8x128xf32, #tpu.memory_space<vmem>>, vector<1x8x16xf32>
      %145 = vector.shape_cast %144 : vector<1x8x16xf32> to vector<8x16xf32>
      %c0_99 = arith.constant 0 : index
      %c0_100 = arith.constant 0 : index
      %c48_101 = arith.constant 48 : index
      %146 = vector.load %arg6[%c0_99, %c0_100, %c48_101] : memref<1x8x128xf32, #tpu.memory_space<vmem>>, vector<1x8x16xf32>
      %147 = vector.shape_cast %146 : vector<1x8x16xf32> to vector<8x16xf32>
      %cst_102 = arith.constant dense<0.000000e+00> : vector<8x8xf32>
      %148 = tpu.matmul %143, %145, %cst_102 {dimension_numbers = #tpu.dot_dimension_numbers<[1], [1], [0], [0], [0, 0, 1, 0], [], []>} : vector<8x16xf32>, vector<8x16xf32>, vector<8x8xf32> -> vector<8x8xf32>
      %cst_103 = arith.constant -1.000000e+30 : f32
      %149 = vector.broadcast %cst_103 : f32 to vector<8x8xf32>
      %150 = arith.select %21, %148, %149 : vector<8x8xi1>, vector<8x8xf32>
      %c3 = arith.constant 3 : index
      %c0_104 = arith.constant 0 : index
      %c0_105 = arith.constant 0 : index
      %151 = vector.load %arg8[%c3, %c0_104, %c0_105] : memref<8x8x1xf32, #tpu.memory_space<vmem>>, vector<1x8x1xf32>
      %152 = vector.shape_cast %151 : vector<1x8x1xf32> to vector<8x1xf32>
      %cst_106 = arith.constant dense<0xFF800000> : vector<8xf32>
      %153 = vector.multi_reduction <maximumf>, %150, %cst_106 [1] : vector<8x8xf32> to vector<8xf32>
      %154 = vector.shape_cast %153 : vector<8xf32> to vector<8x1xf32>
      %155 = arith.maximumf %152, %154 : vector<8x1xf32>
      %156 = arith.subf %152, %155 : vector<8x1xf32>
      %157 = math.exp %156 : vector<8x1xf32>
      %158 = vector.broadcast %155 : vector<8x1xf32> to vector<8x8xf32>
      %159 = arith.subf %150, %158 : vector<8x8xf32>
      %160 = math.exp %159 : vector<8x8xf32>
      %c3_107 = arith.constant 3 : index
      %c0_108 = arith.constant 0 : index
      %c0_109 = arith.constant 0 : index
      %161 = vector.load %arg9[%c3_107, %c0_108, %c0_109] : memref<8x8x1xf32, #tpu.memory_space<vmem>>, vector<1x8x1xf32>
      %162 = vector.shape_cast %161 : vector<1x8x1xf32> to vector<8x1xf32>
      %163 = arith.mulf %157, %162 : vector<8x1xf32>
      %cst_110 = arith.constant dense<0.000000e+00> : vector<8xf32>
      %164 = vector.multi_reduction <add>, %160, %cst_110 [1] : vector<8x8xf32> to vector<8xf32>
      %165 = vector.shape_cast %164 : vector<8xf32> to vector<8x1xf32>
      %166 = arith.addf %163, %165 : vector<8x1xf32>
      %c3_111 = arith.constant 3 : index
      %c0_112 = arith.constant 0 : index
      %c0_113 = arith.constant 0 : index
      %167 = vector.load %arg9[%c3_111, %c0_112, %c0_113] : memref<8x8x1xf32, #tpu.memory_space<vmem>>, vector<1x8x1xf32>
      %168 = vector.shape_cast %167 : vector<1x8x1xf32> to vector<8x1xf32>
      %169 = vector.shape_cast %166 : vector<8x1xf32> to vector<1x8x1xf32>
      tpu.vector_store %arg9[%c3_111, %c0_112, %c0_113], %169 {strides = array<i32>} : memref<8x8x1xf32, #tpu.memory_space<vmem>>, vector<1x8x1xf32>,
      %c3_114 = arith.constant 3 : index
      %c0_115 = arith.constant 0 : index
      %c0_116 = arith.constant 0 : index
      %170 = vector.load %arg10[%c3_114, %c0_115, %c0_116] : memref<8x8x16xf32, #tpu.memory_space<vmem>>, vector<1x8x16xf32>
      %171 = vector.shape_cast %170 : vector<1x8x16xf32> to vector<8x16xf32>
      %172 = vector.broadcast %157 : vector<8x1xf32> to vector<8x16xf32>
      %173 = arith.mulf %172, %171 : vector<8x16xf32>
      %cst_117 = arith.constant dense<0.000000e+00> : vector<8x16xf32>
      %174 = tpu.matmul %160, %147, %cst_117 {dimension_numbers = #tpu.dot_dimension_numbers<[1], [0], [0], [1], [0, 0, 1, 1], [], []>} : vector<8x8xf32>, vector<8x16xf32>, vector<8x16xf32> -> vector<8x16xf32>
      %175 = arith.addf %173, %174 : vector<8x16xf32>
      %c3_118 = arith.constant 3 : index
      %c0_119 = arith.constant 0 : index
      %c0_120 = arith.constant 0 : index
      %176 = vector.load %arg10[%c3_118, %c0_119, %c0_120] : memref<8x8x16xf32, #tpu.memory_space<vmem>>, vector<1x8x16xf32>
      %177 = vector.shape_cast %176 : vector<1x8x16xf32> to vector<8x16xf32>
      %178 = vector.shape_cast %175 : vector<8x16xf32> to vector<1x8x16xf32>
      tpu.vector_store %arg10[%c3_118, %c0_119, %c0_120], %178 {strides = array<i32>} : memref<8x8x16xf32, #tpu.memory_space<vmem>>, vector<1x8x16xf32>,
      %c3_121 = arith.constant 3 : index
      %c0_122 = arith.constant 0 : index
      %c0_123 = arith.constant 0 : index
      %179 = vector.load %arg8[%c3_121, %c0_122, %c0_123] : memref<8x8x1xf32, #tpu.memory_space<vmem>>, vector<1x8x1xf32>
      %180 = vector.shape_cast %179 : vector<1x8x1xf32> to vector<8x1xf32>
      %181 = vector.shape_cast %155 : vector<8x1xf32> to vector<1x8x1xf32>
      tpu.vector_store %arg8[%c3_121, %c0_122, %c0_123], %181 {strides = array<i32>} : memref<8x8x1xf32, #tpu.memory_space<vmem>>, vector<1x8x1xf32>,
      %c0_124 = arith.constant 0 : index
      %c0_125 = arith.constant 0 : index
      %c64 = arith.constant 64 : index
      %182 = vector.load %arg4[%c0_124, %c0_125, %c64] : memref<1x8x128xf32, #tpu.memory_space<vmem>>, vector<1x8x16xf32>
      %183 = vector.shape_cast %182 : vector<1x8x16xf32> to vector<8x16xf32>
      %c0_126 = arith.constant 0 : index
      %c0_127 = arith.constant 0 : index
      %c64_128 = arith.constant 64 : index
      %184 = vector.load %arg5[%c0_126, %c0_127, %c64_128] : memref<1x8x128xf32, #tpu.memory_space<vmem>>, vector<1x8x16xf32>
      %185 = vector.shape_cast %184 : vector<1x8x16xf32> to vector<8x16xf32>
      %c0_129 = arith.constant 0 : index
      %c0_130 = arith.constant 0 : index
      %c64_131 = arith.constant 64 : index
      %186 = vector.load %arg6[%c0_129, %c0_130, %c64_131] : memref<1x8x128xf32, #tpu.memory_space<vmem>>, vector<1x8x16xf32>
      %187 = vector.shape_cast %186 : vector<1x8x16xf32> to vector<8x16xf32>
      %cst_132 = arith.constant dense<0.000000e+00> : vector<8x8xf32>
      %188 = tpu.matmul %183, %185, %cst_132 {dimension_numbers = #tpu.dot_dimension_numbers<[1], [1], [0], [0], [0, 0, 1, 0], [], []>} : vector<8x16xf32>, vector<8x16xf32>, vector<8x8xf32> -> vector<8x8xf32>
      %cst_133 = arith.constant -1.000000e+30 : f32
      %189 = vector.broadcast %cst_133 : f32 to vector<8x8xf32>
      %190 = arith.select %21, %188, %189 : vector<8x8xi1>, vector<8x8xf32>
      %c4 = arith.constant 4 : index
      %c0_134 = arith.constant 0 : index
      %c0_135 = arith.constant 0 : index
      %191 = vector.load %arg8[%c4, %c0_134, %c0_135] : memref<8x8x1xf32, #tpu.memory_space<vmem>>, vector<1x8x1xf32>
      %192 = vector.shape_cast %191 : vector<1x8x1xf32> to vector<8x1xf32>
      %cst_136 = arith.constant dense<0xFF800000> : vector<8xf32>
      %193 = vector.multi_reduction <maximumf>, %190, %cst_136 [1] : vector<8x8xf32> to vector<8xf32>
      %194 = vector.shape_cast %193 : vector<8xf32> to vector<8x1xf32>
      %195 = arith.maximumf %192, %194 : vector<8x1xf32>
      %196 = arith.subf %192, %195 : vector<8x1xf32>
      %197 = math.exp %196 : vector<8x1xf32>
      %198 = vector.broadcast %195 : vector<8x1xf32> to vector<8x8xf32>
      %199 = arith.subf %190, %198 : vector<8x8xf32>
      %200 = math.exp %199 : vector<8x8xf32>
      %c4_137 = arith.constant 4 : index
      %c0_138 = arith.constant 0 : index
      %c0_139 = arith.constant 0 : index
      %201 = vector.load %arg9[%c4_137, %c0_138, %c0_139] : memref<8x8x1xf32, #tpu.memory_space<vmem>>, vector<1x8x1xf32>
      %202 = vector.shape_cast %201 : vector<1x8x1xf32> to vector<8x1xf32>
      %203 = arith.mulf %197, %202 : vector<8x1xf32>
      %cst_140 = arith.constant dense<0.000000e+00> : vector<8xf32>
      %204 = vector.multi_reduction <add>, %200, %cst_140 [1] : vector<8x8xf32> to vector<8xf32>
      %205 = vector.shape_cast %204 : vector<8xf32> to vector<8x1xf32>
      %206 = arith.addf %203, %205 : vector<8x1xf32>
      %c4_141 = arith.constant 4 : index
      %c0_142 = arith.constant 0 : index
      %c0_143 = arith.constant 0 : index
      %207 = vector.load %arg9[%c4_141, %c0_142, %c0_143] : memref<8x8x1xf32, #tpu.memory_space<vmem>>, vector<1x8x1xf32>
      %208 = vector.shape_cast %207 : vector<1x8x1xf32> to vector<8x1xf32>
      %209 = vector.shape_cast %206 : vector<8x1xf32> to vector<1x8x1xf32>
      tpu.vector_store %arg9[%c4_141, %c0_142, %c0_143], %209 {strides = array<i32>} : memref<8x8x1xf32, #tpu.memory_space<vmem>>, vector<1x8x1xf32>,
      %c4_144 = arith.constant 4 : index
      %c0_145 = arith.constant 0 : index
      %c0_146 = arith.constant 0 : index
      %210 = vector.load %arg10[%c4_144, %c0_145, %c0_146] : memref<8x8x16xf32, #tpu.memory_space<vmem>>, vector<1x8x16xf32>
      %211 = vector.shape_cast %210 : vector<1x8x16xf32> to vector<8x16xf32>
      %212 = vector.broadcast %197 : vector<8x1xf32> to vector<8x16xf32>
      %213 = arith.mulf %212, %211 : vector<8x16xf32>
      %cst_147 = arith.constant dense<0.000000e+00> : vector<8x16xf32>
      %214 = tpu.matmul %200, %187, %cst_147 {dimension_numbers = #tpu.dot_dimension_numbers<[1], [0], [0], [1], [0, 0, 1, 1], [], []>} : vector<8x8xf32>, vector<8x16xf32>, vector<8x16xf32> -> vector<8x16xf32>
      %215 = arith.addf %213, %214 : vector<8x16xf32>
      %c4_148 = arith.constant 4 : index
      %c0_149 = arith.constant 0 : index
      %c0_150 = arith.constant 0 : index
      %216 = vector.load %arg10[%c4_148, %c0_149, %c0_150] : memref<8x8x16xf32, #tpu.memory_space<vmem>>, vector<1x8x16xf32>
      %217 = vector.shape_cast %216 : vector<1x8x16xf32> to vector<8x16xf32>
      %218 = vector.shape_cast %215 : vector<8x16xf32> to vector<1x8x16xf32>
      tpu.vector_store %arg10[%c4_148, %c0_149, %c0_150], %218 {strides = array<i32>} : memref<8x8x16xf32, #tpu.memory_space<vmem>>, vector<1x8x16xf32>,
      %c4_151 = arith.constant 4 : index
      %c0_152 = arith.constant 0 : index
      %c0_153 = arith.constant 0 : index
      %219 = vector.load %arg8[%c4_151, %c0_152, %c0_153] : memref<8x8x1xf32, #tpu.memory_space<vmem>>, vector<1x8x1xf32>
      %220 = vector.shape_cast %219 : vector<1x8x1xf32> to vector<8x1xf32>
      %221 = vector.shape_cast %195 : vector<8x1xf32> to vector<1x8x1xf32>
      tpu.vector_store %arg8[%c4_151, %c0_152, %c0_153], %221 {strides = array<i32>} : memref<8x8x1xf32, #tpu.memory_space<vmem>>, vector<1x8x1xf32>,
      %c0_154 = arith.constant 0 : index
      %c0_155 = arith.constant 0 : index
      %c80 = arith.constant 80 : index
      %222 = vector.load %arg4[%c0_154, %c0_155, %c80] : memref<1x8x128xf32, #tpu.memory_space<vmem>>, vector<1x8x16xf32>
      %223 = vector.shape_cast %222 : vector<1x8x16xf32> to vector<8x16xf32>
      %c0_156 = arith.constant 0 : index
      %c0_157 = arith.constant 0 : index
      %c80_158 = arith.constant 80 : index
      %224 = vector.load %arg5[%c0_156, %c0_157, %c80_158] : memref<1x8x128xf32, #tpu.memory_space<vmem>>, vector<1x8x16xf32>
      %225 = vector.shape_cast %224 : vector<1x8x16xf32> to vector<8x16xf32>
      %c0_159 = arith.constant 0 : index
      %c0_160 = arith.constant 0 : index
      %c80_161 = arith.constant 80 : index
      %226 = vector.load %arg6[%c0_159, %c0_160, %c80_161] : memref<1x8x128xf32, #tpu.memory_space<vmem>>, vector<1x8x16xf32>
      %227 = vector.shape_cast %226 : vector<1x8x16xf32> to vector<8x16xf32>
      %cst_162 = arith.constant dense<0.000000e+00> : vector<8x8xf32>
      %228 = tpu.matmul %223, %225, %cst_162 {dimension_numbers = #tpu.dot_dimension_numbers<[1], [1], [0], [0], [0, 0, 1, 0], [], []>} : vector<8x16xf32>, vector<8x16xf32>, vector<8x8xf32> -> vector<8x8xf32>
      %cst_163 = arith.constant -1.000000e+30 : f32
      %229 = vector.broadcast %cst_163 : f32 to vector<8x8xf32>
      %230 = arith.select %21, %228, %229 : vector<8x8xi1>, vector<8x8xf32>
      %c5 = arith.constant 5 : index
      %c0_164 = arith.constant 0 : index
      %c0_165 = arith.constant 0 : index
      %231 = vector.load %arg8[%c5, %c0_164, %c0_165] : memref<8x8x1xf32, #tpu.memory_space<vmem>>, vector<1x8x1xf32>
      %232 = vector.shape_cast %231 : vector<1x8x1xf32> to vector<8x1xf32>
      %cst_166 = arith.constant dense<0xFF800000> : vector<8xf32>
      %233 = vector.multi_reduction <maximumf>, %230, %cst_166 [1] : vector<8x8xf32> to vector<8xf32>
      %234 = vector.shape_cast %233 : vector<8xf32> to vector<8x1xf32>
      %235 = arith.maximumf %232, %234 : vector<8x1xf32>
      %236 = arith.subf %232, %235 : vector<8x1xf32>
      %237 = math.exp %236 : vector<8x1xf32>
      %238 = vector.broadcast %235 : vector<8x1xf32> to vector<8x8xf32>
      %239 = arith.subf %230, %238 : vector<8x8xf32>
      %240 = math.exp %239 : vector<8x8xf32>
      %c5_167 = arith.constant 5 : index
      %c0_168 = arith.constant 0 : index
      %c0_169 = arith.constant 0 : index
      %241 = vector.load %arg9[%c5_167, %c0_168, %c0_169] : memref<8x8x1xf32, #tpu.memory_space<vmem>>, vector<1x8x1xf32>
      %242 = vector.shape_cast %241 : vector<1x8x1xf32> to vector<8x1xf32>
      %243 = arith.mulf %237, %242 : vector<8x1xf32>
      %cst_170 = arith.constant dense<0.000000e+00> : vector<8xf32>
      %244 = vector.multi_reduction <add>, %240, %cst_170 [1] : vector<8x8xf32> to vector<8xf32>
      %245 = vector.shape_cast %244 : vector<8xf32> to vector<8x1xf32>
      %246 = arith.addf %243, %245 : vector<8x1xf32>
      %c5_171 = arith.constant 5 : index
      %c0_172 = arith.constant 0 : index
      %c0_173 = arith.constant 0 : index
      %247 = vector.load %arg9[%c5_171, %c0_172, %c0_173] : memref<8x8x1xf32, #tpu.memory_space<vmem>>, vector<1x8x1xf32>
      %248 = vector.shape_cast %247 : vector<1x8x1xf32> to vector<8x1xf32>
      %249 = vector.shape_cast %246 : vector<8x1xf32> to vector<1x8x1xf32>
      tpu.vector_store %arg9[%c5_171, %c0_172, %c0_173], %249 {strides = array<i32>} : memref<8x8x1xf32, #tpu.memory_space<vmem>>, vector<1x8x1xf32>,
      %c5_174 = arith.constant 5 : index
      %c0_175 = arith.constant 0 : index
      %c0_176 = arith.constant 0 : index
      %250 = vector.load %arg10[%c5_174, %c0_175, %c0_176] : memref<8x8x16xf32, #tpu.memory_space<vmem>>, vector<1x8x16xf32>
      %251 = vector.shape_cast %250 : vector<1x8x16xf32> to vector<8x16xf32>
      %252 = vector.broadcast %237 : vector<8x1xf32> to vector<8x16xf32>
      %253 = arith.mulf %252, %251 : vector<8x16xf32>
      %cst_177 = arith.constant dense<0.000000e+00> : vector<8x16xf32>
      %254 = tpu.matmul %240, %227, %cst_177 {dimension_numbers = #tpu.dot_dimension_numbers<[1], [0], [0], [1], [0, 0, 1, 1], [], []>} : vector<8x8xf32>, vector<8x16xf32>, vector<8x16xf32> -> vector<8x16xf32>
      %255 = arith.addf %253, %254 : vector<8x16xf32>
      %c5_178 = arith.constant 5 : index
      %c0_179 = arith.constant 0 : index
      %c0_180 = arith.constant 0 : index
      %256 = vector.load %arg10[%c5_178, %c0_179, %c0_180] : memref<8x8x16xf32, #tpu.memory_space<vmem>>, vector<1x8x16xf32>
      %257 = vector.shape_cast %256 : vector<1x8x16xf32> to vector<8x16xf32>
      %258 = vector.shape_cast %255 : vector<8x16xf32> to vector<1x8x16xf32>
      tpu.vector_store %arg10[%c5_178, %c0_179, %c0_180], %258 {strides = array<i32>} : memref<8x8x16xf32, #tpu.memory_space<vmem>>, vector<1x8x16xf32>,
      %c5_181 = arith.constant 5 : index
      %c0_182 = arith.constant 0 : index
      %c0_183 = arith.constant 0 : index
      %259 = vector.load %arg8[%c5_181, %c0_182, %c0_183] : memref<8x8x1xf32, #tpu.memory_space<vmem>>, vector<1x8x1xf32>
      %260 = vector.shape_cast %259 : vector<1x8x1xf32> to vector<8x1xf32>
      %261 = vector.shape_cast %235 : vector<8x1xf32> to vector<1x8x1xf32>
      tpu.vector_store %arg8[%c5_181, %c0_182, %c0_183], %261 {strides = array<i32>} : memref<8x8x1xf32, #tpu.memory_space<vmem>>, vector<1x8x1xf32>,
      %c0_184 = arith.constant 0 : index
      %c0_185 = arith.constant 0 : index
      %c96 = arith.constant 96 : index
      %262 = vector.load %arg4[%c0_184, %c0_185, %c96] : memref<1x8x128xf32, #tpu.memory_space<vmem>>, vector<1x8x16xf32>
      %263 = vector.shape_cast %262 : vector<1x8x16xf32> to vector<8x16xf32>
      %c0_186 = arith.constant 0 : index
      %c0_187 = arith.constant 0 : index
      %c96_188 = arith.constant 96 : index
      %264 = vector.load %arg5[%c0_186, %c0_187, %c96_188] : memref<1x8x128xf32, #tpu.memory_space<vmem>>, vector<1x8x16xf32>
      %265 = vector.shape_cast %264 : vector<1x8x16xf32> to vector<8x16xf32>
      %c0_189 = arith.constant 0 : index
      %c0_190 = arith.constant 0 : index
      %c96_191 = arith.constant 96 : index
      %266 = vector.load %arg6[%c0_189, %c0_190, %c96_191] : memref<1x8x128xf32, #tpu.memory_space<vmem>>, vector<1x8x16xf32>
      %267 = vector.shape_cast %266 : vector<1x8x16xf32> to vector<8x16xf32>
      %cst_192 = arith.constant dense<0.000000e+00> : vector<8x8xf32>
      %268 = tpu.matmul %263, %265, %cst_192 {dimension_numbers = #tpu.dot_dimension_numbers<[1], [1], [0], [0], [0, 0, 1, 0], [], []>} : vector<8x16xf32>, vector<8x16xf32>, vector<8x8xf32> -> vector<8x8xf32>
      %cst_193 = arith.constant -1.000000e+30 : f32
      %269 = vector.broadcast %cst_193 : f32 to vector<8x8xf32>
      %270 = arith.select %21, %268, %269 : vector<8x8xi1>, vector<8x8xf32>
      %c6 = arith.constant 6 : index
      %c0_194 = arith.constant 0 : index
      %c0_195 = arith.constant 0 : index
      %271 = vector.load %arg8[%c6, %c0_194, %c0_195] : memref<8x8x1xf32, #tpu.memory_space<vmem>>, vector<1x8x1xf32>
      %272 = vector.shape_cast %271 : vector<1x8x1xf32> to vector<8x1xf32>
      %cst_196 = arith.constant dense<0xFF800000> : vector<8xf32>
      %273 = vector.multi_reduction <maximumf>, %270, %cst_196 [1] : vector<8x8xf32> to vector<8xf32>
      %274 = vector.shape_cast %273 : vector<8xf32> to vector<8x1xf32>
      %275 = arith.maximumf %272, %274 : vector<8x1xf32>
      %276 = arith.subf %272, %275 : vector<8x1xf32>
      %277 = math.exp %276 : vector<8x1xf32>
      %278 = vector.broadcast %275 : vector<8x1xf32> to vector<8x8xf32>
      %279 = arith.subf %270, %278 : vector<8x8xf32>
      %280 = math.exp %279 : vector<8x8xf32>
      %c6_197 = arith.constant 6 : index
      %c0_198 = arith.constant 0 : index
      %c0_199 = arith.constant 0 : index
      %281 = vector.load %arg9[%c6_197, %c0_198, %c0_199] : memref<8x8x1xf32, #tpu.memory_space<vmem>>, vector<1x8x1xf32>
      %282 = vector.shape_cast %281 : vector<1x8x1xf32> to vector<8x1xf32>
      %283 = arith.mulf %277, %282 : vector<8x1xf32>
      %cst_200 = arith.constant dense<0.000000e+00> : vector<8xf32>
      %284 = vector.multi_reduction <add>, %280, %cst_200 [1] : vector<8x8xf32> to vector<8xf32>
      %285 = vector.shape_cast %284 : vector<8xf32> to vector<8x1xf32>
      %286 = arith.addf %283, %285 : vector<8x1xf32>
      %c6_201 = arith.constant 6 : index
      %c0_202 = arith.constant 0 : index
      %c0_203 = arith.constant 0 : index
      %287 = vector.load %arg9[%c6_201, %c0_202, %c0_203] : memref<8x8x1xf32, #tpu.memory_space<vmem>>, vector<1x8x1xf32>
      %288 = vector.shape_cast %287 : vector<1x8x1xf32> to vector<8x1xf32>
      %289 = vector.shape_cast %286 : vector<8x1xf32> to vector<1x8x1xf32>
      tpu.vector_store %arg9[%c6_201, %c0_202, %c0_203], %289 {strides = array<i32>} : memref<8x8x1xf32, #tpu.memory_space<vmem>>, vector<1x8x1xf32>,
      %c6_204 = arith.constant 6 : index
      %c0_205 = arith.constant 0 : index
      %c0_206 = arith.constant 0 : index
      %290 = vector.load %arg10[%c6_204, %c0_205, %c0_206] : memref<8x8x16xf32, #tpu.memory_space<vmem>>, vector<1x8x16xf32>
      %291 = vector.shape_cast %290 : vector<1x8x16xf32> to vector<8x16xf32>
      %292 = vector.broadcast %277 : vector<8x1xf32> to vector<8x16xf32>
      %293 = arith.mulf %292, %291 : vector<8x16xf32>
      %cst_207 = arith.constant dense<0.000000e+00> : vector<8x16xf32>
      %294 = tpu.matmul %280, %267, %cst_207 {dimension_numbers = #tpu.dot_dimension_numbers<[1], [0], [0], [1], [0, 0, 1, 1], [], []>} : vector<8x8xf32>, vector<8x16xf32>, vector<8x16xf32> -> vector<8x16xf32>
      %295 = arith.addf %293, %294 : vector<8x16xf32>
      %c6_208 = arith.constant 6 : index
      %c0_209 = arith.constant 0 : index
      %c0_210 = arith.constant 0 : index
      %296 = vector.load %arg10[%c6_208, %c0_209, %c0_210] : memref<8x8x16xf32, #tpu.memory_space<vmem>>, vector<1x8x16xf32>
      %297 = vector.shape_cast %296 : vector<1x8x16xf32> to vector<8x16xf32>
      %298 = vector.shape_cast %295 : vector<8x16xf32> to vector<1x8x16xf32>
      tpu.vector_store %arg10[%c6_208, %c0_209, %c0_210], %298 {strides = array<i32>} : memref<8x8x16xf32, #tpu.memory_space<vmem>>, vector<1x8x16xf32>,
      %c6_211 = arith.constant 6 : index
      %c0_212 = arith.constant 0 : index
      %c0_213 = arith.constant 0 : index
      %299 = vector.load %arg8[%c6_211, %c0_212, %c0_213] : memref<8x8x1xf32, #tpu.memory_space<vmem>>, vector<1x8x1xf32>
      %300 = vector.shape_cast %299 : vector<1x8x1xf32> to vector<8x1xf32>
      %301 = vector.shape_cast %275 : vector<8x1xf32> to vector<1x8x1xf32>
      tpu.vector_store %arg8[%c6_211, %c0_212, %c0_213], %301 {strides = array<i32>} : memref<8x8x1xf32, #tpu.memory_space<vmem>>, vector<1x8x1xf32>,
      %c0_214 = arith.constant 0 : index
      %c0_215 = arith.constant 0 : index
      %c112 = arith.constant 112 : index
      %302 = vector.load %arg4[%c0_214, %c0_215, %c112] : memref<1x8x128xf32, #tpu.memory_space<vmem>>, vector<1x8x16xf32>
      %303 = vector.shape_cast %302 : vector<1x8x16xf32> to vector<8x16xf32>
      %c0_216 = arith.constant 0 : index
      %c0_217 = arith.constant 0 : index
      %c112_218 = arith.constant 112 : index
      %304 = vector.load %arg5[%c0_216, %c0_217, %c112_218] : memref<1x8x128xf32, #tpu.memory_space<vmem>>, vector<1x8x16xf32>
      %305 = vector.shape_cast %304 : vector<1x8x16xf32> to vector<8x16xf32>
      %c0_219 = arith.constant 0 : index
      %c0_220 = arith.constant 0 : index
      %c112_221 = arith.constant 112 : index
      %306 = vector.load %arg6[%c0_219, %c0_220, %c112_221] : memref<1x8x128xf32, #tpu.memory_space<vmem>>, vector<1x8x16xf32>
      %307 = vector.shape_cast %306 : vector<1x8x16xf32> to vector<8x16xf32>
      %cst_222 = arith.constant dense<0.000000e+00> : vector<8x8xf32>
      %308 = tpu.matmul %303, %305, %cst_222 {dimension_numbers = #tpu.dot_dimension_numbers<[1], [1], [0], [0], [0, 0, 1, 0], [], []>} : vector<8x16xf32>, vector<8x16xf32>, vector<8x8xf32> -> vector<8x8xf32>
      %cst_223 = arith.constant -1.000000e+30 : f32
      %309 = vector.broadcast %cst_223 : f32 to vector<8x8xf32>
      %310 = arith.select %21, %308, %309 : vector<8x8xi1>, vector<8x8xf32>
      %c7 = arith.constant 7 : index
      %c0_224 = arith.constant 0 : index
      %c0_225 = arith.constant 0 : index
      %311 = vector.load %arg8[%c7, %c0_224, %c0_225] : memref<8x8x1xf32, #tpu.memory_space<vmem>>, vector<1x8x1xf32>
      %312 = vector.shape_cast %311 : vector<1x8x1xf32> to vector<8x1xf32>
      %cst_226 = arith.constant dense<0xFF800000> : vector<8xf32>
      %313 = vector.multi_reduction <maximumf>, %310, %cst_226 [1] : vector<8x8xf32> to vector<8xf32>
      %314 = vector.shape_cast %313 : vector<8xf32> to vector<8x1xf32>
      %315 = arith.maximumf %312, %314 : vector<8x1xf32>
      %316 = arith.subf %312, %315 : vector<8x1xf32>
      %317 = math.exp %316 : vector<8x1xf32>
      %318 = vector.broadcast %315 : vector<8x1xf32> to vector<8x8xf32>
      %319 = arith.subf %310, %318 : vector<8x8xf32>
      %320 = math.exp %319 : vector<8x8xf32>
      %c7_227 = arith.constant 7 : index
      %c0_228 = arith.constant 0 : index
      %c0_229 = arith.constant 0 : index
      %321 = vector.load %arg9[%c7_227, %c0_228, %c0_229] : memref<8x8x1xf32, #tpu.memory_space<vmem>>, vector<1x8x1xf32>
      %322 = vector.shape_cast %321 : vector<1x8x1xf32> to vector<8x1xf32>
      %323 = arith.mulf %317, %322 : vector<8x1xf32>
      %cst_230 = arith.constant dense<0.000000e+00> : vector<8xf32>
      %324 = vector.multi_reduction <add>, %320, %cst_230 [1] : vector<8x8xf32> to vector<8xf32>
      %325 = vector.shape_cast %324 : vector<8xf32> to vector<8x1xf32>
      %326 = arith.addf %323, %325 : vector<8x1xf32>
      %c7_231 = arith.constant 7 : index
      %c0_232 = arith.constant 0 : index
      %c0_233 = arith.constant 0 : index
      %327 = vector.load %arg9[%c7_231, %c0_232, %c0_233] : memref<8x8x1xf32, #tpu.memory_space<vmem>>, vector<1x8x1xf32>
      %328 = vector.shape_cast %327 : vector<1x8x1xf32> to vector<8x1xf32>
      %329 = vector.shape_cast %326 : vector<8x1xf32> to vector<1x8x1xf32>
      tpu.vector_store %arg9[%c7_231, %c0_232, %c0_233], %329 {strides = array<i32>} : memref<8x8x1xf32, #tpu.memory_space<vmem>>, vector<1x8x1xf32>,
      %c7_234 = arith.constant 7 : index
      %c0_235 = arith.constant 0 : index
      %c0_236 = arith.constant 0 : index
      %330 = vector.load %arg10[%c7_234, %c0_235, %c0_236] : memref<8x8x16xf32, #tpu.memory_space<vmem>>, vector<1x8x16xf32>
      %331 = vector.shape_cast %330 : vector<1x8x16xf32> to vector<8x16xf32>
      %332 = vector.broadcast %317 : vector<8x1xf32> to vector<8x16xf32>
      %333 = arith.mulf %332, %331 : vector<8x16xf32>
      %cst_237 = arith.constant dense<0.000000e+00> : vector<8x16xf32>
      %334 = tpu.matmul %320, %307, %cst_237 {dimension_numbers = #tpu.dot_dimension_numbers<[1], [0], [0], [1], [0, 0, 1, 1], [], []>} : vector<8x8xf32>, vector<8x16xf32>, vector<8x16xf32> -> vector<8x16xf32>
      %335 = arith.addf %333, %334 : vector<8x16xf32>
      %c7_238 = arith.constant 7 : index
      %c0_239 = arith.constant 0 : index
      %c0_240 = arith.constant 0 : index
      %336 = vector.load %arg10[%c7_238, %c0_239, %c0_240] : memref<8x8x16xf32, #tpu.memory_space<vmem>>, vector<1x8x16xf32>
      %337 = vector.shape_cast %336 : vector<1x8x16xf32> to vector<8x16xf32>
      %338 = vector.shape_cast %335 : vector<8x16xf32> to vector<1x8x16xf32>
      tpu.vector_store %arg10[%c7_238, %c0_239, %c0_240], %338 {strides = array<i32>} : memref<8x8x16xf32, #tpu.memory_space<vmem>>, vector<1x8x16xf32>,
      %c7_241 = arith.constant 7 : index
      %c0_242 = arith.constant 0 : index
      %c0_243 = arith.constant 0 : index
      %339 = vector.load %arg8[%c7_241, %c0_242, %c0_243] : memref<8x8x1xf32, #tpu.memory_space<vmem>>, vector<1x8x1xf32>
      %340 = vector.shape_cast %339 : vector<1x8x1xf32> to vector<8x1xf32>
      %341 = vector.shape_cast %315 : vector<8x1xf32> to vector<1x8x1xf32>
      tpu.vector_store %arg8[%c7_241, %c0_242, %c0_243], %341 {strides = array<i32>} : memref<8x8x1xf32, #tpu.memory_space<vmem>>, vector<1x8x1xf32>,
      %c0_244 = arith.constant 0 : index
      %c0_245 = arith.constant 0 : index
      %c0_246 = arith.constant 0 : index
      %342 = vector.load %arg10[%c0_244, %c0_245, %c0_246] : memref<8x8x16xf32, #tpu.memory_space<vmem>>, vector<1x8x16xf32>
      %343 = vector.shape_cast %342 : vector<1x8x16xf32> to vector<8x16xf32>
      %c0_247 = arith.constant 0 : index
      %c0_248 = arith.constant 0 : index
      %c0_249 = arith.constant 0 : index
      %344 = vector.load %arg9[%c0_247, %c0_248, %c0_249] : memref<8x8x1xf32, #tpu.memory_space<vmem>>, vector<1x8x1xf32>
      %345 = vector.shape_cast %344 : vector<1x8x1xf32> to vector<8x1xf32>
      %346 = tpu.reciprocal %345 {approx = true} : vector<8x1xf32> -> vector<8x1xf32>
      %347 = vector.broadcast %346 : vector<8x1xf32> to vector<8x16xf32>
      %348 = arith.mulf %343, %347 : vector<8x16xf32>
      %c0_250 = arith.constant 0 : index
      %c0_251 = arith.constant 0 : index
      %c0_252 = arith.constant 0 : index
      %349 = vector.load %arg7[%c0_250, %c0_251, %c0_252] : memref<1x8x128xf32, #tpu.memory_space<vmem>>, vector<1x8x16xf32>
      %350 = vector.shape_cast %349 : vector<1x8x16xf32> to vector<8x16xf32>
      %351 = vector.shape_cast %348 : vector<8x16xf32> to vector<1x8x16xf32>
      tpu.vector_store %arg7[%c0_250, %c0_251, %c0_252], %351 {strides = array<i32>} : memref<1x8x128xf32, #tpu.memory_space<vmem>>, vector<1x8x16xf32>,
      %c1_253 = arith.constant 1 : index
      %c0_254 = arith.constant 0 : index
      %c0_255 = arith.constant 0 : index
      %352 = vector.load %arg10[%c1_253, %c0_254, %c0_255] : memref<8x8x16xf32, #tpu.memory_space<vmem>>, vector<1x8x16xf32>
      %353 = vector.shape_cast %352 : vector<1x8x16xf32> to vector<8x16xf32>
      %c1_256 = arith.constant 1 : index
      %c0_257 = arith.constant 0 : index
      %c0_258 = arith.constant 0 : index
      %354 = vector.load %arg9[%c1_256, %c0_257, %c0_258] : memref<8x8x1xf32, #tpu.memory_space<vmem>>, vector<1x8x1xf32>
      %355 = vector.shape_cast %354 : vector<1x8x1xf32> to vector<8x1xf32>
      %356 = tpu.reciprocal %355 {approx = true} : vector<8x1xf32> -> vector<8x1xf32>
      %357 = vector.broadcast %356 : vector<8x1xf32> to vector<8x16xf32>
      %358 = arith.mulf %353, %357 : vector<8x16xf32>
      %c0_259 = arith.constant 0 : index
      %c0_260 = arith.constant 0 : index
      %c16_261 = arith.constant 16 : index
      %359 = vector.load %arg7[%c0_259, %c0_260, %c16_261] : memref<1x8x128xf32, #tpu.memory_space<vmem>>, vector<1x8x16xf32>
      %360 = vector.shape_cast %359 : vector<1x8x16xf32> to vector<8x16xf32>
      %361 = vector.shape_cast %358 : vector<8x16xf32> to vector<1x8x16xf32>
      tpu.vector_store %arg7[%c0_259, %c0_260, %c16_261], %361 {strides = array<i32>} : memref<1x8x128xf32, #tpu.memory_space<vmem>>, vector<1x8x16xf32>,
      %c2_262 = arith.constant 2 : index
      %c0_263 = arith.constant 0 : index
      %c0_264 = arith.constant 0 : index
      %362 = vector.load %arg10[%c2_262, %c0_263, %c0_264] : memref<8x8x16xf32, #tpu.memory_space<vmem>>, vector<1x8x16xf32>
      %363 = vector.shape_cast %362 : vector<1x8x16xf32> to vector<8x16xf32>
      %c2_265 = arith.constant 2 : index
      %c0_266 = arith.constant 0 : index
      %c0_267 = arith.constant 0 : index
      %364 = vector.load %arg9[%c2_265, %c0_266, %c0_267] : memref<8x8x1xf32, #tpu.memory_space<vmem>>, vector<1x8x1xf32>
      %365 = vector.shape_cast %364 : vector<1x8x1xf32> to vector<8x1xf32>
      %366 = tpu.reciprocal %365 {approx = true} : vector<8x1xf32> -> vector<8x1xf32>
      %367 = vector.broadcast %366 : vector<8x1xf32> to vector<8x16xf32>
      %368 = arith.mulf %363, %367 : vector<8x16xf32>
      %c0_268 = arith.constant 0 : index
      %c0_269 = arith.constant 0 : index
      %c32_270 = arith.constant 32 : index
      %369 = vector.load %arg7[%c0_268, %c0_269, %c32_270] : memref<1x8x128xf32, #tpu.memory_space<vmem>>, vector<1x8x16xf32>
      %370 = vector.shape_cast %369 : vector<1x8x16xf32> to vector<8x16xf32>
      %371 = vector.shape_cast %368 : vector<8x16xf32> to vector<1x8x16xf32>
      tpu.vector_store %arg7[%c0_268, %c0_269, %c32_270], %371 {strides = array<i32>} : memref<1x8x128xf32, #tpu.memory_space<vmem>>, vector<1x8x16xf32>,
      %c3_271 = arith.constant 3 : index
      %c0_272 = arith.constant 0 : index
      %c0_273 = arith.constant 0 : index
      %372 = vector.load %arg10[%c3_271, %c0_272, %c0_273] : memref<8x8x16xf32, #tpu.memory_space<vmem>>, vector<1x8x16xf32>
      %373 = vector.shape_cast %372 : vector<1x8x16xf32> to vector<8x16xf32>
      %c3_274 = arith.constant 3 : index
      %c0_275 = arith.constant 0 : index
      %c0_276 = arith.constant 0 : index
      %374 = vector.load %arg9[%c3_274, %c0_275, %c0_276] : memref<8x8x1xf32, #tpu.memory_space<vmem>>, vector<1x8x1xf32>
      %375 = vector.shape_cast %374 : vector<1x8x1xf32> to vector<8x1xf32>
      %376 = tpu.reciprocal %375 {approx = true} : vector<8x1xf32> -> vector<8x1xf32>
      %377 = vector.broadcast %376 : vector<8x1xf32> to vector<8x16xf32>
      %378 = arith.mulf %373, %377 : vector<8x16xf32>
      %c0_277 = arith.constant 0 : index
      %c0_278 = arith.constant 0 : index
      %c48_279 = arith.constant 48 : index
      %379 = vector.load %arg7[%c0_277, %c0_278, %c48_279] : memref<1x8x128xf32, #tpu.memory_space<vmem>>, vector<1x8x16xf32>
      %380 = vector.shape_cast %379 : vector<1x8x16xf32> to vector<8x16xf32>
      %381 = vector.shape_cast %378 : vector<8x16xf32> to vector<1x8x16xf32>
      tpu.vector_store %arg7[%c0_277, %c0_278, %c48_279], %381 {strides = array<i32>} : memref<1x8x128xf32, #tpu.memory_space<vmem>>, vector<1x8x16xf32>,
      %c4_280 = arith.constant 4 : index
      %c0_281 = arith.constant 0 : index
      %c0_282 = arith.constant 0 : index
      %382 = vector.load %arg10[%c4_280, %c0_281, %c0_282] : memref<8x8x16xf32, #tpu.memory_space<vmem>>, vector<1x8x16xf32>
      %383 = vector.shape_cast %382 : vector<1x8x16xf32> to vector<8x16xf32>
      %c4_283 = arith.constant 4 : index
      %c0_284 = arith.constant 0 : index
      %c0_285 = arith.constant 0 : index
      %384 = vector.load %arg9[%c4_283, %c0_284, %c0_285] : memref<8x8x1xf32, #tpu.memory_space<vmem>>, vector<1x8x1xf32>
      %385 = vector.shape_cast %384 : vector<1x8x1xf32> to vector<8x1xf32>
      %386 = tpu.reciprocal %385 {approx = true} : vector<8x1xf32> -> vector<8x1xf32>
      %387 = vector.broadcast %386 : vector<8x1xf32> to vector<8x16xf32>
      %388 = arith.mulf %383, %387 : vector<8x16xf32>
      %c0_286 = arith.constant 0 : index
      %c0_287 = arith.constant 0 : index
      %c64_288 = arith.constant 64 : index
      %389 = vector.load %arg7[%c0_286, %c0_287, %c64_288] : memref<1x8x128xf32, #tpu.memory_space<vmem>>, vector<1x8x16xf32>
      %390 = vector.shape_cast %389 : vector<1x8x16xf32> to vector<8x16xf32>
      %391 = vector.shape_cast %388 : vector<8x16xf32> to vector<1x8x16xf32>
      tpu.vector_store %arg7[%c0_286, %c0_287, %c64_288], %391 {strides = array<i32>} : memref<1x8x128xf32, #tpu.memory_space<vmem>>, vector<1x8x16xf32>,
      %c5_289 = arith.constant 5 : index
      %c0_290 = arith.constant 0 : index
      %c0_291 = arith.constant 0 : index
      %392 = vector.load %arg10[%c5_289, %c0_290, %c0_291] : memref<8x8x16xf32, #tpu.memory_space<vmem>>, vector<1x8x16xf32>
      %393 = vector.shape_cast %392 : vector<1x8x16xf32> to vector<8x16xf32>
      %c5_292 = arith.constant 5 : index
      %c0_293 = arith.constant 0 : index
      %c0_294 = arith.constant 0 : index
      %394 = vector.load %arg9[%c5_292, %c0_293, %c0_294] : memref<8x8x1xf32, #tpu.memory_space<vmem>>, vector<1x8x1xf32>
      %395 = vector.shape_cast %394 : vector<1x8x1xf32> to vector<8x1xf32>
      %396 = tpu.reciprocal %395 {approx = true} : vector<8x1xf32> -> vector<8x1xf32>
      %397 = vector.broadcast %396 : vector<8x1xf32> to vector<8x16xf32>
      %398 = arith.mulf %393, %397 : vector<8x16xf32>
      %c0_295 = arith.constant 0 : index
      %c0_296 = arith.constant 0 : index
      %c80_297 = arith.constant 80 : index
      %399 = vector.load %arg7[%c0_295, %c0_296, %c80_297] : memref<1x8x128xf32, #tpu.memory_space<vmem>>, vector<1x8x16xf32>
      %400 = vector.shape_cast %399 : vector<1x8x16xf32> to vector<8x16xf32>
      %401 = vector.shape_cast %398 : vector<8x16xf32> to vector<1x8x16xf32>
      tpu.vector_store %arg7[%c0_295, %c0_296, %c80_297], %401 {strides = array<i32>} : memref<1x8x128xf32, #tpu.memory_space<vmem>>, vector<1x8x16xf32>,
      %c6_298 = arith.constant 6 : index
      %c0_299 = arith.constant 0 : index
      %c0_300 = arith.constant 0 : index
      %402 = vector.load %arg10[%c6_298, %c0_299, %c0_300] : memref<8x8x16xf32, #tpu.memory_space<vmem>>, vector<1x8x16xf32>
      %403 = vector.shape_cast %402 : vector<1x8x16xf32> to vector<8x16xf32>
      %c6_301 = arith.constant 6 : index
      %c0_302 = arith.constant 0 : index
      %c0_303 = arith.constant 0 : index
      %404 = vector.load %arg9[%c6_301, %c0_302, %c0_303] : memref<8x8x1xf32, #tpu.memory_space<vmem>>, vector<1x8x1xf32>
      %405 = vector.shape_cast %404 : vector<1x8x1xf32> to vector<8x1xf32>
      %406 = tpu.reciprocal %405 {approx = true} : vector<8x1xf32> -> vector<8x1xf32>
      %407 = vector.broadcast %406 : vector<8x1xf32> to vector<8x16xf32>
      %408 = arith.mulf %403, %407 : vector<8x16xf32>
      %c0_304 = arith.constant 0 : index
      %c0_305 = arith.constant 0 : index
      %c96_306 = arith.constant 96 : index
      %409 = vector.load %arg7[%c0_304, %c0_305, %c96_306] : memref<1x8x128xf32, #tpu.memory_space<vmem>>, vector<1x8x16xf32>
      %410 = vector.shape_cast %409 : vector<1x8x16xf32> to vector<8x16xf32>
      %411 = vector.shape_cast %408 : vector<8x16xf32> to vector<1x8x16xf32>
      tpu.vector_store %arg7[%c0_304, %c0_305, %c96_306], %411 {strides = array<i32>} : memref<1x8x128xf32, #tpu.memory_space<vmem>>, vector<1x8x16xf32>,
      %c7_307 = arith.constant 7 : index
      %c0_308 = arith.constant 0 : index
      %c0_309 = arith.constant 0 : index
      %412 = vector.load %arg10[%c7_307, %c0_308, %c0_309] : memref<8x8x16xf32, #tpu.memory_space<vmem>>, vector<1x8x16xf32>
      %413 = vector.shape_cast %412 : vector<1x8x16xf32> to vector<8x16xf32>
      %c7_310 = arith.constant 7 : index
      %c0_311 = arith.constant 0 : index
      %c0_312 = arith.constant 0 : index
      %414 = vector.load %arg9[%c7_310, %c0_311, %c0_312] : memref<8x8x1xf32, #tpu.memory_space<vmem>>, vector<1x8x1xf32>
      %415 = vector.shape_cast %414 : vector<1x8x1xf32> to vector<8x1xf32>
      %416 = tpu.reciprocal %415 {approx = true} : vector<8x1xf32> -> vector<8x1xf32>
      %417 = vector.broadcast %416 : vector<8x1xf32> to vector<8x16xf32>
      %418 = arith.mulf %413, %417 : vector<8x16xf32>
      %c0_313 = arith.constant 0 : index
      %c0_314 = arith.constant 0 : index
      %c112_315 = arith.constant 112 : index
      %419 = vector.load %arg7[%c0_313, %c0_314, %c112_315] : memref<1x8x128xf32, #tpu.memory_space<vmem>>, vector<1x8x16xf32>
      %420 = vector.shape_cast %419 : vector<1x8x16xf32> to vector<8x16xf32>
      %421 = vector.shape_cast %418 : vector<8x16xf32> to vector<1x8x16xf32>
      tpu.vector_store %arg7[%c0_313, %c0_314, %c112_315], %421 {strides = array<i32>} : memref<1x8x128xf32, #tpu.memory_space<vmem>>, vector<1x8x16xf32>,
    } else {
    }
    return
  }
  func.func @transform_0(%arg0: i32, %arg1: i32, %arg2: memref<3xi32, #tpu.memory_space<smem>>, %arg3: memref<3xi32, #tpu.memory_space<smem>>) -> (i32, i32, i32) {
    %0 = arith.index_cast %arg1 : i32 to index
    %1 = memref.load %arg2[%0] : memref<3xi32, #tpu.memory_space<smem>>
    %c0_i32 = arith.constant 0 : i32
    %c0_i32_0 = arith.constant 0 : i32
    return %arg0, %1, %c0_i32 : i32, i32, i32
  }
  func.func @transform_1(%arg0: i32, %arg1: i32, %arg2: memref<3xi32, #tpu.memory_space<smem>>, %arg3: memref<3xi32, #tpu.memory_space<smem>>) -> (i32, i32, i32) {
    %0 = arith.index_cast %arg1 : i32 to index
    %1 = memref.load %arg3[%0] : memref<3xi32, #tpu.memory_space<smem>>
    %c0_i32 = arith.constant 0 : i32
    %c0_i32_0 = arith.constant 0 : i32
    return %arg0, %1, %c0_i32 : i32, i32, i32
  }
  func.func @transform_2(%arg0: i32, %arg1: i32, %arg2: memref<3xi32, #tpu.memory_space<smem>>, %arg3: memref<3xi32, #tpu.memory_space<smem>>) -> (i32, i32, i32) {
    %0 = arith.index_cast %arg1 : i32 to index
    %1 = memref.load %arg3[%0] : memref<3xi32, #tpu.memory_space<smem>>
    %c0_i32 = arith.constant 0 : i32
    %c0_i32_0 = arith.constant 0 : i32
    return %arg0, %1, %c0_i32 : i32, i32, i32
  }
  func.func @transform_3(%arg0: i32, %arg1: i32, %arg2: memref<3xi32, #tpu.memory_space<smem>>, %arg3: memref<3xi32, #tpu.memory_space<smem>>) -> (i32, i32, i32) {
    %0 = arith.index_cast %arg1 : i32 to index
    %1 = memref.load %arg2[%0] : memref<3xi32, #tpu.memory_space<smem>>
    %c0_i32 = arith.constant 0 : i32
    %c0_i32_0 = arith.constant 0 : i32
    return %arg0, %1, %c0_i32 : i32, i32, i32
  }
}

</mosaic_0001>

<bundles_post_ra>
// kernel: tile.6
= control target key start
LH: loop header
LB: loop body
LE: loop exit
PB: predicated region body
PF: predicated region fallthrough
CT: control target
= control target key end

     0   :  { %s22_s0 = inlined_call_operand.vmem [shape: f32[2], index: 0, kind: input, shape index: {}]   ;;  %s23_s1 = inlined_call_operand.vmem [shape: f32[8,2], index: 1, kind: output, shape index: {}]  }
   0x1   :  { %v4_v0 = vld [vmem:[%s22_s0] ss:$0 sm:$0xff] }
   0x2   :  { %5 = vst [vmem:[%s23_s1] sm:$0xff] %v4_v0 }

// kernel: mul.5
= control target key start
LH: loop header
LB: loop body
LE: loop exit
PB: predicated region body
PF: predicated region fallthrough
CT: control target
= control target key end

     0   :  { %s69_s10 = smov 14   ;;  %s70_s11 = smov 10   ;;  %vm3_vm0 = vcmask 15360   ;;  %vm9_vm1 = vcmask 130160   ;;  %vm15_vm2 = vcmask 113760   ;;  %vm21_vm3 = vcmask 97360   ;;  %s113_s0 = inlined_call_operand.vmem [shape: f32[8,2], index: 0, kind: input, shape index: {}]   ;;  %s114_s1 = inlined_call_operand.vmem [shape: f32[16], index: 1, kind: output, shape index: {}]  }
   0x1   :  { %v55_v0 = vld [vmem:[%s113_s0 + $0x7] sm:$0x1]   ;;  %v57_v1 = vld [vmem:[%s113_s0 + $0x5] sm:$0x1]   ;;  %v56_v2 = vld [vmem:[%s113_s0 + $0x6] sm:$0x1]  }
   0x2   :  { %7 = vrot.lane.b32.xlu0 %v55_v0, %s69_s10  ;;  %19 = vrot.lane.b32.xlu1 %v57_v1, %s70_s11  ;;  %v58_v3 = vld [vmem:[%s113_s0 + $0x4] sm:$0x1]   ;;  %v2_v4 = vld [vmem:[%s113_s0] sm:$0x1]   ;;  %s71_s18 = smov 12   ;;  %s72_s19 = smov 8  }
   0x3   :  { %4 = vst.msk [vmem:[#allocation0] sm:$0x1] %vm3_vm0, %v2_v4   ;;  %v59_v5 = vld [vmem:[%s113_s0 + $0x3] sm:$0x1]   ;;  %v60_v6 = vld [vmem:[%s113_s0 + $0x2] sm:$0x1]  }
   0x4   :  { %s73_s24 = smov 6   ;;  %s74_s25 = smov 4   ;;  %v61_v7 = vld [vmem:[%s113_s0 + $0x1] sm:$0x1]   ;;  %vm27_vm4 = vcmask 80960   ;;  %vm33_vm5 = vcmask 64560  }
   0x5   :  { %s75_s0 = smov 2   ;;  %vm39_vm6 = vcmask 48160   ;;  %vm45_vm7 = vcmask 31760  }
   0x6   :  { %13 = vrot.lane.b32.xlu0 %v56_v2, %s71_s18  ;;  %25 = vrot.lane.b32.xlu1 %v58_v3, %s72_s19 }
   0xa   :  { %31 = vrot.lane.b32.xlu0 %v59_v5, %s73_s24  ;;  %37 = vrot.lane.b32.xlu1 %v60_v6, %s74_s25 }
   0xe   :  { %43 = vrot.lane.b32.xlu0 %v61_v7, %s75_s0 }
  0x74   :  { %v8_v8 = vpop.permute.xlu0 %7   ;;  %v20_v9 = vpop.permute.xlu1 %19  }
  0x75   :  { %10 = vst.msk [vmem:[#allocation0] sm:$0x1] %vm9_vm1, %v8_v8  }
  0x78   :  { %v14_v10 = vpop.permute.xlu0 %13   ;;  %v26_v11 = vpop.permute.xlu1 %25  }
  0x79   :  { %16 = vst.msk [vmem:[#allocation0] sm:$0x1] %vm15_vm2, %v14_v10  }
  0x7a   :  { %22 = vst.msk [vmem:[#allocation0] sm:$0x1] %vm21_vm3, %v20_v9  }
  0x7b   :  { %28 = vst.msk [vmem:[#allocation0] sm:$0x1] %vm27_vm4, %v26_v11  }
  0x7c   :  { %v32_v12 = vpop.permute.xlu0 %31   ;;  %v38_v13 = vpop.permute.xlu1 %37  }
  0x7d   :  { %34 = vst.msk [vmem:[#allocation0] sm:$0x1] %vm33_vm5, %v32_v12  }
  0x7e   :  { %40 = vst.msk [vmem:[#allocation0] sm:$0x1] %vm39_vm6, %v38_v13  }
  0x80   :  { %v44_v14 = vpop.permute.xlu0 %43  }
  0x81   :  { %46 = vst.msk [vmem:[#allocation0] sm:$0x1] %vm45_vm7, %v44_v14  }
  0x88   :  { %v51_v15 = vld [vmem:[#allocation0] sm:$0x1] }
  0x89   :  { %54 = vst [vmem:[%s114_s1] sm:$0x1] %v51_v15 }

// kernel: attention_forward.5
= control target key start
LH: loop header
LB: loop body
LE: loop exit
PB: predicated region body
PF: predicated region fallthrough
CT: control target
= control target key end

     0   :  { %s352_s0 = inlined_call_operand.vmem [shape: f32[32,128], index: 0, kind: input, shape index: {}]   ;;  %s353_s1 = inlined_call_operand.vmem [shape: f32[128,128], index: 1, kind: input, shape index: {}]   ;;  %s354_s2 = inlined_call_operand.vmem [shape: f32[1,128], index: 2, kind: input, shape index: {}]   ;;  %s355_s3 = inlined_call_operand.hbm [shape: f32[32,128], index: 3, kind: output, shape index: {}]  }
   0x1   :  { %v34_v0 = vld [vmem:[%s353_s1 + $0x78] sm:$0xff]  ;;  %v33_v1 = vld [vmem:[%s353_s1 + $0x70] sm:$0xff]  ;;  %v32_v2 = vld [vmem:[%s353_s1 + $0x68] sm:$0xff] }
   0x2   :  { %168 = vmatprep.subr.mxu0 %v34_v0  ;;  %206 = vmatprep.subr.mxu1 %v34_v0  ;;  %v31_v3 = vld [vmem:[%s353_s1 + $0x60] sm:$0xff]  ;;  %v30_v4 = vld [vmem:[%s353_s1 + $0x58] sm:$0xff] }
   0x3   :  { %169 = vmatpush3.msra.mxu0 %v34_v0  ;;  %222 = vmatpush3.msra.mxu1 %v34_v0 }
   0x4   :  { %170 = vmatprep.subr.mxu0 %v33_v1  ;;  %207 = vmatprep.subr.mxu1 %v33_v1 }
   0x5   :  { %171 = vmatpush3.msra.mxu0 %v33_v1  ;;  %223 = vmatpush3.msra.mxu1 %v33_v1 }
   0x6   :  { %172 = vmatprep.subr.mxu0 %v32_v2  ;;  %208 = vmatprep.subr.mxu1 %v32_v2 }
   0x7   :  { %173 = vmatpush3.msra.mxu0 %v32_v2  ;;  %224 = vmatpush3.msra.mxu1 %v32_v2 }
   0x8   :  { %8 = vsyncpa [#allocation3], 0  ;;  %174 = vmatprep.subr.mxu0 %v31_v3  ;;  %209 = vmatprep.subr.mxu1 %v31_v3  ;;  %v29_v5 = vld [vmem:[%s353_s1 + $0x50] sm:$0xff]  ;;  %v28_v6 = vld [vmem:[%s353_s1 + $0x48] sm:$0xff]  ;;  %s263_s26 = smov [#allocation2]  }
   0x9   :  { %175 = vmatpush3.msra.mxu0 %v31_v3  ;;  %225 = vmatpush3.msra.mxu1 %v31_v3  ;;  %v27_v7 = vld [vmem:[%s353_s1 + $0x40] sm:$0xff]  ;;  %v26_v8 = vld [vmem:[%s353_s1 + $0x38] sm:$0xff]  ;;  %v25_v9 = vld [vmem:[%s353_s1 + $0x30] sm:$0xff]  ;;  %s136_s27 = sshll.u32 %s263_s26, 4  ;;  %s137_s27 = int_to_ptr.vmem [resolvable:$true] %s136_s27 }
   0xa   :  { %176 = vmatprep.subr.mxu0 %v30_v4  ;;  %210 = vmatprep.subr.mxu1 %v30_v4  ;;  %v24_v10 = vld [vmem:[%s353_s1 + $0x28] sm:$0xff]  ;;  %v23_v11 = vld [vmem:[%s353_s1 + $0x20] sm:$0xff]  ;;  %v22_v12 = vld [vmem:[%s353_s1 + $0x18] sm:$0xff]  ;;  %p246_p1 = scmp.lt.s32.totalorder %s137_s27, %s137_s27 }
   0xb   :  { %177 = vmatpush3.msra.mxu0 %v30_v4  ;;  %226 = vmatpush3.msra.mxu1 %v30_v4  ;;  %v21_v13 = vld [vmem:[%s353_s1 + $0x10] sm:$0xff]  ;;  %v20_v14 = vld [vmem:[%s353_s1 + $0x8] sm:$0xff]  ;;  %v19_v15 = vld [vmem:[%s353_s1] sm:$0xff] }
   0xc   :  { %178 = vmatprep.subr.mxu0 %v29_v5  ;;  %211 = vmatprep.subr.mxu1 %v29_v5  ;;  %v15_v16 = vld [vmem:[%s352_s0] sm:$0xff]  ;;  %v17_v17 = vld [vmem:[%s352_s0 + $0x10] sm:$0xff]  ;;  %v16_v18 = vld [vmem:[%s352_s0 + $0x8] sm:$0xff] }
   0xd   :  { %179 = vmatpush3.msra.mxu0 %v29_v5  ;;  %227 = vmatpush3.msra.mxu1 %v29_v5  ;;  %v18_v19 = vld [vmem:[%s352_s0 + $0x18] sm:$0xff]  ;;  %v147_v20 = vld [vmem:[%s354_s2] ss:$0 sm:$0xff]  ;;  %s241_s0 = scalar_lea.vmem %s137_s27, 512 }
   0xe   :  { %180 = vmatprep.subr.mxu0 %v28_v6  ;;  %212 = vmatprep.subr.mxu1 %v28_v6  ;;  %p242_p0 = scmp.ne.s32.totalorder %s137_s27, %s241_s0  ;;  %p247_p2 = scmp.lt.s32.totalorder %s241_s0, %s241_s0 }
   0xf   :  { %181 = vmatpush3.msra.mxu0 %v28_v6  ;;  %228 = vmatpush3.msra.mxu1 %v28_v6 }
  0x10   :  { %182 = vmatprep.subr.mxu0 %v27_v7  ;;  %213 = vmatprep.subr.mxu1 %v27_v7  ;;  %p248_p3 = por %p247_p2, %p246_p1 }
  0x11   :  { %183 = vmatpush3.msra.mxu0 %v27_v7  ;;  %229 = vmatpush3.msra.mxu1 %v27_v7 }
  0x12   :  { %184 = vmatprep.subr.mxu0 %v26_v8  ;;  %214 = vmatprep.subr.mxu1 %v26_v8  ;;  %p249_p4 = pnand %p248_p3, %p242_p0 }
  0x13   :  { %185 = vmatpush3.msra.mxu0 %v26_v8  ;;  %230 = vmatpush3.msra.mxu1 %v26_v8 }
  0x14   :  { %186 = vmatprep.subr.mxu0 %v25_v9  ;;  %215 = vmatprep.subr.mxu1 %v25_v9 }
  0x15   :  { %187 = vmatpush3.msra.mxu0 %v25_v9  ;;  %231 = vmatpush3.msra.mxu1 %v25_v9 }
  0x16   :  { %188 = vmatprep.subr.mxu0 %v24_v10  ;;  %216 = vmatprep.subr.mxu1 %v24_v10 }
  0x17   :  { %189 = vmatpush3.msra.mxu0 %v24_v10  ;;  %232 = vmatpush3.msra.mxu1 %v24_v10 }
  0x18   :  { %190 = vmatprep.subr.mxu0 %v23_v11  ;;  %217 = vmatprep.subr.mxu1 %v23_v11 }
  0x19   :  { %191 = vmatpush3.msra.mxu0 %v23_v11  ;;  %233 = vmatpush3.msra.mxu1 %v23_v11 }
  0x1a   :  { %192 = vmatprep.subr.mxu0 %v22_v12  ;;  %218 = vmatprep.subr.mxu1 %v22_v12 }
  0x1b   :  { %193 = vmatpush3.msra.mxu0 %v22_v12  ;;  %234 = vmatpush3.msra.mxu1 %v22_v12 }
  0x1c   :  { %194 = vmatprep.subr.mxu0 %v21_v13  ;;  %219 = vmatprep.subr.mxu1 %v21_v13 }
  0x1d   :  { %195 = vmatpush3.msra.mxu0 %v21_v13  ;;  %235 = vmatpush3.msra.mxu1 %v21_v13 }
  0x1e   :  { %196 = vmatprep.subr.mxu0 %v20_v14  ;;  %220 = vmatprep.subr.mxu1 %v20_v14 }
  0x1f   :  { %197 = vmatpush3.msra.mxu0 %v20_v14  ;;  %236 = vmatpush3.msra.mxu1 %v20_v14 }
  0x20   :  { %198 = vmatprep.subr.mxu0 %v19_v15  ;;  %221 = vmatprep.subr.mxu1 %v19_v15 }
  0x21   :  { %199 = vmatpush3.msra.mxu0 %v19_v15  ;;  %237 = vmatpush3.msra.mxu1 %v19_v15 }
  0x22   :  { %200 = vmatprep.mubr.f32.mxu0 %v15_v16  ;;  %203 = vmatprep.mubr.f32.mxu1 %v17_v17 }
  0x23   :  { %201 = vmatmul.mubr.f32.vlgmr.msra.gmra.mxu0 %v16_v18  ;;  %204 = vmatmul.mubr.f32.vlgmr.msra.gmra.mxu1 %v18_v19 }
  0xe3   :  { %v202_v21 = vpop.f32.mrf.mxu0  ;;  %v205_v22 = vpop.f32.mrf.mxu1 }
  0xe4   :  { %v114_v23 = vadd.f32 %v202_v21, %v147_v20  ;;  %v124_v24 = vadd.f32 %v205_v22, %v147_v20 }
  0xe5   :  { %v108_v25 = vpop.f32.mrf.mxu0  ;;  %v118_v26 = vpop.f32.mrf.mxu1 }
  0xe6   :  { %128 = vst [vmem:[#allocation2 + $0x8] sm:$0xff] %v114_v23  ;;  %130 = vst [vmem:[#allocation2 + $0x18] sm:$0xff] %v124_v24  ;;  %v109_v27 = vadd.f32 %v147_v20, %v108_v25  ;;  %v119_v28 = vadd.f32 %v147_v20, %v118_v26 }
  0xe8   :  { %127 = vst [vmem:[#allocation2] sm:$0xff] %v109_v27  ;;  %129 = vst [vmem:[#allocation2 + $0x10] sm:$0xff] %v119_v28 }
  0xe9   :  { %252 = shalt.err (!%p249_p4)
}
  0xea   :  { %s264_s2 = smov 128   ;;  %s265_s28 = smov 8  }
  0xeb   :  { %142 = dma.vmem_to_hbm [thread:$0]  %s137_s27, 512, %s355_s3, [#allocation3], %s264_s2, %s264_s2, %s265_s28  }
  0xec   :  { %261 = dma.done.wait [#allocation3], 512  }
  0xed   :  { %262 = vsyncadd [#allocation3], 4294966784 }
  0xee   :  { %146 = vsyncpa [#allocation3], 1 }

// kernel: attention_forward.3
= control target key start
LH: loop header
LB: loop body
LE: loop exit
PB: predicated region body
PF: predicated region fallthrough
CT: control target
= control target key end

     0   :  { %17 = vsyncpa [#allocation3], 0  ;;  %s2028_s0 = inlined_call_operand.vmem [shape: f32[2,16,128], index: 0, kind: input, shape index: {}]   ;;  %s2029_s1 = inlined_call_operand.vmem [shape: f32[128,128], index: 1, kind: input, shape index: {}]   ;;  %s2030_s2 = inlined_call_operand.hbm [shape: f32[128,128], index: 2, kind: input, shape index: {}]   ;;  %s2031_s3 = inlined_call_operand.hbm [shape: f32[128,128], index: 3, kind: input, shape index: {}]   ;;  %s2032_s4 = inlined_call_operand.vmem [shape: f32[1,128], index: 4, kind: input, shape index: {}]   ;;  %s2033_s5 = inlined_call_operand.vmem [shape: f32[1,128], index: 5, kind: input, shape index: {}]   ;;  %s2034_s6 = inlined_call_operand.vmem [shape: f32[1,128], index: 6, kind: input, shape index: {}]   ;;  %s2035_s7 = inlined_call_operand.vmem [shape: f32[16,16], index: 7, kind: input, shape index: {}]   ;;  %s2036_s8 = inlined_call_operand.vmem [shape: f32[16,16], index: 8, kind: input, shape index: {}]   ;;  %s2037_s9 = inlined_call_operand.vmem [shape: f32[2,16,128], index: 9, kind: output, shape index: {0}]   ;;  %s2038_s10 = inlined_call_operand.vmem [shape: f32[2,16,128], index: 10, kind: output, shape index: {1}]   ;;  %s2039_s11 = inlined_call_operand.vmem [shape: f32[2,16,128], index: 11, kind: output, shape index: {2}]  }
   0x1   :  { %18 = vsyncpa [#allocation5], 0  ;;  %s1757_s17 = smov 0   ;;  %s1759_s18 = smov 0  }
   0x2   :  { %s1761_s19 = smov 0   ;;  %s1763_s20 = smov 0  }
   0x3   :  { %s1765_s21 = smov 0  }
   0x4 LB: > { %s1324_s22 = sadd.s32 4294967295, %s1680_s21   ;;  %s36_s23 = sadd.s32 1, %s1672_s19  ;;  %s1680_s21 = sphi %s1765_s21, %s24_s21   ;;  %s1676_s20 = sphi %s1763_s20, %s2048_s20   ;;  %s1672_s19 = sphi %s1761_s19, %s2047_s19   ;;  %s1668_s18 = sphi %s1759_s18, %s2046_s18   ;;  %s1664_s17 = sphi %s1757_s17, %s2045_s17  }
   0x5   : > { %p37_p0 = scmp.ge.s32.totalorder %s36_s23, 2  ;;  %s39_s24 = sadd.s32 1, %s1676_s20 }
   0x6   : > { %p1326_p1 = scmp.ge.s32.totalorder %s1680_s21, 1  ;;  %p374_p2 = scmp.lt.s32.totalorder %s1680_s21, 5 }
   0x7   : > { %s2050_s23 = smov (%p37_p0, %s36_s23), 0  ;;  %s2052_s24 = smov (!%p37_p0, %s39_s24), %s1676_s20 }
   0x8   : > { %p1790_p3 = pnand %p1326_p1, %p374_p2  ;;  %p41_p4 = scmp.ge.s32.totalorder %s2052_s24, 2 }
   0x9   : > { %p1794_p5 = scmp.eq.s32.totalorder %s1324_s22, 0  ;;  %s1682_s27 = smov [#allocation2]  }
   0xa   : > { %p1516_p6 = pneg %p1790_p3  ;;  %s2054_s24 = smov (%p41_p4, %s2052_s24), 0 }
   0xb   : > { %2042 = sst [smem:[#allocation8_spill]] %s2054_s24  ;;  %s395_s28 = sshll.u32 %s1682_s27, 4  ;;  %s396_s28 = int_to_ptr.vmem [resolvable:$true] %s395_s28 }
   0xc   : > { %p1804_p7 = pnand %p1794_p5, %p1516_p6  ;;  %s1593_s30 = scalar_lea.vmem %s396_s28, 2048 }
   0xd   : > { %p1594_p9 = scmp.ne.s32.totalorder %s396_s28, %s1593_s30  ;;  %p1601_p12 = scmp.lt.s32.totalorder %s396_s28, %s396_s28 }
   0xe   : > { %p1584_p8 = pneg %p1804_p7  ;;  %p1602_p13 = scmp.lt.s32.totalorder %s1593_s30, %s1593_s30 }
  0x10   : > { %p1596_p10 = pnand %p1594_p9, %p1584_p8  ;;  %p1603_p0 = por %p1602_p13, %p1601_p12 }
  0x12   : > { %p1597_p11 = pneg %p1596_p10 }
  0x14   : > { %p1604_p1 = pnand %p1603_p0, %p1597_p11 }
  0x16   : > { %1607 = shalt.err (!%p1604_p1)
}
  0x17   : > { %s1683_s12 = smov 128   ;;  %s1684_s13 = smov 8  }
  0x18   : > { %1519 = dma.hbm_to_vmem [thread:$0]  (!%p1804_p7), %s2030_s2, 2048, %s396_s28, [#allocation3], %s1683_s12, %s1683_s12, %s1684_s13  }
  0x19   : > { %s1685_s16 = smov [#allocation4]  }
  0x1a   : > { %s410_s22 = sshll.u32 %s1685_s16, 4  ;;  %s411_s22 = int_to_ptr.vmem [resolvable:$true] %s410_s22 }
  0x1b   : > { %s1619_s27 = scalar_lea.vmem %s411_s22, 2048  ;;  %p1627_p9 = scmp.lt.s32.totalorder %s411_s22, %s411_s22 }
  0x1c   : > { %p1620_p2 = scmp.ne.s32.totalorder %s411_s22, %s1619_s27  ;;  %p1628_p10 = scmp.lt.s32.totalorder %s1619_s27, %s1619_s27 }
  0x1e   : > { %p1622_p4 = pnand %p1620_p2, %p1584_p8  ;;  %p1629_p11 = por %p1628_p10, %p1627_p9 }
  0x20   : > { %p1623_p6 = pneg %p1622_p4 }
  0x22   : > { %p1630_p12 = pnand %p1629_p11, %p1623_p6 }
  0x24   : > { %1633 = shalt.err (!%p1630_p12)
}
  0x25   : > { %1522 = dma.hbm_to_vmem [thread:$0]  (!%p1804_p7), %s2031_s3, 2048, %s411_s22, [#allocation5], %s1683_s12, %s1683_s12, %s1684_s13  }
  0x26   : > { %469 = sbr.rel (%p1790_p3) target bundleno = 400 (0x190), region = 56 }
  0x2b   : > { %1655 = dma.done.wait (%p1794_p5), [#allocation3], 2048  }
  0x2c   : > { %1657 = vsyncadd (%p1794_p5), [#allocation3], 4294965248 }
  0x2d   : > { %1659 = dma.done.wait (%p1794_p5), [#allocation5], 2048  }
  0x2e   : > { %1661 = vsyncadd (%p1794_p5), [#allocation5], 4294965248  ;;  %v1686_v0 = vmov 0.0   ;;  %vm1687_vm0 = vmmov 0   ;;  %v725_v1 = vld [vmem:[%s2029_s1 + $0x78] sm:$0xff]  ;;  %v724_v2 = vld [vmem:[%s2029_s1 + $0x70] sm:$0xff] }
  0x2f   : > { %1403 = vmatprep.subr.mxu0 %v1686_v0  ;;  %1438 = vmatprep.subr.mxu1 %v1686_v0  ;;  %v818_v3 = vld [vmem:[#allocation2 + $0x78] sm:$0xff]  ;;  %v817_v4 = vld [vmem:[#allocation2 + $0x70] sm:$0xff]  ;;  %v723_v5 = vld [vmem:[%s2029_s1 + $0x68] sm:$0xff]  ;;  %p565_p3 = scmp.lt.s32.totalorder %s1668_s18, 1  ;;  %p567_p5 = scmp.lt.s32.totalorder %s1664_s17, 1  ;;  %vm651_vm1 = vcmask 130048  }
  0x30   : > { %1435 = vmatprep.mubr.msk.f32.mxu0 %vm1687_vm0, %v1686_v0  ;;  %1470 = vmatprep.mubr.msk.f32.mxu1 %vm1687_vm0, %v1686_v0  ;;  %v816_v6 = vld [vmem:[#allocation2 + $0x68] sm:$0xff]  ;;  %v722_v7 = vld [vmem:[%s2029_s1 + $0x60] sm:$0xff]  ;;  %v721_v9 = vld [vmem:[%s2029_s1 + $0x58] sm:$0xff]  ;;  %s1688_s12 = smov 16   ;;  %s1689_s13 = smov 32   ;;  %vm653_vm2 = vcmask 261120  }
  0x31   : > { %1404 = vmatpush3.msra.mxu0 %v725_v1  ;;  %1439 = vmatpush3.msra.mxu1 %v818_v3  ;;  %v815_v8 = vld [vmem:[#allocation2 + $0x60] sm:$0xff]  ;;  %v814_v10 = vld [vmem:[#allocation2 + $0x58] sm:$0xff]  ;;  %v720_v11 = vld [vmem:[%s2029_s1 + $0x50] sm:$0xff]  ;;  %s2056_s18 = smov (!%p565_p3, %s1668_s18), 1  ;;  %s2058_s17 = smov (!%p567_p5, %s1664_s17), 1  ;;  %vm655_vm3 = vcmask 392192  }
  0x32   : > { %1405 = vmatprep.subr.mxu0 %v1686_v0  ;;  %1440 = vmatprep.subr.mxu1 %v1686_v0  ;;  %v813_v12 = vld [vmem:[#allocation2 + $0x50] sm:$0xff]  ;;  %v719_v13 = vld [vmem:[%s2029_s1 + $0x48] sm:$0xff]  ;;  %v718_v15 = vld [vmem:[%s2029_s1 + $0x40] sm:$0xff]  ;;  %s1337_s14 = sshll.u32 %s2056_s18, 1  ;;  %s1339_s26 = sshll.u32 %s2058_s17, 3  ;;  %vm657_vm4 = vcmask 523264  }
  0x33   : > { %1406 = vmatpush3.msra.mxu0 %v724_v2  ;;  %1441 = vmatpush3.msra.mxu1 %v817_v4  ;;  %v812_v14 = vld [vmem:[#allocation2 + $0x48] sm:$0xff]  ;;  %v811_v16 = vld [vmem:[#allocation2 + $0x40] sm:$0xff]  ;;  %v717_v17 = vld [vmem:[%s2029_s1 + $0x38] sm:$0xff]  ;;  %s570_s18 = sadd.s32 %s1337_s14, %s2058_s17  ;;  %s589_s17 = scalar_lea.vmem %s2035_s7, %s1339_s26  ;;  %vm659_vm5 = vcmask 654336   ;;  %vm661_vm6 = vcmask 785408   ;;  %vm663_vm7 = vcmask 916480  }
  0x34   : > { %1407 = vmatprep.subr.mxu0 %v1686_v0  ;;  %1442 = vmatprep.subr.mxu1 %v1686_v0  ;;  %v810_v18 = vld [vmem:[#allocation2 + $0x38] sm:$0xff]  ;;  %v716_v19 = vld [vmem:[%s2029_s1 + $0x30] sm:$0xff]  ;;  %v715_v21 = vld [vmem:[%s2029_s1 + $0x28] sm:$0xff]  ;;  %s1914_s25 = sshll.u32 %s570_s18, 3  ;;  %s593_s29 = scalar_lea.vmem %s2036_s8, %s1339_s26 }
  0x35   : > { %1408 = vmatpush3.msra.mxu0 %v723_v5  ;;  %1443 = vmatpush3.msra.mxu1 %v816_v6  ;;  %v809_v20 = vld [vmem:[#allocation2 + $0x30] sm:$0xff]  ;;  %v808_v22 = vld [vmem:[#allocation2 + $0x28] sm:$0xff]  ;;  %v714_v23 = vld [vmem:[%s2029_s1 + $0x20] sm:$0xff]  ;;  %s572_s16 = scalar_lea.vmem %s2028_s0, %s1914_s25  ;;  %s1690_s26 = smov 48  }
  0x36   : > { %1409 = vmatprep.subr.mxu0 %v1686_v0  ;;  %1444 = vmatprep.subr.mxu1 %v1686_v0  ;;  %v807_v24 = vld [vmem:[#allocation2 + $0x20] sm:$0xff]  ;;  %v713_v25 = vld [vmem:[%s2029_s1 + $0x18] sm:$0xff]  ;;  %v712_v27 = vld [vmem:[%s2029_s1 + $0x10] sm:$0xff]  ;;  %s1691_s14 = smov 64   ;;  %s1692_s15 = smov 80  }
  0x37   : > { %1410 = vmatpush3.msra.mxu0 %v722_v7  ;;  %1445 = vmatpush3.msra.mxu1 %v815_v8  ;;  %v806_v26 = vld [vmem:[#allocation2 + $0x18] sm:$0xff]  ;;  %v805_v28 = vld [vmem:[#allocation2 + $0x10] sm:$0xff]  ;;  %v711_v29 = vld [vmem:[%s2029_s1 + $0x8] sm:$0xff]  ;;  %s1694_s22 = smov 112   ;;  %s1695_s24 = smov 1  }
  0x38   : > { %1411 = vmatprep.subr.mxu0 %v1686_v0  ;;  %1446 = vmatprep.subr.mxu1 %v1686_v0  ;;  %v804_v30 = vld [vmem:[#allocation2 + $0x8] sm:$0xff]  ;;  %v710_v31 = vld [vmem:[%s2029_s1] sm:$0xff]  ;;  %v911_v35 = vld [vmem:[#allocation4 + $0x78] sm:$0xff]  ;;  %s1696_s28 = smov 127   ;;  %s615_s18 = scalar_lea.vmem %s2038_s10, %s1914_s25 }
  0x39   : > { %1412 = vmatpush3.msra.mxu0 %v721_v9  ;;  %1447 = vmatpush3.msra.mxu1 %v814_v10  ;;  %v803_v32 = vld [vmem:[#allocation2] sm:$0xff]  ;;  %v910_v37 = vld [vmem:[#allocation4 + $0x70] sm:$0xff]  ;;  %v909_v38 = vld [vmem:[#allocation4 + $0x68] sm:$0xff] }
  0x3a   : > { %1413 = vmatprep.subr.mxu0 %v1686_v0  ;;  %1448 = vmatprep.subr.mxu1 %v1686_v0  ;;  %v1939_v33 = vld [vmem:[%s572_s16] sm:$0xff]  ;;  %v907_v40 = vld [vmem:[#allocation4 + $0x58] sm:$0xff]  ;;  %v906_v41 = vld [vmem:[#allocation4 + $0x50] sm:$0xff]  ;;  %s1693_s16 = smov 96  }
  0x3b   : > { %1414 = vmatpush3.msra.mxu0 %v720_v11  ;;  %1449 = vmatpush3.msra.mxu1 %v813_v12  ;;  %v1942_v34 = vld [vmem:[%s589_s17] sm:$0xff]  ;;  %v905_v42 = vld [vmem:[#allocation4 + $0x48] sm:$0xff]  ;;  %v903_v44 = vld [vmem:[#allocation4 + $0x38] sm:$0xff] }
  0x3c   : > { %1415 = vmatprep.subr.mxu0 %v1686_v0  ;;  %1450 = vmatprep.subr.mxu1 %v1686_v0  ;;  %v1952_v36 = vld [vmem:[%s593_s29] sm:$0xff]  ;;  %v902_v45 = vld [vmem:[#allocation4 + $0x30] sm:$0xff]  ;;  %v901_v46 = vld [vmem:[#allocation4 + $0x28] sm:$0xff] }
  0x3d   : > { %1416 = vmatpush3.msra.mxu0 %v719_v13  ;;  %1451 = vmatpush3.msra.mxu1 %v812_v14  ;;  %v908_v39 = vld [vmem:[#allocation4 + $0x60] sm:$0xff]  ;;  %v899_v48 = vld [vmem:[#allocation4 + $0x18] sm:$0xff]  ;;  %v898_v49 = vld [vmem:[#allocation4 + $0x10] sm:$0xff]  ;;  %v695_v14 = vlaneseq }
  0x3e   : > { %1417 = vmatprep.subr.mxu0 %v1686_v0  ;;  %1452 = vmatprep.subr.mxu1 %v1686_v0  ;;  %v904_v43 = vld [vmem:[#allocation4 + $0x40] sm:$0xff]  ;;  %v897_v50 = vld [vmem:[#allocation4 + $0x8] sm:$0xff] }
  0x3f   : > { %1418 = vmatpush3.msra.mxu0 %v718_v15  ;;  %1453 = vmatpush3.msra.mxu1 %v811_v16  ;;  %v900_v47 = vld [vmem:[#allocation4 + $0x20] sm:$0xff] }
  0x40   : > { %1419 = vmatprep.subr.mxu0 %v1686_v0  ;;  %1454 = vmatprep.subr.mxu1 %v1686_v0  ;;  %v896_v51 = vld [vmem:[#allocation4] sm:$0xff] }
  0x41   : > { %1420 = vmatpush3.msra.mxu0 %v717_v17  ;;  %1455 = vmatpush3.msra.mxu1 %v810_v18  ;;  %v1347_v52 = vld [vmem:[%s2032_s4] ss:$0 sm:$0xff] }
  0x42   : > { %1421 = vmatprep.subr.mxu0 %v1686_v0  ;;  %1456 = vmatprep.subr.mxu1 %v1686_v0  ;;  %v1348_v54 = vld [vmem:[%s2033_s5] ss:$0 sm:$0xff] }
  0x43   : > { %1422 = vmatpush3.msra.mxu0 %v716_v19  ;;  %1457 = vmatpush3.msra.mxu1 %v809_v20  ;;  %v1349_v60 = vld [vmem:[%s2034_s6] ss:$0 sm:$0xff]  ;;  %v696_v20 = vand.u32 127, %v695_v14 }
  0x44   : > { %1423 = vmatprep.subr.mxu0 %v1686_v0  ;;  %1458 = vmatprep.subr.mxu1 %v1686_v0 }
  0x45   : > { %1424 = vmatpush3.msra.mxu0 %v715_v21  ;;  %1459 = vmatpush3.msra.mxu1 %v808_v22 }
  0x46   : > { %1425 = vmatprep.subr.mxu0 %v1686_v0  ;;  %1460 = vmatprep.subr.mxu1 %v1686_v0 }
  0x47   : > { %1426 = vmatpush3.msra.mxu0 %v714_v23  ;;  %1461 = vmatpush3.msra.mxu1 %v807_v24  ;;  %v701_v23 = vand.u32 1, %v696_v20 }
  0x48   : > { %1427 = vmatprep.subr.mxu0 %v1686_v0  ;;  %1462 = vmatprep.subr.mxu1 %v1686_v0 }
  0x49   : > { %1428 = vmatpush3.msra.mxu0 %v713_v25  ;;  %1463 = vmatpush3.msra.mxu1 %v806_v26  ;;  %vm709_vm8 = vcmp.eq.s32.totalorder %v701_v23, 0 }
  0x4a   : > { %1429 = vmatprep.subr.mxu0 %v1686_v0  ;;  %1464 = vmatprep.subr.mxu1 %v1686_v0 }
  0x4b   : > { %1430 = vmatpush3.msra.mxu0 %v712_v27  ;;  %1465 = vmatpush3.msra.mxu1 %v805_v28 }
  0x4c   : > { %1431 = vmatprep.subr.mxu0 %v1686_v0  ;;  %1466 = vmatprep.subr.mxu1 %v1686_v0 }
  0x4d   : > { %1432 = vmatpush3.msra.mxu0 %v711_v29  ;;  %1467 = vmatpush3.msra.mxu1 %v804_v30 }
  0x4e   : > { %1433 = vmatprep.subr.mxu0 %v1686_v0  ;;  %1468 = vmatprep.subr.mxu1 %v1686_v0 }
  0x4f   : > { %1434 = vmatpush3.msra.mxu0 %v710_v31  ;;  %1469 = vmatpush3.msra.mxu1 %v803_v32 }
  0x50   : > { %1436 = vmatmul.mubr.f32.vlgmr.msra.gmra.mxu0 %v1939_v33  ;;  %1471 = vmatmul.mubr.f32.vlgmr.msra.gmra.mxu1 %v1939_v33 }
  0x51   : > { %630 = vrot.lane.b32.xlu0 %v1942_v34, %s1688_s12  ;;  %633 = vrot.lane.b32.xlu1 %v1942_v34, %s1689_s13 }
  0x52   : > { %1473 = vmatprep.subr.mxu0 %v1686_v0  ;;  %1505 = vmatprep.mubr.msk.f32.mxu0 %vm1687_vm0, %v1686_v0 }
  0x53   : > { %1474 = vmatpush3.msra.mxu0 %v911_v35 }
  0x54   : > { %1475 = vmatprep.subr.mxu0 %v1686_v0 }
  0x55   : > { %667 = vrot.lane.b32.xlu0 %v1952_v36, %s1688_s12  ;;  %1476 = vmatpush3.msra.mxu0 %v910_v37 }
  0x56   : > { %1477 = vmatprep.subr.mxu0 %v1686_v0  ;;  %670 = vrot.lane.b32.xlu1 %v1952_v36, %s1689_s13 }
  0x57   : > { %1478 = vmatpush3.msra.mxu0 %v909_v38 }
  0x58   : > { %1479 = vmatprep.subr.mxu0 %v1686_v0 }
  0x59   : > { %636 = vrot.lane.b32.xlu0 %v1942_v34, %s1690_s26  ;;  %1480 = vmatpush3.msra.mxu0 %v908_v39 }
  0x5a   : > { %1481 = vmatprep.subr.mxu0 %v1686_v0  ;;  %673 = vrot.lane.b32.xlu1 %v1952_v36, %s1690_s26 }
  0x5b   : > { %1482 = vmatpush3.msra.mxu0 %v907_v40 }
  0x5c   : > { %1483 = vmatprep.subr.mxu0 %v1686_v0 }
  0x5d   : > { %639 = vrot.lane.b32.xlu0 %v1942_v34, %s1691_s14  ;;  %1484 = vmatpush3.msra.mxu0 %v906_v41 }
  0x5e   : > { %1485 = vmatprep.subr.mxu0 %v1686_v0  ;;  %676 = vrot.lane.b32.xlu1 %v1952_v36, %s1691_s14  ;;  %s626_s14 = scalar_lea.vmem %s2039_s11, %s1914_s25 }
  0x5f   : > { %1486 = vmatpush3.msra.mxu0 %v905_v42 }
  0x60   : > { %1487 = vmatprep.subr.mxu0 %v1686_v0 }
  0x61   : > { %642 = vrot.lane.b32.xlu0 %v1942_v34, %s1692_s15  ;;  %1488 = vmatpush3.msra.mxu0 %v904_v43 }
  0x62   : > { %1489 = vmatprep.subr.mxu0 %v1686_v0  ;;  %679 = vrot.lane.b32.xlu1 %v1952_v36, %s1692_s15 }
  0x63   : > { %1490 = vmatpush3.msra.mxu0 %v903_v44 }
  0x64   : > { %1491 = vmatprep.subr.mxu0 %v1686_v0 }
  0x65   : > { %645 = vrot.lane.b32.xlu0 %v1942_v34, %s1693_s16  ;;  %1492 = vmatpush3.msra.mxu0 %v902_v45 }
  0x66   : > { %1493 = vmatprep.subr.mxu0 %v1686_v0  ;;  %682 = vrot.lane.b32.xlu1 %v1952_v36, %s1693_s16 }
  0x67   : > { %1494 = vmatpush3.msra.mxu0 %v901_v46 }
  0x68   : > { %1495 = vmatprep.subr.mxu0 %v1686_v0 }
  0x69   : > { %648 = vrot.lane.b32.xlu0 %v1942_v34, %s1694_s22  ;;  %1496 = vmatpush3.msra.mxu0 %v900_v47 }
  0x6a   : > { %1497 = vmatprep.subr.mxu0 %v1686_v0  ;;  %685 = vrot.lane.b32.xlu1 %v1952_v36, %s1694_s22  ;;  %s604_s22 = scalar_lea.vmem %s2037_s9, %s1914_s25 }
  0x6b   : > { %1498 = vmatpush3.msra.mxu0 %v899_v48 }
  0x6c   : > { %1499 = vmatprep.subr.mxu0 %v1686_v0 }
  0x6d   : > { %1500 = vmatpush3.msra.mxu0 %v898_v49 }
  0x6e   : > { %1501 = vmatprep.subr.mxu0 %v1686_v0 }
  0x6f   : > { %1502 = vmatpush3.msra.mxu0 %v897_v50 }
  0x70   : > { %1503 = vmatprep.subr.mxu0 %v1686_v0 }
  0x71   : > { %1504 = vmatpush3.msra.mxu0 %v896_v51 }
  0x72   : > { %1506 = vmatmul.mubr.f32.vlgmr.msra.gmra.mxu0 %v1939_v33 }
  0xc3   : > { %v631_v0 = vpop.permute.xlu0 %630  ;;  %v634_v1 = vpop.permute.xlu1 %633 }
  0xc4   : > { %v652_v8 = vsel %vm651_vm1, %v1942_v34, %v631_v0 }
  0xc5   : > { %v654_v11 = vsel %vm653_vm2, %v652_v8, %v634_v1 }
  0xc7   : > { %v668_v2 = vpop.permute.xlu0 %667 }
  0xc8   : > { %v671_v3 = vpop.permute.xlu1 %670  ;;  %v688_v9 = vsel %vm651_vm1, %v1952_v36, %v668_v2 }
  0xc9   : > { %v689_v13 = vsel %vm653_vm2, %v688_v9, %v671_v3 }
  0xcb   : > { %v637_v4 = vpop.permute.xlu0 %636 }
  0xcc   : > { %v674_v5 = vpop.permute.xlu1 %673  ;;  %v656_v15 = vsel %vm655_vm3, %v654_v11, %v637_v4 }
  0xcd   : > { %v690_v16 = vsel %vm655_vm3, %v689_v13, %v674_v5 }
  0xcf   : > { %v640_v6 = vpop.permute.xlu0 %639 }
  0xd0   : > { %v677_v7 = vpop.permute.xlu1 %676  ;;  %v658_v17 = vsel %vm657_vm4, %v656_v15, %v640_v6 }
  0xd1   : > { %v691_v21 = vsel %vm657_vm4, %v690_v16, %v677_v7 }
  0xd3   : > { %v643_v10 = vpop.permute.xlu0 %642 }
  0xd4   : > { %v680_v12 = vpop.permute.xlu1 %679  ;;  %v660_v22 = vsel %vm659_vm5, %v658_v17, %v643_v10 }
  0xd5   : > { %v692_v24 = vsel %vm659_vm5, %v691_v21, %v680_v12 }
  0xd7   : > { %v646_v18 = vpop.permute.xlu0 %645 }
  0xd8   : > { %v683_v19 = vpop.permute.xlu1 %682  ;;  %v662_v25 = vsel %vm661_vm6, %v660_v22, %v646_v18 }
  0xd9   : > { %v693_v28 = vsel %vm661_vm6, %v692_v24, %v683_v19 }
  0xdb   : > { %v649_v26 = vpop.permute.xlu0 %648 }
  0xdc   : > { %v686_v27 = vpop.permute.xlu1 %685  ;;  %v664_v29 = vsel %vm663_vm7, %v662_v25, %v649_v26 }
  0xdd   : > { %v694_v32 = vsel %vm663_vm7, %v693_v28, %v686_v27 }
 0x110   : > { %v799_v53 = vpop.f32.mrf.mxu0  ;;  %v892_v55 = vpop.f32.mrf.mxu1 }
 0x111   : > { %v800_v56 = vadd.f32 %v1347_v52, %v799_v53  ;;  %v1991_v59 = vadd.f32 %v1348_v54, %v892_v55 }
 0x112   : > { %v1437_v57 = vpop.f32.mrf.mxu0  ;;  %v1472_v58 = vpop.f32.mrf.mxu1 }
 0x113   : > { %992 = vrot.lane.b32.xlu1 %v800_v56, %s1695_s24  ;;  %990 = vrot.lane.b32.xlu0 %v800_v56, %s1696_s28  ;;  %v989_v34 = vmul.f32 %v800_v56, %v664_v29  ;;  %v999_v40 = vmul.f32 %v1991_v59, %v664_v29 }
 0x117   : > { %1002 = vrot.lane.b32.xlu1 %v1991_v59, %s1695_s24  ;;  %1000 = vrot.lane.b32.xlu0 %v1991_v59, %s1696_s28 }
 0x132   : > { %v985_v61 = vpop.f32.mrf.mxu0 }
 0x133   : > { %v986_v62 = vadd.f32 %v1349_v60, %v985_v61 }
 0x134   : > { %v1507_v63 = vpop.f32.mrf.mxu0 }
 0x135   : > { %1008 = vst [vmem:[%s626_s14] sm:$0xff] %v986_v62 }
 0x185   : > { %v993_v30 = vpop.permute.xlu1 %992  ;;  %v991_v31 = vpop.permute.xlu0 %990 }
 0x186   : > { %v994_v33 = vsel %vm709_vm8, %v991_v31, %v993_v30 }
 0x187   : > { %v995_v35 = vmul.f32 %v994_v33, %v694_v32 }
 0x189   : > { %v996_v36 = vadd.f32 %v995_v35, %v989_v34  ;;  %v1003_v37 = vpop.permute.xlu1 %1002  ;;  %v1001_v38 = vpop.permute.xlu0 %1000 }
 0x18a   : > { %v1004_v39 = vsel %vm709_vm8, %v1001_v38, %v1003_v37 }
 0x18b   : > { %v997_v41 = vmul.f32 0.25, %v996_v36  ;;  %v1005_v42 = vmul.f32 %v1004_v39, %v694_v32 }
 0x18d   : > { %998 = vst [vmem:[%s604_s22] sm:$0xff] %v997_v41  ;;  %v1006_v43 = vadd.f32 %v1005_v42, %v999_v40 }
 0x18f   : > { %1007 = vst [vmem:[%s615_s18] sm:$0xff] %v1006_v43 }
 0x190 PF: > { %s24_s21 = sadd.s32 1, %s1680_s21   ;;  %s2044_s30 = sld [smem:[#allocation8_spill]] }
 0x191   : > { %p21_p7 = scmp.ge.s32.totalorder %s24_s21, 6   ;;  %s2045_s17 = smov %s1672_s19 }
 0x192   : > { %s2046_s18 = smov %s1676_s20  ;;  %s2047_s19 = smov %s2050_s23 }
 0x193   :  { %23 = sbr.rel (!%p21_p7) target bundleno = 4 (0x4), region = 139 }
 0x196   : > { %s2048_s20 = smov %s2044_s30 }
 0x198   :  { %1098 = vsyncpa [#allocation3], 1 }
 0x199   :  { %1100 = vsyncpa [#allocation3 + $0x1], 1 }
 0x19a   :  { %1101 = vsyncpa [#allocation5], 1 }

// kernel: attention_forward.4
= control target key start
LH: loop header
LB: loop body
LE: loop exit
PB: predicated region body
PF: predicated region fallthrough
CT: control target
= control target key end

     0   :  { %s4902_s0 = inlined_call_operand.vmem [shape: s32[3], index: 0, kind: input, shape index: {}]   ;;  %s4903_s2 = inlined_call_operand.vmem [shape: f32[2,16,128], index: 2, kind: input, shape index: {}]   ;;  %s4904_s3 = inlined_call_operand.vmem [shape: f32[2,16,128], index: 3, kind: input, shape index: {}]   ;;  %s4905_s4 = inlined_call_operand.vmem [shape: f32[2,16,128], index: 4, kind: input, shape index: {}]   ;;  %s4906_s5 = inlined_call_operand.vmem [shape: f32[2,16,128], index: 5, kind: output, shape index: {}]   ;;  %s4907_s1 = inlined_call_operand.vmem [shape: s32[3], index: 1, kind: input, shape index: {}]  }
   0x1   :  { %s10_s20 = sshll.u32 %s4902_s0, 4  ;;  %s14_s23 = sshll.u32 %s4907_s1, 4  ;;  %s11_s20 = int_to_ptr.vmem [resolvable:$true] %s10_s20  ;;  %s15_s23 = int_to_ptr.vmem [resolvable:$true] %s14_s23 }
   0x2   :  { %s4162_s24 = scalar_lea.vmem %s11_s20, 16  ;;  %p4167_p1 = scmp.lt.s32.totalorder %s11_s20, %s11_s20 }
   0x3   :  { %p4163_p0 = scmp.ne.s32.totalorder %s11_s20, %s4162_s24  ;;  %p4168_p2 = scmp.lt.s32.totalorder %s4162_s24, %s4162_s24 }
   0x5   :  { %p4169_p3 = por %p4168_p2, %p4167_p1 }
   0x7   :  { %p4170_p4 = pnand %p4169_p3, %p4163_p0 }
   0x9   :  { %4173 = shalt.err (!%p4170_p4)  }
   0xa   :  { %s4228_s25 = smov [#allocation6]   ;;  %s4174_s26 = scalar_lea.vmem %s15_s23, 16 }
   0xb   :  { %13 = dma.vmem_to_smem %s11_s20, 16, %s4228_s25, [#allocation5] }
   0xc   :  { %p4175_p5 = scmp.ne.s32.totalorder %s15_s23, %s4174_s26  ;;  %p4179_p6 = scmp.lt.s32.totalorder %s15_s23, %s15_s23 }
   0xd   :  { %p4180_p7 = scmp.lt.s32.totalorder %s4174_s26, %s4174_s26 }
   0xf   :  { %p4181_p8 = por %p4180_p7, %p4179_p6 }
  0x11   :  { %p4182_p9 = pnand %p4181_p8, %p4175_p5 }
  0x13   :  { %4185 = shalt.err (!%p4182_p9)  }
  0x14   :  { %s4229_s0 = smov [#allocation7]  }
  0x15   :  { %17 = dma.vmem_to_smem %s15_s23, 16, %s4229_s0, [#allocation5] }
  0x16   :  { %4206 = dma.done.wait [#allocation5], 32 }
  0x17   :  { %4207 = vsyncadd [#allocation5], 4294967264 }
  0x18   :  { %19 = sfence }
  0x19   :  { %s4288_s1 = smov 0   ;;  %s4290_s27 = smov 0  }
  0x1a   :  { %s4292_s28 = smov 0   ;;  %s4294_s29 = smov 0  }
  0x1b   :  { %s4296_s30 = smov 0  }
  0x1c LB: > { %s34_s6 = sadd.s32 1, %s4218_s28  ;;  %s37_s7 = sadd.s32 1, %s4222_s29  ;;  %s4226_s30 = sphi %s4296_s30, %s25_s30   ;;  %s4222_s29 = sphi %s4294_s29, %s4913_s29   ;;  %s4218_s28 = sphi %s4292_s28, %s4912_s28   ;;  %s4214_s27 = sphi %s4290_s27, %s4911_s27   ;;  %s4210_s1 = sphi %s4288_s1, %s4910_s1  }
  0x1d   : > { %p35_p10 = scmp.ge.s32.totalorder %s34_s6, 3  ;;  %p3726_p11 = scmp.ge.s32.totalorder %s4226_s30, 1 }
  0x1e   : > { %p212_p12 = scmp.lt.s32.totalorder %s4226_s30, 7 }
  0x1f   : > { %s4915_s6 = smov (%p35_p10, %s34_s6), 0  ;;  %s4917_s7 = smov (!%p35_p10, %s37_s7), %s4222_s29 }
  0x20   : > { %p213_p13 = pnand %p3726_p11, %p212_p12  ;;  %p39_p0 = scmp.ge.s32.totalorder %s4917_s7, 2 }
  0x21   : > { %s262_s8 = sld [smem:[#allocation6 + %s4210_s1]] (!%p213_p13)  ;;  %p263_p1 = scmp.lt.s32.totalorder (!%p213_p13), %s4214_s27, 1 }
  0x22   : > { %s4919_s7 = smov (%p39_p0, %s4917_s7), 0  ;;  %216 = sbr.rel (%p213_p13) target bundleno = 2982 (0xba6), region = 32 }
  0x23   : > { %s272_s9 = sld [smem:[#allocation7 + %s4210_s1]] (!%p213_p13) }
  0x24   : > { %s282_s10 = sld [smem:[#allocation7 + %s4210_s1]] (!%p213_p13) }
  0x25   : > { %s292_s11 = sld [smem:[#allocation6 + %s4210_s1]] (!%p213_p13) }
  0x26   : > { %s4318_s12 = sld [smem:[#allocation6 + %s4210_s1]] (!%p213_p13) }
  0x27   : > { %s4921_s27 = smov (!%p263_p1, %s4214_s27), 1  ;;  %p265_p2 = scmp.lt.s32.totalorder %s262_s8, 1 }
  0x28   : > { %s4320_s13 = sld [smem:[#allocation7 + %s4210_s1]]  ;;  %s3727_s14 = sshll.u32 %s4921_s27, 1 }
  0x29   : > { %p275_p3 = scmp.lt.s32.totalorder %s272_s9, 1  ;;  %s4923_s8 = smov (!%p265_p2, %s262_s8), 1 }
  0x2a   : > { %s268_s15 = sadd.s32 %s3727_s14, %s4923_s8  ;;  %p285_p4 = scmp.lt.s32.totalorder %s282_s10, 1 }
  0x2b   : > { %s4925_s9 = smov (!%p275_p3, %s272_s9), 1  ;;  %s3728_s16 = sshll.u32 %s268_s15, 3 }
  0x2c   : > { %s278_s17 = sadd.s32 %s3727_s14, %s4925_s9  ;;  %s4325_s20 = scalar_lea.vmem %s4903_s2, %s3728_s16 }
  0x2d   : > { %s3730_s21 = sshll.u32 %s278_s17, 3  ;;  %p295_p5 = scmp.lt.s32.totalorder %s292_s11, 1 }
  0x2e   : > { %s4330_s24 = scalar_lea.vmem %s4904_s3, %s3730_s21  ;;  %s4927_s10 = smov (!%p285_p4, %s282_s10), 1 }
  0x2f   : > { %s4929_s11 = smov (!%p295_p5, %s292_s11), 1  ;;  %s288_s25 = sadd.s32 %s3727_s14, %s4927_s10 }
  0x30   : > { %s3732_s26 = sshll.u32 %s288_s25, 3  ;;  %s298_s0 = sadd.s32 %s3727_s14, %s4929_s11 }
  0x31   : > { %s4335_s8 = scalar_lea.vmem %s4905_s4, %s3732_s26  ;;  %s3734_s9 = sshll.u32 %s298_s0, 3 }
  0x32   : > { %s4340_s17 = scalar_lea.vmem %s4906_s5, %s3734_s9  ;;  %p3735_p6 = scmp.ne.s32.totalorder %s4320_s13, 0 }
  0x34   : > { %307 = sbr.rel (%p3735_p6) target bundleno = 70 (0x46), region = 36 }
  0x39   : > { %vm308_vm0 = vcmask 7168   ;;  %vm325_vm1 = vcmask 130048   ;;  %v4230_v0 = vmov -1e+30   ;;  %v4231_v1 = vmov 0.0  }
  0x3a   : > { %309 = vst.msk [vmem:[#allocation2] sm:$0xff] %vm308_vm0, %v4230_v0  ;;  %310 = vst.msk [vmem:[#allocation2 + $0x8] sm:$0xff] %vm308_vm0, %v4230_v0 }
  0x3b   : > { %311 = vst.msk [vmem:[#allocation2 + $0x10] sm:$0xff] %vm308_vm0, %v4230_v0  ;;  %312 = vst.msk [vmem:[#allocation2 + $0x18] sm:$0xff] %vm308_vm0, %v4230_v0 }
  0x3c   : > { %313 = vst.msk [vmem:[#allocation2 + $0x20] sm:$0xff] %vm308_vm0, %v4230_v0  ;;  %314 = vst.msk [vmem:[#allocation2 + $0x28] sm:$0xff] %vm308_vm0, %v4230_v0 }
  0x3d   : > { %315 = vst.msk [vmem:[#allocation2 + $0x30] sm:$0xff] %vm308_vm0, %v4230_v0  ;;  %316 = vst.msk [vmem:[#allocation2 + $0x38] sm:$0xff] %vm308_vm0, %v4230_v0 }
  0x3e   : > { %317 = vst.msk [vmem:[#allocation3] sm:$0xff] %vm308_vm0, %v4231_v1  ;;  %318 = vst.msk [vmem:[#allocation3 + $0x8] sm:$0xff] %vm308_vm0, %v4231_v1 }
  0x3f   : > { %319 = vst.msk [vmem:[#allocation3 + $0x10] sm:$0xff] %vm308_vm0, %v4231_v1  ;;  %320 = vst.msk [vmem:[#allocation3 + $0x18] sm:$0xff] %vm308_vm0, %v4231_v1 }
  0x40   : > { %321 = vst.msk [vmem:[#allocation3 + $0x20] sm:$0xff] %vm308_vm0, %v4231_v1  ;;  %322 = vst.msk [vmem:[#allocation3 + $0x28] sm:$0xff] %vm308_vm0, %v4231_v1 }
  0x41   : > { %323 = vst.msk [vmem:[#allocation3 + $0x30] sm:$0xff] %vm308_vm0, %v4231_v1  ;;  %324 = vst.msk [vmem:[#allocation3 + $0x38] sm:$0xff] %vm308_vm0, %v4231_v1 }
  0x42   : > { %326 = vst.msk [vmem:[#allocation4] sm:$0xff] %vm325_vm1, %v4231_v1  ;;  %327 = vst.msk [vmem:[#allocation4 + $0x8] sm:$0xff] %vm325_vm1, %v4231_v1 }
  0x43   : > { %328 = vst.msk [vmem:[#allocation4 + $0x10] sm:$0xff] %vm325_vm1, %v4231_v1  ;;  %329 = vst.msk [vmem:[#allocation4 + $0x18] sm:$0xff] %vm325_vm1, %v4231_v1 }
  0x44   : > { %330 = vst.msk [vmem:[#allocation4 + $0x20] sm:$0xff] %vm325_vm1, %v4231_v1  ;;  %331 = vst.msk [vmem:[#allocation4 + $0x28] sm:$0xff] %vm325_vm1, %v4231_v1 }
  0x45   : > { %332 = vst.msk [vmem:[#allocation4 + $0x30] sm:$0xff] %vm325_vm1, %v4231_v1  ;;  %333 = vst.msk [vmem:[#allocation4 + $0x38] sm:$0xff] %vm325_vm1, %v4231_v1 }
  0x46 PF: > { %p3736_p7 = scmp.ge.s32.totalorder %s4320_s13, %s4318_s12 }
  0x47   : > { %s4235_s10 = smov (!%p3736_p7), 112   ;;  %s4236_s11 = smov (!%p3736_p7), 96  }
  0x48   : > { %337 = sbr.rel (%p3736_p7) target bundleno = 1405 (0x57d), region = 40  ;;  %s4237_s14 = smov (!%p3736_p7), 80  }
  0x49   : > { %s4238_s18 = smov (!%p3736_p7), 64   ;;  %s4239_s19 = smov (!%p3736_p7), 48  }
  0x4a   : > { %s4240_s21 = smov (!%p3736_p7), 32   ;;  %s4241_s22 = smov (!%p3736_p7), 16  }
  0x4d   : > { %v339_v2 = vld [vmem:[%s4330_s24] sm:$0xff]  ;;  %vm341_vm2 = vcmask 130048   ;;  %v4232_v3 = vmov 0.0   ;;  %vm4233_vm3 = vmmov 0   ;;  %vm419_vm4 = vcmask 64512   ;;  %v610_v62 = vld [vmem:[#allocation2 + $0x8] sm:$0xff] }
  0x4e   : > { %3854 = vmatprep.subr.mxu0 %v4232_v3  ;;  %3856 = vmatprep.mubr.msk.f32.mxu0 %vm4233_vm3, %v4232_v3  ;;  %v338_v4 = vld [vmem:[%s4325_s20] sm:$0xff]  ;;  %v4234_v8 = vmov 0   ;;  %vm441_vm5 = vcmask 7168   ;;  %v806_v1 = vld [vmem:[#allocation2 + $0x10] sm:$0xff] }
  0x4f   : > { %3855 = vmatpush3.xpose.msk.msra.mxu0 %vm341_vm2, %v339_v2  ;;  %3859 = vmatprep.subr.mxu1 %v4232_v3  ;;  %v4384_v9 = vld [vmem:[%s4335_s8] sm:$0xff] }
  0x50   : > { %3861 = vmatprep.mubr.msk.f32.mxu1 %vm4233_vm3, %v4232_v3  ;;  %3869 = vmatprep.subr.mxu0 %v4232_v3  ;;  %v418_v10 = vld [vmem:[#allocation2] sm:$0xff] }
  0x51   : > { %4078 = vset.pattern.permute.xlu0 %v4234_v8  ;;  %4079 = vset.pattern.permute.xlu1 %v4234_v8  ;;  %v435_v36 = vld [vmem:[#allocation3] sm:$0xff]  ;;  %v4478_v8 = vld [vmem:[#allocation2 + $0x28] sm:$0xff] }
  0x52   : > { %3857 = vmatmul.mubr.msk.f32.vlgmr.msra.gmra.mxu0 %vm341_vm2, %v338_v4  ;;  %533 = vrot.lane.b32.xlu1 %v339_v2, %s4235_s10 }
  0x53   : > { %3871 = vmatprep.mubr.msk.f32.mxu0 %vm4233_vm3, %v4232_v3  ;;  %3860 = vmatpush3.msra.mxu1 %v4384_v9 }
  0x54   : > { %3864 = vmatprep.subr.mxu1 %v4232_v3 }
  0x56   : > { %530 = vrot.lane.b32.xlu1 %v338_v4, %s4235_s10 }
  0x5a   : > { %729 = vrot.lane.b32.xlu1 %v339_v2, %s4236_s11 }
  0x5e   : > { %726 = vrot.lane.b32.xlu1 %v338_v4, %s4236_s11 }
  0x62   : > { %925 = vrot.lane.b32.xlu1 %v339_v2, %s4237_s14 }
  0x66   : > { %922 = vrot.lane.b32.xlu1 %v338_v4, %s4237_s14 }
  0x6a   : > { %1121 = vrot.lane.b32.xlu1 %v339_v2, %s4238_s18 }
  0x6e   : > { %1118 = vrot.lane.b32.xlu1 %v338_v4, %s4238_s18 }
  0x72   : > { %1317 = vrot.lane.b32.xlu1 %v339_v2, %s4239_s19 }
  0x76   : > { %1314 = vrot.lane.b32.xlu1 %v338_v4, %s4239_s19 }
  0x7a   : > { %1513 = vrot.lane.b32.xlu1 %v339_v2, %s4240_s21 }
  0x7e   : > { %1510 = vrot.lane.b32.xlu1 %v338_v4, %s4240_s21 }
  0x82   : > { %1706 = vrot.lane.b32.xlu1 %v338_v4, %s4241_s22 }
  0xc4   : > { %v534_v14 = vpop.permute.xlu1 %533 }
  0xc8   : > { %v531_v15 = vpop.permute.xlu1 %530 }
  0xcc   : > { %v730_v16 = vpop.permute.xlu1 %729 }
  0xd0   : > { %v727_v17 = vpop.permute.xlu1 %726 }
  0xd4   : > { %v926_v19 = vpop.permute.xlu1 %925 }
  0xd8   : > { %v923_v23 = vpop.permute.xlu1 %922 }
  0xdc   : > { %v1122_v25 = vpop.permute.xlu1 %1121 }
  0xe0   : > { %v1119_v26 = vpop.permute.xlu1 %1118 }
  0xe4   : > { %v1318_v29 = vpop.permute.xlu1 %1317 }
  0xe8   : > { %v1315_v30 = vpop.permute.xlu1 %1314 }
  0xec   : > { %v1514_v31 = vpop.permute.xlu1 %1513 }
  0xf0   : > { %v1511_v32 = vpop.permute.xlu1 %1510 }
  0xf4   : > { %v1707_v33 = vpop.permute.xlu1 %1706 }
 0x112   : > { %v414_v5 = vpop.f32.mrf.mxu0 }
 0x113   : > { %v420_v6 = vsel %vm419_vm4, %v414_v5, -inf }
 0x114   : > { %421 = vmax.xlane.f32.xlu0 %v420_v6  ;;  %v3858_v7 = vpop.f32.mrf.mxu0 }
 0x19d   : > { %v422_v11 = vpop.xlane.xlu0 %421 }
 0x19e   : > { %v423_v12 = vmax.f32 %v418_v10, %v422_v11 }
 0x1a0   : > { %v424_v13 = vsub.f32 %v418_v10, %v423_v12  ;;  %525 = vst.msk [vmem:[#allocation2] sm:$0xff] %vm441_vm5, %v423_v12  ;;  %429 = vperm.xlu0 %4078, %v423_v12   ;;  %v4483_v12 = vld [vmem:[#allocation2 + $0x30] sm:$0xff] }
 0x1a2   : > { %v425_v34 = vmul.f32 1.442695, %v424_v13 }
 0x1a4   : > { %1709 = vrot.lane.b32.xlu0 %v339_v2, %s4241_s22 }
 0x1a8   : > { %643 = vrot.lane.b32.xlu0 %v4384_v9, %s4235_s10 }
 0x21b   : > { %v430_v18 = vpop.permute.xlu0 %429 }
 0x21c   : > { %v432_v20 = vsub.f32 %v414_v5, %v430_v18  ;;  %v1002_v5 = vld [vmem:[#allocation2 + $0x18] sm:$0xff] }
 0x21e   : > { %v433_v21 = vmul.f32 1.442695, %v432_v20 }
 0x21f   : > { %v1710_v22 = vpop.permute.xlu0 %1709 }
 0x220   : > { %4080 = vpow2.f32 %v433_v21 }
 0x221   : > { %4082 = vpow2.f32 %v425_v34 }
 0x223   : > { %v644_v24 = vpop.permute.xlu0 %643 }
 0x224   : > { %3870 = vmatpush3.msra.mxu0 %v644_v24 }
 0x225   : > { %3879 = vmatprep.subr.mxu0 %v4232_v3 }
 0x22d   : > { %v4081_v27 = vpop.eup %4080 }
 0x22e   : > { %3862 = vmatmul.mubr.msk.f32.vlgmr.msra.gmra.mxu1 %vm419_vm4, %v4081_v27  ;;  %v437_v28 = vsel %vm419_vm4, %v4081_v27, 0.0  ;;  %v4083_v35 = vpop.eup %4082 }
 0x22f   : > { %3865 = vmatpush3.xpose.msk.msra.mxu1 %vm341_vm2, %v534_v14  ;;  %438 = vadd.xlane.f32.xlu0 %v437_v28  ;;  %v436_v37 = vmul.f32 %v4083_v35, %v435_v36 }
 0x230   : > { %3866 = vmatprep.mubr.msk.f32.mxu1 %vm4233_vm3, %v4232_v3  ;;  %3874 = vmatprep.subr.mxu1 %v4232_v3 }
 0x232   : > { %3867 = vmatmul.mubr.msk.f32.vlgmr.msra.gmra.mxu1 %vm341_vm2, %v531_v15 }
 0x233   : > { %3875 = vmatpush3.xpose.msk.msra.mxu1 %vm341_vm2, %v730_v16  ;;  %3876 = vmatprep.mubr.msk.f32.mxu1 %vm4233_vm3, %v4232_v3 }
 0x234   : > { %3884 = vmatprep.subr.mxu1 %v4232_v3 }
 0x236   : > { %3877 = vmatmul.mubr.msk.f32.vlgmr.msra.gmra.mxu1 %vm341_vm2, %v727_v17 }
 0x237   : > { %3885 = vmatpush3.xpose.msk.msra.mxu1 %vm341_vm2, %v926_v19  ;;  %3886 = vmatprep.mubr.msk.f32.mxu1 %vm4233_vm3, %v4232_v3 }
 0x238   : > { %3894 = vmatprep.subr.mxu1 %v4232_v3 }
 0x23a   : > { %3887 = vmatmul.mubr.msk.f32.vlgmr.msra.gmra.mxu1 %vm341_vm2, %v923_v23 }
 0x23b   : > { %3895 = vmatpush3.xpose.msk.msra.mxu1 %vm341_vm2, %v1122_v25  ;;  %3896 = vmatprep.mubr.msk.f32.mxu1 %vm4233_vm3, %v4232_v3  ;;  %v1198_v25 = vld [vmem:[#allocation2 + $0x20] sm:$0xff] }
 0x23c   : > { %3904 = vmatprep.subr.mxu1 %v4232_v3 }
 0x23e   : > { %3897 = vmatmul.mubr.msk.f32.vlgmr.msra.gmra.mxu1 %vm341_vm2, %v1119_v26 }
 0x23f   : > { %3905 = vmatpush3.xpose.msk.msra.mxu1 %vm341_vm2, %v1318_v29  ;;  %3906 = vmatprep.mubr.msk.f32.mxu1 %vm4233_vm3, %v4232_v3  ;;  %v443_v29 = vld [vmem:[#allocation4] sm:$0xff] }
 0x240   : > { %3914 = vmatprep.subr.mxu1 %v4232_v3 }
 0x242   : > { %3907 = vmatmul.mubr.msk.f32.vlgmr.msra.gmra.mxu1 %vm341_vm2, %v1315_v30 }
 0x243   : > { %3915 = vmatpush3.xpose.msk.msra.mxu1 %vm341_vm2, %v1514_v31  ;;  %3916 = vmatprep.mubr.msk.f32.mxu1 %vm4233_vm3, %v4232_v3 }
 0x244   : > { %3924 = vmatprep.subr.mxu1 %v4232_v3 }
 0x246   : > { %3917 = vmatmul.mubr.msk.f32.vlgmr.msra.gmra.mxu1 %vm341_vm2, %v1511_v32 }
 0x247   : > { %3925 = vmatpush3.xpose.msk.msra.mxu1 %vm341_vm2, %v1710_v22  ;;  %3926 = vmatprep.mubr.msk.f32.mxu1 %vm4233_vm3, %v4232_v3 }
 0x24a   : > { %3927 = vmatmul.mubr.msk.f32.vlgmr.msra.gmra.mxu1 %vm341_vm2, %v1707_v33 }
 0x2b8   : > { %v439_v38 = vpop.xlane.xlu0 %438 }
 0x2b9   : > { %v440_v39 = vadd.f32 %v439_v38, %v436_v37 }
 0x2bb   : > { %442 = vst.msk [vmem:[#allocation3] sm:$0xff] %vm441_vm5, %v440_v39 }
 0x2ee   : > { %v4443_v40 = vpop.f32.mrf.mxu1 }
 0x2f0   : > { %v3863_v41 = vpop.f32.mrf.mxu1 }
 0x2f2   : > { %v4445_v42 = vpop.f32.mrf.mxu1 }
 0x2f3   : > { %v611_v43 = vsel %vm419_vm4, %v4445_v42, -inf }
 0x2f4   : > { %612 = vmax.xlane.f32.xlu1 %v611_v43  ;;  %v3868_v44 = vpop.f32.mrf.mxu1 }
 0x2f6   : > { %v4449_v45 = vpop.f32.mrf.mxu1 }
 0x2f7   : > { %v807_v46 = vsel %vm419_vm4, %v4449_v45, -inf }
 0x2f8   : > { %v3878_v47 = vpop.f32.mrf.mxu1  ;;  %808 = vmax.xlane.f32.xlu0 %v807_v46 }
 0x2fa   : > { %v4453_v48 = vpop.f32.mrf.mxu1 }
 0x2fb   : > { %v1003_v49 = vsel %vm419_vm4, %v4453_v48, -inf }
 0x2fc   : > { %1004 = vmax.xlane.f32.xlu0 %v1003_v49  ;;  %v3888_v50 = vpop.f32.mrf.mxu1 }
 0x2fd   : > { %v1786_v50 = vld [vmem:[#allocation2 + $0x38] sm:$0xff] }
 0x2fe   : > { %v4457_v51 = vpop.f32.mrf.mxu1 }
 0x2ff   : > { %v1199_v61 = vsel %vm419_vm4, %v4457_v51, -inf }
 0x300   : > { %v3898_v52 = vpop.f32.mrf.mxu1 }
 0x302   : > { %v4459_v53 = vpop.f32.mrf.mxu1 }
 0x303   : > { %v1395_v54 = vsel %vm419_vm4, %v4459_v53, -inf }
 0x304   : > { %1396 = vmax.xlane.f32.xlu0 %v1395_v54  ;;  %v3908_v55 = vpop.f32.mrf.mxu1 }
 0x305   : > { %839 = vrot.lane.b32.xlu1 %v4384_v9, %s4236_s11 }
 0x306   : > { %v4465_v56 = vpop.f32.mrf.mxu1 }
 0x307   : > { %v1591_v57 = vsel %vm419_vm4, %v4465_v56, -inf }
 0x308   : > { %1592 = vmax.xlane.f32.xlu0 %v1591_v57  ;;  %v3918_v58 = vpop.f32.mrf.mxu1 }
 0x30a   : > { %v4469_v59 = vpop.f32.mrf.mxu1 }
 0x30b   : > { %v1787_v17 = vsel %vm419_vm4, %v4469_v59, -inf }
 0x30c   : > { %v3928_v60 = vpop.f32.mrf.mxu1 }
 0x329   : > { %1200 = vmax.xlane.f32.xlu1 %v1199_v61 }
 0x33a   : > { %446 = vperm.xlu1 %4079, %v4083_v35  }
 0x33e   : > { %1035 = vrot.lane.b32.xlu1 %v4384_v9, %s4237_s14 }
 0x37d   : > { %v613_v63 = vpop.xlane.xlu1 %612 }
 0x37e   : > { %v614_v0 = vmax.f32 %v610_v62, %v613_v63 }
 0x380   : > { %721 = vst.msk [vmem:[#allocation2 + $0x8] sm:$0xff] %vm441_vm5, %v614_v0  ;;  %620 = vperm.xlu0 %4078, %v614_v0   ;;  %v615_v22 = vsub.f32 %v610_v62, %v614_v0 }
 0x381   : > { %v809_v2 = vpop.xlane.xlu0 %808  ;;  %v840_v24 = vpop.permute.xlu1 %839 }
 0x382   : > { %v810_v4 = vmax.f32 %v806_v1, %v809_v2  ;;  %v616_v23 = vmul.f32 1.442695, %v615_v22 }
 0x384   : > { %917 = vst.msk [vmem:[#allocation2 + $0x10] sm:$0xff] %vm441_vm5, %v810_v4  ;;  %816 = vperm.xlu1 %4079, %v810_v4   ;;  %v811_v18 = vsub.f32 %v806_v1, %v810_v4 }
 0x385   : > { %v1005_v6 = vpop.xlane.xlu0 %1004 }
 0x386   : > { %v1006_v7 = vmax.f32 %v1002_v5, %v1005_v6  ;;  %v812_v19 = vmul.f32 1.442695, %v811_v18 }
 0x388   : > { %1113 = vst.msk [vmem:[#allocation2 + $0x18] sm:$0xff] %vm441_vm5, %v1006_v7  ;;  %1012 = vperm.xlu1 %4079, %v1006_v7   ;;  %v1007_v20 = vsub.f32 %v1002_v5, %v1006_v7  ;;  %4084 = vpow2.f32 %v812_v19 }
 0x38a   : > { %v1008_v21 = vmul.f32 1.442695, %v1007_v20  ;;  %v1019_v20 = vld [vmem:[#allocation3 + $0x18] sm:$0xff] }
 0x38c   : > { %4086 = vpow2.f32 %v1008_v21 }
 0x38d   : > { %v1397_v10 = vpop.xlane.xlu0 %1396  ;;  %4088 = vpow2.f32 %v616_v23 }
 0x38e   : > { %v4481_v11 = vmax.f32 %v4478_v8, %v1397_v10 }
 0x390   : > { %v1399_v13 = vsub.f32 %v4478_v8, %v4481_v11  ;;  %1505 = vst.msk [vmem:[#allocation2 + $0x28] sm:$0xff] %vm441_vm5, %v4481_v11 }
 0x391   : > { %v1593_v14 = vpop.xlane.xlu0 %1592 }
 0x392   : > { %v4490_v15 = vmax.f32 %v4483_v12, %v1593_v14  ;;  %v1400_v58 = vmul.f32 1.442695, %v1399_v13 }
 0x394   : > { %v1595_v16 = vsub.f32 %v4483_v12, %v4490_v15  ;;  %1701 = vst.msk [vmem:[#allocation2 + $0x30] sm:$0xff] %vm441_vm5, %v4490_v15 }
 0x395   : > { %v4498_v26 = vpop.eup %4084 }
 0x396   : > { %v1596_v63 = vmul.f32 1.442695, %v1595_v16 }
 0x399   : > { %v4502_v31 = vpop.eup %4086 }
 0x39a   : > { %v4508_v35 = vpop.eup %4088  ;;  %v1020_v21 = vmul.f32 %v4502_v31, %v1019_v20 }
 0x39f   : > { %1788 = vmax.xlane.f32.xlu0 %v1787_v17 }
 0x3b2   : > { %v1201_v27 = vpop.xlane.xlu1 %1200 }
 0x3b3   : > { %v1202_v28 = vmax.f32 %v1198_v25, %v1201_v27 }
 0x3b5   : > { %v1203_v30 = vsub.f32 %v1198_v25, %v1202_v28  ;;  %1309 = vst.msk [vmem:[#allocation2 + $0x20] sm:$0xff] %vm441_vm5, %v1202_v28  ;;  %834 = vperm.xlu0 %4078, %v4498_v26   ;;  %1208 = vperm.xlu1 %4079, %v1202_v28  }
 0x3b6   : > { %v447_v32 = vpop.permute.xlu1 %446 }
 0x3b7   : > { %v449_v33 = vmul.f32 %v447_v32, %v443_v29  ;;  %v1204_v57 = vmul.f32 1.442695, %v1203_v30 }
 0x3b9   : > { %v523_v34 = vadd.f32 %v4443_v40, %v449_v33  ;;  %1030 = vperm.xlu0 %4078, %v4502_v31   ;;  %1404 = vperm.xlu1 %4079, %v4481_v11   ;;  %v1215_v33 = vld [vmem:[#allocation3 + $0x20] sm:$0xff] }
 0x3ba   : > { %v1036_v36 = vpop.permute.xlu1 %1035 }
 0x3bb   : > { %524 = vst.msk [vmem:[#allocation4] sm:$0xff] %vm341_vm2, %v523_v34  ;;  %v635_v34 = vld [vmem:[#allocation4 + $0x8] sm:$0xff] }
 0x3bd   : > { %638 = vperm.xlu1 %4079, %v4508_v35  }
 0x3c1   : > { %1600 = vperm.xlu1 %4079, %v4490_v15  }
 0x3fb   : > { %v621_v37 = vpop.permute.xlu0 %620 }
 0x3fc   : > { %v623_v38 = vsub.f32 %v4445_v42, %v621_v37 }
 0x3fe   : > { %v624_v39 = vmul.f32 1.442695, %v623_v38 }
 0x3ff   : > { %v817_v41 = vpop.permute.xlu1 %816 }
 0x400   : > { %4090 = vpow2.f32 %v624_v39  ;;  %v819_v40 = vsub.f32 %v4449_v45, %v817_v41  ;;  %v1411_v39 = vld [vmem:[#allocation3 + $0x28] sm:$0xff]  ;;  %v831_v41 = vld [vmem:[#allocation4 + $0x10] sm:$0xff] }
 0x402   : > { %v820_v43 = vmul.f32 1.442695, %v819_v40 }
 0x403   : > { %v1013_v44 = vpop.permute.xlu1 %1012 }
 0x404   : > { %4092 = vpow2.f32 %v820_v43  ;;  %v1015_v46 = vsub.f32 %v4453_v48, %v1013_v44 }
 0x406   : > { %v1016_v47 = vmul.f32 1.442695, %v1015_v46 }
 0x408   : > { %4094 = vpow2.f32 %v1016_v47 }
 0x409   : > { %4096 = vpow2.f32 %v1204_v57 }
 0x40a   : > { %4098 = vpow2.f32 %v1400_v58 }
 0x40d   : > { %v4091_v49 = vpop.eup %4090 }
 0x40e   : > { %3872 = vmatmul.mubr.msk.f32.vlgmr.msra.gmra.mxu0 %vm419_vm4, %v4091_v49  ;;  %v629_v14 = vsel %vm419_vm4, %v4091_v49, 0.0 }
 0x40f   : > { %3880 = vmatpush3.msra.mxu0 %v840_v24  ;;  %3881 = vmatprep.mubr.msk.f32.mxu0 %vm4233_vm3, %v4232_v3 }
 0x410   : > { %3889 = vmatprep.subr.mxu0 %v4232_v3 }
 0x411   : > { %v4093_v42 = vpop.eup %4092 }
 0x412   : > { %3882 = vmatmul.mubr.msk.f32.vlgmr.msra.gmra.mxu0 %vm419_vm4, %v4093_v42  ;;  %v825_v16 = vsel %vm419_vm4, %v4093_v42, 0.0  ;;  %v1027_v42 = vld [vmem:[#allocation4 + $0x18] sm:$0xff] }
 0x413   : > { %3890 = vmatpush3.msra.mxu0 %v1036_v36  ;;  %3891 = vmatprep.mubr.msk.f32.mxu0 %vm4233_vm3, %v4232_v3 }
 0x414   : > { %3899 = vmatprep.subr.mxu0 %v4232_v3 }
 0x415   : > { %v4095_v45 = vpop.eup %4094 }
 0x416   : > { %3892 = vmatmul.mubr.msk.f32.vlgmr.msra.gmra.mxu0 %vm419_vm4, %v4095_v45  ;;  %v1021_v48 = vsel %vm419_vm4, %v4095_v45, 0.0  ;;  %v4097_v6 = vpop.eup %4096 }
 0x417   : > { %1022 = vadd.xlane.f32.xlu0 %v1021_v48  ;;  %3901 = vmatprep.mubr.msk.f32.mxu0 %vm4233_vm3, %v4232_v3  ;;  %v4547_v8 = vpop.eup %4098  ;;  %v1216_v36 = vmul.f32 %v4097_v6, %v1215_v33 }
 0x418   : > { %v1412_v46 = vmul.f32 %v4547_v8, %v1411_v39 }
 0x428   : > { %v1789_v52 = vpop.xlane.xlu0 %1788 }
 0x429   : > { %v1790_v54 = vmax.f32 %v1786_v50, %v1789_v52 }
 0x42b   : > { %v1791_v55 = vsub.f32 %v1786_v50, %v1790_v54  ;;  %1897 = vst.msk [vmem:[#allocation2 + $0x38] sm:$0xff] %vm441_vm5, %v1790_v54  ;;  %1796 = vperm.xlu1 %4079, %v1790_v54  }
 0x42d   : > { %v1792_v15 = vmul.f32 1.442695, %v1791_v55  ;;  %v1607_v55 = vld [vmem:[#allocation3 + $0x30] sm:$0xff] }
 0x42f   : > { %1231 = vrot.lane.b32.xlu1 %v4384_v9, %s4238_s18 }
 0x430   : > { %v1209_v60 = vpop.permute.xlu1 %1208  ;;  %v835_v18 = vpop.permute.xlu0 %834 }
 0x431   : > { %v1211_v61 = vsub.f32 %v4457_v51, %v1209_v60  ;;  %v837_v47 = vmul.f32 %v835_v18, %v831_v41 }
 0x433   : > { %v1212_v62 = vmul.f32 1.442695, %v1211_v61  ;;  %1427 = vrot.lane.b32.xlu1 %v4384_v9, %s4239_s19 }
 0x434   : > { %v1405_v0 = vpop.permute.xlu1 %1404  ;;  %v1031_v19 = vpop.permute.xlu0 %1030 }
 0x435   : > { %4100 = vpow2.f32 %v1212_v62  ;;  %v1407_v1 = vsub.f32 %v4459_v53, %v1405_v0  ;;  %v1033_v54 = vmul.f32 %v1031_v19, %v1027_v42 }
 0x436   : > { %4102 = vpow2.f32 %v1596_v63 }
 0x437   : > { %v1408_v2 = vmul.f32 1.442695, %v1407_v1  ;;  %1623 = vrot.lane.b32.xlu1 %v4384_v9, %s4240_s21 }
 0x438   : > { %v4542_v4 = vpop.permute.xlu1 %638 }
 0x439   : > { %4104 = vpow2.f32 %v1408_v2  ;;  %v641_v37 = vmul.f32 %v4542_v4, %v635_v34  ;;  %v627_v4 = vld [vmem:[#allocation3 + $0x8] sm:$0xff] }
 0x43b   : > { %1819 = vrot.lane.b32.xlu1 %v4384_v9, %s4241_s22 }
 0x43c   : > { %v1601_v51 = vpop.permute.xlu1 %1600 }
 0x43d   : > { %v1603_v5 = vsub.f32 %v4465_v56, %v1601_v51  ;;  %v628_v51 = vmul.f32 %v4508_v35, %v627_v4 }
 0x43f   : > { %v1604_v7 = vmul.f32 1.442695, %v1603_v5  ;;  %1226 = vperm.xlu1 %4079, %v4097_v6   ;;  %v823_v6 = vld [vmem:[#allocation3 + $0x10] sm:$0xff] }
 0x441   : > { %4106 = vpow2.f32 %v1604_v7 }
 0x442   : > { %v4101_v53 = vpop.eup %4100  ;;  %4108 = vpow2.f32 %v1792_v15 }
 0x443   : > { %1422 = vperm.xlu1 %4079, %v4547_v8   ;;  %v1217_v10 = vsel %vm419_vm4, %v4101_v53, 0.0  ;;  %v4551_v11 = vpop.eup %4102  ;;  %v824_v8 = vmul.f32 %v4498_v26, %v823_v6  ;;  %v1615_v26 = vld [vmem:[#allocation4 + $0x30] sm:$0xff] }
 0x444   : > { %1218 = vadd.xlane.f32.xlu0 %v1217_v10  ;;  %v1608_v61 = vmul.f32 %v4551_v11, %v1607_v55 }
 0x446   : > { %v4105_v12 = vpop.eup %4104 }
 0x447   : > { %1618 = vperm.xlu1 %4079, %v4551_v11   ;;  %v1413_v9 = vsel %vm419_vm4, %v4105_v12, 0.0  ;;  %v1803_v11 = vld [vmem:[#allocation3 + $0x38] sm:$0xff] }
 0x448   : > { %1414 = vadd.xlane.f32.xlu0 %v1413_v9 }
 0x44e   : > { %v4107_v56 = vpop.eup %4106 }
 0x44f   : > { %v1609_v13 = vsel %vm419_vm4, %v4107_v56, 0.0  ;;  %v4558_v17 = vpop.eup %4108 }
 0x450   : > { %1610 = vadd.xlane.f32.xlu0 %v1609_v13  ;;  %v1223_v13 = vld [vmem:[#allocation4 + $0x20] sm:$0xff] }
 0x46b   : > { %630 = vadd.xlane.f32.xlu1 %v629_v14  ;;  %v1419_v14 = vld [vmem:[#allocation4 + $0x28] sm:$0xff] }
 0x46f   : > { %826 = vadd.xlane.f32.xlu1 %v825_v16 }
 0x480   : > { %1814 = vperm.xlu1 %4079, %v4558_v17  }
 0x4a0   : > { %v1023_v22 = vpop.xlane.xlu0 %1022 }
 0x4a1   : > { %v1024_v23 = vadd.f32 %v1023_v22, %v1020_v21 }
 0x4a3   : > { %1025 = vst.msk [vmem:[#allocation3 + $0x18] sm:$0xff] %vm441_vm5, %v1024_v23 }
 0x4a6   : > { %v1797_v24 = vpop.permute.xlu1 %1796 }
 0x4a7   : > { %v1799_v25 = vsub.f32 %v4469_v59, %v1797_v24  ;;  %v1811_v24 = vld [vmem:[#allocation4 + $0x38] sm:$0xff] }
 0x4a9   : > { %v1800_v27 = vmul.f32 1.442695, %v1799_v25 }
 0x4aa   : > { %v1232_v28 = vpop.permute.xlu1 %1231 }
 0x4ab   : > { %4110 = vpow2.f32 %v1800_v27  ;;  %3900 = vmatpush3.msra.mxu0 %v1232_v28 }
 0x4ac   : > { %3902 = vmatmul.mubr.msk.f32.vlgmr.msra.gmra.mxu0 %vm419_vm4, %v4101_v53  ;;  %3909 = vmatprep.subr.mxu0 %v4232_v3 }
 0x4ad   : > { %3911 = vmatprep.mubr.msk.f32.mxu0 %vm4233_vm3, %v4232_v3 }
 0x4ae   : > { %v1428_v29 = vpop.permute.xlu1 %1427 }
 0x4af   : > { %3910 = vmatpush3.msra.mxu0 %v1428_v29 }
 0x4b0   : > { %3912 = vmatmul.mubr.msk.f32.vlgmr.msra.gmra.mxu0 %vm419_vm4, %v4105_v12  ;;  %3919 = vmatprep.subr.mxu0 %v4232_v3  ;;  %v1804_v12 = vmul.f32 %v4558_v17, %v1803_v11 }
 0x4b1   : > { %3921 = vmatprep.mubr.msk.f32.mxu0 %vm4233_vm3, %v4232_v3 }
 0x4b2   : > { %v1624_v59 = vpop.permute.xlu1 %1623 }
 0x4b3   : > { %3920 = vmatpush3.msra.mxu0 %v1624_v59 }
 0x4b4   : > { %3922 = vmatmul.mubr.msk.f32.vlgmr.msra.gmra.mxu0 %vm419_vm4, %v4107_v56  ;;  %3929 = vmatprep.subr.mxu0 %v4232_v3 }
 0x4b5   : > { %3931 = vmatprep.mubr.msk.f32.mxu0 %vm4233_vm3, %v4232_v3 }
 0x4b6   : > { %v1820_v30 = vpop.permute.xlu1 %1819 }
 0x4b7   : > { %3930 = vmatpush3.msra.mxu0 %v1820_v30 }
 0x4b8   : > { %v4111_v31 = vpop.eup %4110 }
 0x4b9   : > { %3932 = vmatmul.mubr.msk.f32.vlgmr.msra.gmra.mxu0 %vm419_vm4, %v4111_v31  ;;  %v1805_v32 = vsel %vm419_vm4, %v4111_v31, 0.0 }
 0x4ba   : > { %1806 = vadd.xlane.f32.xlu0 %v1805_v32  ;;  %v1227_v0 = vpop.permute.xlu1 %1226 }
 0x4bb   : > { %v1229_v35 = vmul.f32 %v1227_v0, %v1223_v13 }
 0x4be   : > { %v1423_v1 = vpop.permute.xlu1 %1422 }
 0x4bf   : > { %v1425_v19 = vmul.f32 %v1423_v1, %v1419_v14 }
 0x4c2   : > { %v1619_v2 = vpop.permute.xlu1 %1618 }
 0x4c3   : > { %v1621_v23 = vmul.f32 %v1619_v2, %v1615_v26 }
 0x4cd   : > { %v1219_v38 = vpop.xlane.xlu0 %1218 }
 0x4ce   : > { %v1220_v40 = vadd.f32 %v1219_v38, %v1216_v36  ;;  %v715_v43 = vpop.f32.mrf.mxu0 }
 0x4cf   : > { %v719_v44 = vadd.f32 %v715_v43, %v641_v37 }
 0x4d0   : > { %1221 = vst.msk [vmem:[#allocation3 + $0x20] sm:$0xff] %vm441_vm5, %v1220_v40  ;;  %v3873_v3 = vpop.f32.mrf.mxu0 }
 0x4d1   : > { %720 = vst.msk [vmem:[#allocation4 + $0x8] sm:$0xff] %vm341_vm2, %v719_v44  ;;  %v1415_v49 = vpop.xlane.xlu0 %1414 }
 0x4d2   : > { %v1416_v45 = vadd.f32 %v1415_v49, %v1412_v46  ;;  %v911_v48 = vpop.f32.mrf.mxu0 }
 0x4d3   : > { %v915_v50 = vadd.f32 %v911_v48, %v837_v47 }
 0x4d4   : > { %1417 = vst.msk [vmem:[#allocation3 + $0x28] sm:$0xff] %vm441_vm5, %v1416_v45  ;;  %v3883_v52 = vpop.f32.mrf.mxu0 }
 0x4d5   : > { %916 = vst.msk [vmem:[#allocation4 + $0x10] sm:$0xff] %vm341_vm2, %v915_v50 }
 0x4d6   : > { %v1107_v57 = vpop.f32.mrf.mxu0 }
 0x4d7   : > { %v1111_v58 = vadd.f32 %v1107_v57, %v1033_v54 }
 0x4d8   : > { %v3893_v60 = vpop.f32.mrf.mxu0 }
 0x4d9   : > { %1112 = vst.msk [vmem:[#allocation4 + $0x18] sm:$0xff] %vm341_vm2, %v1111_v58  ;;  %v1611_v62 = vpop.xlane.xlu0 %1610 }
 0x4da   : > { %v1612_v63 = vadd.f32 %v1611_v62, %v1608_v61 }
 0x4dc   : > { %1613 = vst.msk [vmem:[#allocation3 + $0x30] sm:$0xff] %vm441_vm5, %v1612_v63 }
 0x4f4   : > { %v631_v5 = vpop.xlane.xlu1 %630 }
 0x4f5   : > { %v632_v7 = vadd.f32 %v631_v5, %v628_v51 }
 0x4f7   : > { %633 = vst.msk [vmem:[#allocation3 + $0x8] sm:$0xff] %vm441_vm5, %v632_v7 }
 0x4f8   : > { %v827_v53 = vpop.xlane.xlu1 %826 }
 0x4f9   : > { %v828_v10 = vadd.f32 %v827_v53, %v824_v8 }
 0x4fb   : > { %829 = vst.msk [vmem:[#allocation3 + $0x10] sm:$0xff] %vm441_vm5, %v828_v10 }
 0x4fc   : > { %v1815_v25 = vpop.permute.xlu1 %1814 }
 0x4fd   : > { %v1817_v29 = vmul.f32 %v1815_v25, %v1811_v24 }
 0x543   : > { %v1807_v9 = vpop.xlane.xlu0 %1806 }
 0x544   : > { %v1808_v56 = vadd.f32 %v1807_v9, %v1804_v12 }
 0x546   : > { %1809 = vst.msk [vmem:[#allocation3 + $0x38] sm:$0xff] %vm441_vm5, %v1808_v56 }
 0x56c   : > { %v1303_v15 = vpop.f32.mrf.mxu0 }
 0x56d   : > { %v1307_v16 = vadd.f32 %v1303_v15, %v1229_v35 }
 0x56e   : > { %v3903_v18 = vpop.f32.mrf.mxu0 }
 0x56f   : > { %1308 = vst.msk [vmem:[#allocation4 + $0x20] sm:$0xff] %vm341_vm2, %v1307_v16 }
 0x570   : > { %v1499_v20 = vpop.f32.mrf.mxu0 }
 0x571   : > { %v1503_v21 = vadd.f32 %v1499_v20, %v1425_v19 }
 0x572   : > { %v3913_v22 = vpop.f32.mrf.mxu0 }
 0x573   : > { %1504 = vst.msk [vmem:[#allocation4 + $0x28] sm:$0xff] %vm341_vm2, %v1503_v21 }
 0x574   : > { %v1695_v17 = vpop.f32.mrf.mxu0 }
 0x575   : > { %v1699_v27 = vadd.f32 %v1695_v17, %v1621_v23 }
 0x576   : > { %v3923_v28 = vpop.f32.mrf.mxu0 }
 0x577   : > { %1700 = vst.msk [vmem:[#allocation4 + $0x30] sm:$0xff] %vm341_vm2, %v1699_v27 }
 0x579   : > { %v1891_v59 = vpop.f32.mrf.mxu0 }
 0x57a   : > { %v1895_v30 = vadd.f32 %v1891_v59, %v1817_v29 }
 0x57b   : > { %v3933_v31 = vpop.f32.mrf.mxu0 }
 0x57c   : > { %1896 = vst.msk [vmem:[#allocation4 + $0x38] sm:$0xff] %vm341_vm2, %v1895_v30 }
 0x57d PF: > { %p3761_p8 = scmp.ne.s32.totalorder %s4320_s13, %s4318_s12 }
 0x57e   : > { %s4244_s23 = smov (!%p3761_p8), 112   ;;  %s4247_s25 = smov (!%p3761_p8), 64  }
 0x57f   : > { %1901 = sbr.rel (%p3761_p8) target bundleno = 2982 (0xba6), region = 44  ;;  %s4248_s26 = smov (!%p3761_p8), 48  }
 0x580   : > { %s3762_s0 = sshll.u32 (!%p3761_p8), %s4318_s12, 3  ;;  %s3763_s1 = sshll.u32 (!%p3761_p8), %s4320_s13, 3 }
 0x581   : > { %s4250_s12 = smov (!%p3761_p8), 32   ;;  %s4251_s13 = smov (!%p3761_p8), 16  }
 0x584   : > { %v4600_v32 = vld [vmem:[%s4330_s24] sm:$0xff]  ;;  %vm1916_vm6 = vcmask 130048   ;;  %v4242_v33 = vmov 0.0   ;;  %vm4243_vm7 = vmmov 0   ;;  %s4246_s24 = smov 80   ;;  %v1903_v36 = vlaneseq }
 0x585   : > { %3934 = vmatprep.subr.mxu0 %v4242_v33  ;;  %3936 = vmatprep.mubr.msk.f32.mxu0 %vm4243_vm7, %v4242_v33  ;;  %v1913_v34 = vld [vmem:[%s4325_s20] sm:$0xff]  ;;  %s4245_s20 = smov 96   ;;  %v1905_v39 = vstv %s3762_s0  ;;  %v1910_v41 = vstv %s3763_s1  ;;  %vm1995_vm9 = vcmask 64512   ;;  %v4249_v42 = vmov 0  }
 0x586   : > { %3935 = vmatpush3.xpose.msk.msra.mxu0 %vm1916_vm6, %v4600_v32  ;;  %3939 = vmatprep.subr.mxu1 %v4242_v33  ;;  %v1904_v37 = vshrl.u32 %v1903_v36, 7  ;;  %v1909_v38 = vand.u32 127, %v1903_v36  ;;  %v4642_v45 = vld [vmem:[%s4335_s8] sm:$0xff]  ;;  %vm2017_vm10 = vcmask 7168   ;;  %vm3504_vm11 = vcmask 261248  }
 0x587   : > { %3941 = vmatprep.mubr.msk.f32.mxu1 %vm4243_vm7, %v4242_v33  ;;  %3949 = vmatprep.subr.mxu0 %v4242_v33  ;;  %v1994_v48 = vld [vmem:[#allocation2] sm:$0xff]  ;;  %vm3519_vm12 = vcmask 392448   ;;  %vm3534_vm13 = vcmask 523648   ;;  %vm3549_vm14 = vcmask 654848   ;;  %vm3564_vm15 = vcmask 786048  }
 0x588   : > { %2109 = vrot.lane.b32.xlu1 %v4600_v32, %s4244_s23  ;;  %v1906_v40 = vadd.s32 %v1905_v39, %v1904_v37  ;;  %v1911_v43 = vadd.s32 %v1910_v41, %v1909_v38  ;;  %4112 = vset.pattern.permute.xlu0 %v4249_v42  ;;  %v2011_v13 = vld [vmem:[#allocation3] sm:$0xff]  ;;  %vm3579_vm0 = vcmask 917248   ;;  %vm3594_vm1 = vcmask 1048448  }
 0x589   : > { %3937 = vmatmul.mubr.msk.f32.vlgmr.msra.gmra.mxu0 %vm1916_vm6, %v1913_v34  ;;  %4113 = vset.pattern.permute.xlu1 %v4249_v42  ;;  %v2019_v18 = vld [vmem:[#allocation4] sm:$0xff] }
 0x58a   : > { %3951 = vmatprep.mubr.msk.f32.mxu0 %vm4243_vm7, %v4242_v33  ;;  %vm4632_vm8 = vcmp.le.s32.totalorder %v1911_v43, %v1906_v40  ;;  %3940 = vmatpush3.msra.mxu1 %v4642_v45 }
 0x58b   : > { %3944 = vmatprep.subr.mxu1 %v4242_v33 }
 0x58c   : > { %2106 = vrot.lane.b32.xlu1 %v1913_v34, %s4244_s23 }
 0x590   : > { %2306 = vrot.lane.b32.xlu1 %v4600_v32, %s4245_s20 }
 0x594   : > { %2303 = vrot.lane.b32.xlu1 %v1913_v34, %s4245_s20 }
 0x598   : > { %2503 = vrot.lane.b32.xlu1 %v4600_v32, %s4246_s24 }
 0x59c   : > { %2500 = vrot.lane.b32.xlu1 %v1913_v34, %s4246_s24 }
 0x5a0   : > { %2700 = vrot.lane.b32.xlu1 %v4600_v32, %s4247_s25 }
 0x5a4   : > { %2697 = vrot.lane.b32.xlu1 %v1913_v34, %s4247_s25 }
 0x5a8   : > { %2897 = vrot.lane.b32.xlu1 %v4600_v32, %s4248_s26 }
 0x5ac   : > { %2894 = vrot.lane.b32.xlu1 %v1913_v34, %s4248_s26 }
 0x5b0   : > { %3094 = vrot.lane.b32.xlu1 %v4600_v32, %s4250_s12 }
 0x5b4   : > { %3091 = vrot.lane.b32.xlu1 %v1913_v34, %s4250_s12 }
 0x5b8   : > { %3288 = vrot.lane.b32.xlu1 %v1913_v34, %s4251_s13 }
 0x5bc   : > { %2417 = vrot.lane.b32.xlu1 %v4642_v45, %s4245_s20 }
 0x5fa   : > { %v2110_v58 = vpop.permute.xlu1 %2109 }
 0x5fe   : > { %v2107_v60 = vpop.permute.xlu1 %2106 }
 0x602   : > { %v2307_v61 = vpop.permute.xlu1 %2306 }
 0x606   : > { %v2304_v62 = vpop.permute.xlu1 %2303 }
 0x60a   : > { %v2504_v63 = vpop.permute.xlu1 %2503 }
 0x60e   : > { %v2501_v4 = vpop.permute.xlu1 %2500 }
 0x612   : > { %v2701_v6 = vpop.permute.xlu1 %2700 }
 0x616   : > { %v2698_v7 = vpop.permute.xlu1 %2697 }
 0x61a   : > { %v2898_v10 = vpop.permute.xlu1 %2897 }
 0x61e   : > { %v2895_v11 = vpop.permute.xlu1 %2894 }
 0x622   : > { %v3095_v12 = vpop.permute.xlu1 %3094 }
 0x626   : > { %v3092_v9 = vpop.permute.xlu1 %3091 }
 0x62a   : > { %v3289_v56 = vpop.permute.xlu1 %3288 }
 0x62e   : > { %v4693_v16 = vpop.permute.xlu1 %2417 }
 0x649   : > { %v1989_v3 = vpop.f32.mrf.mxu0 }
 0x64a   : > { %v1993_v46 = vsel %vm4632_vm8, %v1989_v3, -1e+30 }
 0x64b   : > { %v3938_v47 = vpop.f32.mrf.mxu0  ;;  %v1996_v49 = vsel %vm1995_vm9, %v1993_v46, -inf }
 0x64c   : > { %1997 = vmax.xlane.f32.xlu0 %v1996_v49 }
 0x6d5   : > { %v1998_v50 = vpop.xlane.xlu0 %1997 }
 0x6d6   : > { %v1999_v52 = vmax.f32 %v1994_v48, %v1998_v50 }
 0x6d8   : > { %v2000_v54 = vsub.f32 %v1994_v48, %v1999_v52  ;;  %2101 = vst.msk [vmem:[#allocation2] sm:$0xff] %vm2017_vm10, %v1999_v52  ;;  %2005 = vperm.xlu0 %4112, %v1999_v52   ;;  %v2187_v52 = vld [vmem:[#allocation2 + $0x8] sm:$0xff] }
 0x6da   : > { %v2001_v55 = vmul.f32 1.442695, %v2000_v54 }
 0x6dc   : > { %4114 = vpow2.f32 %v2001_v55  ;;  %3291 = vrot.lane.b32.xlu0 %v4600_v32, %s4251_s13 }
 0x6e0   : > { %2220 = vrot.lane.b32.xlu0 %v4642_v45, %s4244_s23 }
 0x6e9   : > { %v4115_v57 = vpop.eup %4114 }
 0x6ea   : > { %2022 = vperm.xlu1 %4113, %v4115_v57   ;;  %v2012_v35 = vmul.f32 %v4115_v57, %v2011_v13  ;;  %v2384_v57 = vld [vmem:[#allocation2 + $0x10] sm:$0xff] }
 0x753   : > { %v2006_v0 = vpop.permute.xlu0 %2005 }
 0x754   : > { %v2008_v1 = vsub.f32 %v1993_v46, %v2006_v0 }
 0x756   : > { %v2009_v2 = vmul.f32 1.442695, %v2008_v1 }
 0x757   : > { %v3292_v51 = vpop.permute.xlu0 %3291 }
 0x758   : > { %4116 = vpow2.f32 %v2009_v2  ;;  %v4734_v2 = vld [vmem:[#allocation2 + $0x20] sm:$0xff] }
 0x75b   : > { %v2221_v5 = vpop.permute.xlu0 %2220 }
 0x75c   : > { %3950 = vmatpush3.msra.mxu0 %v2221_v5 }
 0x75d   : > { %3959 = vmatprep.subr.mxu0 %v4242_v33 }
 0x765   : > { %v4117_v8 = vpop.eup %4116  ;;  %v2023_v19 = vpop.permute.xlu1 %2022 }
 0x766   : > { %3942 = vmatmul.mubr.msk.f32.vlgmr.msra.gmra.mxu1 %vm1995_vm9, %v4117_v8  ;;  %v2013_v53 = vsel %vm1995_vm9, %v4117_v8, 0.0  ;;  %v2025_v26 = vmul.f32 %v2023_v19, %v2019_v18 }
 0x767   : > { %3945 = vmatpush3.xpose.msk.msra.mxu1 %vm1916_vm6, %v2110_v58  ;;  %2014 = vadd.xlane.f32.xlu0 %v2013_v53 }
 0x768   : > { %3946 = vmatprep.mubr.msk.f32.mxu1 %vm4243_vm7, %v4242_v33  ;;  %3954 = vmatprep.subr.mxu1 %v4242_v33 }
 0x76a   : > { %3947 = vmatmul.mubr.msk.f32.vlgmr.msra.gmra.mxu1 %vm1916_vm6, %v2107_v60 }
 0x76b   : > { %3955 = vmatpush3.xpose.msk.msra.mxu1 %vm1916_vm6, %v2307_v61  ;;  %3956 = vmatprep.mubr.msk.f32.mxu1 %vm4243_vm7, %v4242_v33 }
 0x76c   : > { %3964 = vmatprep.subr.mxu1 %v4242_v33 }
 0x76e   : > { %3957 = vmatmul.mubr.msk.f32.vlgmr.msra.gmra.mxu1 %vm1916_vm6, %v2304_v62 }
 0x76f   : > { %3965 = vmatpush3.xpose.msk.msra.mxu1 %vm1916_vm6, %v2504_v63  ;;  %3966 = vmatprep.mubr.msk.f32.mxu1 %vm4243_vm7, %v4242_v33  ;;  %v2581_v63 = vld [vmem:[#allocation2 + $0x18] sm:$0xff] }
 0x770   : > { %3974 = vmatprep.subr.mxu1 %v4242_v33 }
 0x772   : > { %3967 = vmatmul.mubr.msk.f32.vlgmr.msra.gmra.mxu1 %vm1916_vm6, %v2501_v4 }
 0x773   : > { %3975 = vmatpush3.xpose.msk.msra.mxu1 %vm1916_vm6, %v2701_v6  ;;  %3976 = vmatprep.mubr.msk.f32.mxu1 %vm4243_vm7, %v4242_v33  ;;  %v4740_v6 = vld [vmem:[#allocation2 + $0x28] sm:$0xff] }
 0x774   : > { %3984 = vmatprep.subr.mxu1 %v4242_v33 }
 0x776   : > { %3977 = vmatmul.mubr.msk.f32.vlgmr.msra.gmra.mxu1 %vm1916_vm6, %v2698_v7 }
 0x777   : > { %3985 = vmatpush3.xpose.msk.msra.mxu1 %vm1916_vm6, %v2898_v10  ;;  %3986 = vmatprep.mubr.msk.f32.mxu1 %vm4243_vm7, %v4242_v33  ;;  %v4749_v10 = vld [vmem:[#allocation2 + $0x30] sm:$0xff] }
 0x778   : > { %3994 = vmatprep.subr.mxu1 %v4242_v33 }
 0x77a   : > { %3987 = vmatmul.mubr.msk.f32.vlgmr.msra.gmra.mxu1 %vm1916_vm6, %v2895_v11 }
 0x77b   : > { %3995 = vmatpush3.xpose.msk.msra.mxu1 %vm1916_vm6, %v3095_v12  ;;  %3996 = vmatprep.mubr.msk.f32.mxu1 %vm4243_vm7, %v4242_v33 }
 0x77c   : > { %4004 = vmatprep.subr.mxu1 %v4242_v33 }
 0x77e   : > { %3997 = vmatmul.mubr.msk.f32.vlgmr.msra.gmra.mxu1 %vm1916_vm6, %v3092_v9 }
 0x77f   : > { %4005 = vmatpush3.xpose.msk.msra.mxu1 %vm1916_vm6, %v3292_v51  ;;  %4006 = vmatprep.mubr.msk.f32.mxu1 %vm4243_vm7, %v4242_v33 }
 0x782   : > { %4007 = vmatmul.mubr.msk.f32.vlgmr.msra.gmra.mxu1 %vm1916_vm6, %v3289_v56 }
 0x7f0   : > { %v2015_v14 = vpop.xlane.xlu0 %2014 }
 0x7f1   : > { %v2016_v15 = vadd.f32 %v2015_v14, %v2012_v35 }
 0x7f3   : > { %2018 = vst.msk [vmem:[#allocation3] sm:$0xff] %vm2017_vm10, %v2016_v15 }
 0x826   : > { %v2095_v20 = vpop.f32.mrf.mxu1 }
 0x827   : > { %v2099_v21 = vadd.f32 %v2095_v20, %v2025_v26 }
 0x828   : > { %v3943_v22 = vpop.f32.mrf.mxu1 }
 0x829   : > { %2100 = vst.msk [vmem:[#allocation4] sm:$0xff] %vm1916_vm6, %v2099_v21 }
 0x82a   : > { %v2181_v23 = vpop.f32.mrf.mxu1 }
 0x82b   : > { %v4698_v17 = vsel %vm4632_vm8, %v2181_v23, -1e+30 }
 0x82c   : > { %v3948_v24 = vpop.f32.mrf.mxu1  ;;  %v2188_v25 = vsel %vm1995_vm9, %v4698_v17, -inf }
 0x82d   : > { %2189 = vmax.xlane.f32.xlu1 %v2188_v25 }
 0x82e   : > { %v2378_v27 = vpop.f32.mrf.mxu1 }
 0x82f   : > { %v4704_v28 = vsel %vm4632_vm8, %v2378_v27, -1e+30  ;;  %v3369_v27 = vld [vmem:[#allocation2 + $0x38] sm:$0xff] }
 0x830   : > { %v3958_v29 = vpop.f32.mrf.mxu1  ;;  %v2385_v59 = vsel %vm1995_vm9, %v4704_v28, -inf }
 0x831   : > { %2386 = vmax.xlane.f32.xlu0 %v2385_v59 }
 0x832   : > { %v2575_v30 = vpop.f32.mrf.mxu1 }
 0x833   : > { %v4710_v31 = vsel %vm4632_vm8, %v2575_v30, -1e+30 }
 0x834   : > { %v3968_v32 = vpop.f32.mrf.mxu1  ;;  %v2582_v34 = vsel %vm1995_vm9, %v4710_v31, -inf }
 0x835   : > { %2583 = vmax.xlane.f32.xlu0 %v2582_v34 }
 0x836   : > { %v2772_v36 = vpop.f32.mrf.mxu1 }
 0x837   : > { %v4716_v37 = vsel %vm4632_vm8, %v2772_v36, -1e+30 }
 0x838   : > { %v3978_v38 = vpop.f32.mrf.mxu1  ;;  %v2779_v39 = vsel %vm1995_vm9, %v4716_v37, -inf }
 0x839   : > { %2780 = vmax.xlane.f32.xlu1 %v2779_v39 }
 0x83a   : > { %v2969_v41 = vpop.f32.mrf.mxu1 }
 0x83b   : > { %v4722_v40 = vsel %vm4632_vm8, %v2969_v41, -1e+30 }
 0x83c   : > { %v2976_v43 = vsel %vm1995_vm9, %v4722_v40, -inf  ;;  %v3988_v3 = vpop.f32.mrf.mxu1 }
 0x83d   : > { %2977 = vmax.xlane.f32.xlu0 %v2976_v43 }
 0x83e   : > { %v3166_v46 = vpop.f32.mrf.mxu1 }
 0x83f   : > { %v4728_v47 = vsel %vm4632_vm8, %v3166_v46, -1e+30 }
 0x840   : > { %v3173_v49 = vsel %vm1995_vm9, %v4728_v47, -inf  ;;  %v3998_v42 = vpop.f32.mrf.mxu1 }
 0x841   : > { %3174 = vmax.xlane.f32.xlu0 %v3173_v49 }
 0x842   : > { %v3363_v48 = vpop.f32.mrf.mxu1 }
 0x843   : > { %v4770_v35 = vsel %vm4632_vm8, %v3363_v48, -1e+30 }
 0x844   : > { %v4008_v50 = vpop.f32.mrf.mxu1  ;;  %v3370_v14 = vsel %vm1995_vm9, %v4770_v35, -inf }
 0x8b6   : > { %v2190_v54 = vpop.xlane.xlu1 %2189 }
 0x8b7   : > { %v2191_v55 = vmax.f32 %v2187_v52, %v2190_v54 }
 0x8b9   : > { %v2192_v58 = vsub.f32 %v2187_v52, %v2191_v55  ;;  %2298 = vst.msk [vmem:[#allocation2 + $0x8] sm:$0xff] %vm2017_vm10, %v2191_v55  ;;  %2197 = vperm.xlu0 %4112, %v2191_v55  }
 0x8ba   : > { %v2387_v60 = vpop.xlane.xlu0 %2386 }
 0x8bb   : > { %v2193_v61 = vmul.f32 1.442695, %v2192_v58  ;;  %v2388_v62 = vmax.f32 %v2384_v57, %v2387_v60 }
 0x8bd   : > { %2495 = vst.msk [vmem:[#allocation2 + $0x10] sm:$0xff] %vm2017_vm10, %v2388_v62  ;;  %2394 = vperm.xlu1 %4113, %v2388_v62   ;;  %4118 = vpow2.f32 %v2193_v61  ;;  %v2389_v15 = vsub.f32 %v2384_v57, %v2388_v62 }
 0x8be   : > { %v2584_v0 = vpop.xlane.xlu0 %2583 }
 0x8bf   : > { %v2585_v1 = vmax.f32 %v2581_v63, %v2584_v0  ;;  %v2390_v18 = vmul.f32 1.442695, %v2389_v15  ;;  %v2409_v15 = vld [vmem:[#allocation4 + $0x10] sm:$0xff] }
 0x8c1   : > { %v2586_v4 = vsub.f32 %v2581_v63, %v2585_v1  ;;  %2692 = vst.msk [vmem:[#allocation2 + $0x18] sm:$0xff] %vm2017_vm10, %v2585_v1  ;;  %4120 = vpow2.f32 %v2390_v18 }
 0x8c2   : > { %v2781_v51 = vpop.xlane.xlu1 %2780 }
 0x8c3   : > { %v4738_v5 = vmax.f32 %v4734_v2, %v2781_v51 }
 0x8c5   : > { %v2783_v7 = vsub.f32 %v4734_v2, %v4738_v5  ;;  %2889 = vst.msk [vmem:[#allocation2 + $0x20] sm:$0xff] %vm2017_vm10, %v4738_v5 }
 0x8c6   : > { %v2978_v8 = vpop.xlane.xlu0 %2977 }
 0x8c7   : > { %v4747_v53 = vmax.f32 %v4740_v6, %v2978_v8  ;;  %v2784_v62 = vmul.f32 1.442695, %v2783_v7 }
 0x8c9   : > { %v2980_v11 = vsub.f32 %v4740_v6, %v4747_v53  ;;  %3086 = vst.msk [vmem:[#allocation2 + $0x28] sm:$0xff] %vm2017_vm10, %v4747_v53  ;;  %2985 = vperm.xlu1 %4113, %v4747_v53  }
 0x8ca   : > { %v3175_v12 = vpop.xlane.xlu0 %3174  ;;  %v4759_v56 = vpop.eup %4118 }
 0x8cb   : > { %v4757_v9 = vmax.f32 %v4749_v10, %v3175_v12  ;;  %v2981_v42 = vmul.f32 1.442695, %v2980_v11  ;;  %v2212_v12 = vld [vmem:[#allocation4 + $0x8] sm:$0xff] }
 0x8cd   : > { %2215 = vperm.xlu1 %4113, %v4759_v56   ;;  %v3177_v13 = vsub.f32 %v4749_v10, %v4757_v9  ;;  %3283 = vst.msk [vmem:[#allocation2 + $0x30] sm:$0xff] %vm2017_vm10, %v4757_v9 }
 0x8ce   : > { %v4778_v19 = vpop.eup %4120 }
 0x8cf   : > { %v3178_v48 = vmul.f32 1.442695, %v3177_v13 }
 0x8d1   : > { %2811 = vrot.lane.b32.xlu1 %v4642_v45, %s4247_s25 }
 0x8d8   : > { %3371 = vmax.xlane.f32.xlu0 %v3370_v14  ;;  %v2795_v14 = vld [vmem:[#allocation3 + $0x20] sm:$0xff] }
 0x8ee   : > { %2591 = vperm.xlu0 %4112, %v2585_v1  }
 0x8f2   : > { %2788 = vperm.xlu0 %4112, %v4738_v5  }
 0x8f6   : > { %3182 = vperm.xlu0 %4112, %v4757_v9  }
 0x8fa   : > { %2614 = vrot.lane.b32.xlu0 %v4642_v45, %s4246_s24 }
 0x8fe   : > { %2412 = vperm.xlu0 %4112, %v4778_v19  }
 0x934   : > { %v2198_v44 = vpop.permute.xlu0 %2197 }
 0x935   : > { %v2200_v26 = vsub.f32 %v4698_v17, %v2198_v44  ;;  %v2587_v17 = vmul.f32 1.442695, %v2586_v4 }
 0x937   : > { %v2201_v20 = vmul.f32 1.442695, %v2200_v26 }
 0x938   : > { %v2395_v21 = vpop.permute.xlu1 %2394 }
 0x939   : > { %4122 = vpow2.f32 %v2201_v20  ;;  %v2397_v22 = vsub.f32 %v4704_v28, %v2395_v21 }
 0x93b   : > { %v2398_v23 = vmul.f32 1.442695, %v2397_v22 }
 0x93d   : > { %4124 = vpow2.f32 %v2398_v23 }
 0x93e   : > { %4126 = vpow2.f32 %v2587_v17 }
 0x944   : > { %v2986_v38 = vpop.permute.xlu1 %2985 }
 0x945   : > { %v2988_v0 = vsub.f32 %v4722_v40, %v2986_v38 }
 0x946   : > { %v4123_v24 = vpop.eup %4122 }
 0x947   : > { %3952 = vmatmul.mubr.msk.f32.vlgmr.msra.gmra.mxu0 %vm1995_vm9, %v4123_v24  ;;  %v2206_v52 = vsel %vm1995_vm9, %v4123_v24, 0.0  ;;  %v2989_v1 = vmul.f32 1.442695, %v2988_v0 }
 0x948   : > { %3960 = vmatpush3.msra.mxu0 %v4693_v16  ;;  %3961 = vmatprep.mubr.msk.f32.mxu0 %vm4243_vm7, %v4242_v33  ;;  %v4797_v3 = vpop.permute.xlu1 %2215 }
 0x949   : > { %3969 = vmatprep.subr.mxu0 %v4242_v33  ;;  %v2218_v9 = vmul.f32 %v4797_v3, %v2212_v12  ;;  %v3386_v12 = vld [vmem:[#allocation3 + $0x38] sm:$0xff] }
 0x94a   : > { %v4125_v25 = vpop.eup %4124 }
 0x94b   : > { %3962 = vmatmul.mubr.msk.f32.vlgmr.msra.gmra.mxu0 %vm1995_vm9, %v4125_v25  ;;  %v4792_v16 = vpop.eup %4126  ;;  %v2403_v55 = vsel %vm1995_vm9, %v4125_v25, 0.0 }
 0x94c   : > { %3971 = vmatprep.mubr.msk.f32.mxu0 %vm4243_vm7, %v4242_v33  ;;  %v2812_v46 = vpop.permute.xlu1 %2811 }
 0x961   : > { %v3372_v28 = vpop.xlane.xlu0 %3371 }
 0x962   : > { %v3373_v29 = vmax.f32 %v3369_v27, %v3372_v28 }
 0x964   : > { %3480 = vst.msk [vmem:[#allocation2 + $0x38] sm:$0xff] %vm2017_vm10, %v3373_v29  ;;  %3379 = vperm.xlu1 %4113, %v3373_v29   ;;  %v3374_v50 = vsub.f32 %v3369_v27, %v3373_v29  ;;  %v2204_v27 = vld [vmem:[#allocation3 + $0x8] sm:$0xff] }
 0x965   : > { %v2205_v28 = vmul.f32 %v4759_v56, %v2204_v27 }
 0x966   : > { %v3375_v54 = vmul.f32 1.442695, %v3374_v50  ;;  %v2606_v50 = vld [vmem:[#allocation4 + $0x18] sm:$0xff] }
 0x968   : > { %2609 = vperm.xlu1 %4113, %v4792_v16  }
 0x969   : > { %v2592_v59 = vpop.permute.xlu0 %2591 }
 0x96a   : > { %v2594_v30 = vsub.f32 %v4710_v31, %v2592_v59  ;;  %v2401_v59 = vld [vmem:[#allocation3 + $0x10] sm:$0xff] }
 0x96c   : > { %v2595_v32 = vmul.f32 1.442695, %v2594_v30 }
 0x96d   : > { %v2789_v34 = vpop.permute.xlu0 %2788 }
 0x96e   : > { %4128 = vpow2.f32 %v2595_v32  ;;  %v2791_v36 = vsub.f32 %v4716_v37, %v2789_v34  ;;  %v2402_v32 = vmul.f32 %v4778_v19, %v2401_v59 }
 0x970   : > { %v2792_v39 = vmul.f32 1.442695, %v2791_v36  ;;  %v2598_v36 = vld [vmem:[#allocation3 + $0x18] sm:$0xff] }
 0x971   : > { %v3183_v41 = vpop.permute.xlu0 %3182 }
 0x972   : > { %4130 = vpow2.f32 %v2792_v39  ;;  %v3185_v2 = vsub.f32 %v4728_v47, %v3183_v41  ;;  %v3482_v47 = vld [vmem:[#allocation3] sm:$0xff]  ;;  %v2599_v39 = vmul.f32 %v4792_v16, %v2598_v36 }
 0x973   : > { %4132 = vpow2.f32 %v2981_v42 }
 0x974   : > { %4134 = vpow2.f32 %v3178_v48  ;;  %v3186_v4 = vmul.f32 1.442695, %v3185_v2 }
 0x975   : > { %v2615_v43 = vpop.permute.xlu0 %2614  ;;  %4136 = vpow2.f32 %v3375_v54 }
 0x976   : > { %3970 = vmatpush3.msra.mxu0 %v2615_v43  ;;  %4138 = vpow2.f32 %v2784_v62 }
 0x977   : > { %3979 = vmatprep.subr.mxu0 %v4242_v33  ;;  %4140 = vpow2.f32 %v2989_v1 }
 0x978   : > { %4142 = vpow2.f32 %v3186_v4 }
 0x979   : > { %v2413_v13 = vpop.permute.xlu0 %2412 }
 0x97a   : > { %v2415_v20 = vmul.f32 %v2413_v13, %v2409_v15 }
 0x97b   : > { %v4129_v49 = vpop.eup %4128 }
 0x97c   : > { %3972 = vmatmul.mubr.msk.f32.vlgmr.msra.gmra.mxu0 %vm1995_vm9, %v4129_v49  ;;  %v2600_v57 = vsel %vm1995_vm9, %v4129_v49, 0.0 }
 0x97d   : > { %3980 = vmatpush3.msra.mxu0 %v2812_v46  ;;  %3981 = vmatprep.mubr.msk.f32.mxu0 %vm4243_vm7, %v4242_v33 }
 0x97e   : > { %3989 = vmatprep.subr.mxu0 %v4242_v33 }
 0x97f   : > { %v4131_v31 = vpop.eup %4130 }
 0x980   : > { %3982 = vmatmul.mubr.msk.f32.vlgmr.msra.gmra.mxu0 %vm1995_vm9, %v4131_v31  ;;  %v2797_v37 = vsel %vm1995_vm9, %v4131_v31, 0.0  ;;  %v4817_v58 = vpop.eup %4132 }
 0x981   : > { %2798 = vadd.xlane.f32.xlu0 %v2797_v37  ;;  %3991 = vmatprep.mubr.msk.f32.mxu0 %vm4243_vm7, %v4242_v33  ;;  %v4820_v60 = vpop.eup %4134 }
 0x982   : > { %v4823_v61 = vpop.eup %4136 }
 0x983   : > { %v4139_v63 = vpop.eup %4138 }
 0x984   : > { %v4141_v51 = vpop.eup %4140 }
 0x985   : > { %v2994_v5 = vsel %vm1995_vm9, %v4141_v51, 0.0  ;;  %v4143_v6 = vpop.eup %4142 }
 0x986   : > { %v3191_v7 = vsel %vm1995_vm9, %v4143_v6, 0.0 }
 0x98c   : > { %2207 = vadd.xlane.f32.xlu1 %v2206_v52 }
 0x990   : > { %2404 = vadd.xlane.f32.xlu1 %v2403_v55  ;;  %v2803_v55 = vld [vmem:[#allocation4 + $0x20] sm:$0xff] }
 0x994   : > { %2601 = vadd.xlane.f32.xlu1 %v2600_v57 }
 0x997   : > { %3003 = vperm.xlu0 %4112, %v4817_v58  }
 0x99b   : > { %3200 = vperm.xlu0 %4112, %v4820_v60  }
 0x99f   : > { %3397 = vperm.xlu0 %4112, %v4823_v61  }
 0x9a5   : > { %3008 = vrot.lane.b32.xlu1 %v4642_v45, %s4248_s26 }
 0x9a9   : > { %3205 = vrot.lane.b32.xlu1 %v4642_v45, %s4250_s12 }
 0x9ad   : > { %3402 = vrot.lane.b32.xlu1 %v4642_v45, %s4251_s13 }
 0x9b1   : > { %2806 = vperm.xlu1 %4113, %v4139_v63  }
 0x9d5   : > { %2995 = vadd.xlane.f32.xlu1 %v2994_v5 }
 0x9d9   : > { %3192 = vadd.xlane.f32.xlu1 %v3191_v7  ;;  %v3189_v7 = vld [vmem:[#allocation3 + $0x30] sm:$0xff] }
 0x9df   : > { %v3380_v8 = vpop.permute.xlu1 %3379 }
 0x9e0   : > { %v3382_v45 = vsub.f32 %v4770_v35, %v3380_v8  ;;  %v2796_v35 = vmul.f32 %v4139_v63, %v2795_v14 }
 0x9e2   : > { %v3383_v53 = vmul.f32 1.442695, %v3382_v45  ;;  %v3190_v45 = vmul.f32 %v4820_v60, %v3189_v7  ;;  %v3481_v60 = vld [vmem:[#allocation4] sm:$0xff] }
 0x9e3   : > { %v2610_v17 = vpop.permute.xlu1 %2609 }
 0x9e4   : > { %4144 = vpow2.f32 %v3383_v53  ;;  %v2612_v54 = vmul.f32 %v2610_v17, %v2606_v50 }
 0x9e5   : > { %4146 = vrcp.f32 %v3482_v47 }
 0x9f1   : > { %v4145_v40 = vpop.eup %4144 }
 0x9f2   : > { %v3388_v10 = vsel %vm1995_vm9, %v4145_v40, 0.0  ;;  %v4147_v11 = vpop.eup %4146 }
 0x9f3   : > { %3389 = vadd.xlane.f32.xlu1 %v3388_v10 }
 0xa04   : > { %3486 = vperm.xlu1 %4113, %v4147_v11  }
 0xa07   : > { %v2292_v18 = vpop.f32.mrf.mxu0 }
 0xa08   : > { %v2296_v44 = vadd.f32 %v2292_v18, %v2218_v9  ;;  %v3387_v9 = vmul.f32 %v4823_v61, %v3386_v12 }
 0xa09   : > { %v3953_v26 = vpop.f32.mrf.mxu0 }
 0xa0a   : > { %2297 = vst.msk [vmem:[#allocation4 + $0x8] sm:$0xff] %vm1916_vm6, %v2296_v44  ;;  %v2799_v21 = vpop.xlane.xlu0 %2798 }
 0xa0b   : > { %v2800_v22 = vadd.f32 %v2799_v21, %v2796_v35  ;;  %v2489_v23 = vpop.f32.mrf.mxu0 }
 0xa0c   : > { %v2493_v24 = vadd.f32 %v2489_v23, %v2415_v20 }
 0xa0d   : > { %2801 = vst.msk [vmem:[#allocation3 + $0x20] sm:$0xff] %vm2017_vm10, %v2800_v22  ;;  %v3963_v25 = vpop.f32.mrf.mxu0 }
 0xa0e   : > { %2494 = vst.msk [vmem:[#allocation4 + $0x10] sm:$0xff] %vm1916_vm6, %v2493_v24 }
 0xa11   : > { %v3491_v21 = vld [vmem:[#allocation4 + $0x8] sm:$0xff] }
 0xa12   : > { %v3004_v44 = vpop.permute.xlu0 %3003 }
 0xa14   : > { %v3537_v31 = vld [vmem:[#allocation3 + $0x20] sm:$0xff] }
 0xa15   : > { %v2208_v29 = vpop.xlane.xlu1 %2207  ;;  %v3506_v61 = vld [vmem:[#allocation4 + $0x10] sm:$0xff] }
 0xa16   : > { %v2209_v30 = vadd.f32 %v2208_v29, %v2205_v28  ;;  %v3201_v26 = vpop.permute.xlu0 %3200 }
 0xa18   : > { %2210 = vst.msk [vmem:[#allocation3 + $0x8] sm:$0xff] %vm2017_vm10, %v2209_v30 }
 0xa19   : > { %v2405_v34 = vpop.xlane.xlu1 %2404 }
 0xa1a   : > { %v2406_v38 = vadd.f32 %v2405_v34, %v2402_v32  ;;  %v3398_v20 = vpop.permute.xlu0 %3397  ;;  %v3000_v34 = vld [vmem:[#allocation4 + $0x28] sm:$0xff] }
 0xa1b   : > { %v3006_v36 = vmul.f32 %v3004_v44, %v3000_v34 }
 0xa1c   : > { %2407 = vst.msk [vmem:[#allocation3 + $0x10] sm:$0xff] %vm2017_vm10, %v2406_v38  ;;  %v3197_v38 = vld [vmem:[#allocation4 + $0x30] sm:$0xff] }
 0xa1d   : > { %v2602_v41 = vpop.xlane.xlu1 %2601 }
 0xa1e   : > { %v2603_v43 = vadd.f32 %v2602_v41, %v2599_v39 }
 0xa1f   : > { %v3492_v3 = vld [vmem:[#allocation3 + $0x8] sm:$0xff] }
 0xa20   : > { %2604 = vst.msk [vmem:[#allocation3 + $0x18] sm:$0xff] %vm2017_vm10, %v2603_v43  ;;  %4148 = vrcp.f32 %v3492_v3  ;;  %v3203_v3 = vmul.f32 %v3201_v26, %v3197_v38 }
 0xa21   : > { %v3009_v56 = vpop.permute.xlu1 %3008 }
 0xa22   : > { %3990 = vmatpush3.msra.mxu0 %v3009_v56  ;;  %v3394_v56 = vld [vmem:[#allocation4 + $0x38] sm:$0xff] }
 0xa23   : > { %3992 = vmatmul.mubr.msk.f32.vlgmr.msra.gmra.mxu0 %vm1995_vm9, %v4141_v51  ;;  %3999 = vmatprep.subr.mxu0 %v4242_v33  ;;  %v3507_v19 = vld [vmem:[#allocation3 + $0x10] sm:$0xff]  ;;  %v2992_v51 = vld [vmem:[#allocation3 + $0x28] sm:$0xff] }
 0xa24   : > { %4001 = vmatprep.mubr.msk.f32.mxu0 %vm4243_vm7, %v4242_v33  ;;  %4150 = vrcp.f32 %v3507_v19  ;;  %v2993_v5 = vmul.f32 %v4817_v58, %v2992_v51 }
 0xa25   : > { %v3206_v46 = vpop.permute.xlu1 %3205 }
 0xa26   : > { %4000 = vmatpush3.msra.mxu0 %v3206_v46 }
 0xa27   : > { %4002 = vmatmul.mubr.msk.f32.vlgmr.msra.gmra.mxu0 %vm1995_vm9, %v4143_v6  ;;  %4009 = vmatprep.subr.mxu0 %v4242_v33  ;;  %v3522_v16 = vld [vmem:[#allocation3 + $0x18] sm:$0xff] }
 0xa28   : > { %4011 = vmatprep.mubr.msk.f32.mxu0 %vm4243_vm7, %v4242_v33  ;;  %4152 = vrcp.f32 %v3522_v16 }
 0xa29   : > { %v3403_v49 = vpop.permute.xlu1 %3402  ;;  %4154 = vrcp.f32 %v3537_v31 }
 0xa2a   : > { %4010 = vmatpush3.msra.mxu0 %v3403_v49  ;;  %v3400_v49 = vmul.f32 %v3398_v20, %v3394_v56 }
 0xa2b   : > { %4012 = vmatmul.mubr.msk.f32.vlgmr.msra.gmra.mxu0 %vm1995_vm9, %v4145_v40 }
 0xa2d   : > { %v4149_v37 = vpop.eup %4148  ;;  %v2807_v57 = vpop.permute.xlu1 %2806 }
 0xa2e   : > { %3496 = vperm.xlu0 %4112, %v4149_v37   ;;  %v2809_v0 = vmul.f32 %v2807_v57, %v2803_v55 }
 0xa31   : > { %v4151_v42 = vpop.eup %4150 }
 0xa32   : > { %3511 = vperm.xlu0 %4112, %v4151_v42  }
 0xa35   : > { %v4153_v48 = vpop.eup %4152 }
 0xa36   : > { %3526 = vperm.xlu0 %4112, %v4153_v48   ;;  %v4155_v52 = vpop.eup %4154 }
 0xa3a   : > { %3541 = vperm.xlu0 %4112, %v4155_v52  }
 0xa3c   : > { %v2686_v33 = vpop.f32.mrf.mxu0 }
 0xa3d   : > { %v2690_v62 = vadd.f32 %v2686_v33, %v2612_v54 }
 0xa3e   : > { %v3973_v63 = vpop.f32.mrf.mxu0 }
 0xa3f   : > { %2691 = vst.msk [vmem:[#allocation4 + $0x18] sm:$0xff] %vm1916_vm6, %v2690_v62 }
 0xa40   : > { %v2883_v1 = vpop.f32.mrf.mxu0 }
 0xa41   : > { %v2887_v2 = vadd.f32 %v2883_v1, %v2809_v0 }
 0xa42   : > { %v3983_v4 = vpop.f32.mrf.mxu0 }
 0xa43   : > { %2888 = vst.msk [vmem:[#allocation4 + $0x20] sm:$0xff] %vm1916_vm6, %v2887_v2 }
 0xa46   : > { %v3521_v17 = vld [vmem:[#allocation4 + $0x18] sm:$0xff] }
 0xa4a   : > { %v3536_v30 = vld [vmem:[#allocation4 + $0x20] sm:$0xff] }
 0xa5e   : > { %v2996_v6 = vpop.xlane.xlu1 %2995 }
 0xa5f   : > { %v2997_v8 = vadd.f32 %v2996_v6, %v2993_v5 }
 0xa61   : > { %2998 = vst.msk [vmem:[#allocation3 + $0x28] sm:$0xff] %vm2017_vm10, %v2997_v8 }
 0xa62   : > { %v3193_v53 = vpop.xlane.xlu1 %3192 }
 0xa63   : > { %v3194_v40 = vadd.f32 %v3193_v53, %v3190_v45 }
 0xa65   : > { %3195 = vst.msk [vmem:[#allocation3 + $0x30] sm:$0xff] %vm2017_vm10, %v3194_v40 }
 0xa68   : > { %v3552_v10 = vld [vmem:[#allocation3 + $0x28] sm:$0xff] }
 0xa69   : > { %4156 = vrcp.f32 %v3552_v10 }
 0xa6c   : > { %v3567_v47 = vld [vmem:[#allocation3 + $0x30] sm:$0xff] }
 0xa6d   : > { %4158 = vrcp.f32 %v3567_v47 }
 0xa76   : > { %v4157_v11 = vpop.eup %4156 }
 0xa77   : > { %3556 = vperm.xlu0 %4112, %v4157_v11  }
 0xa7a   : > { %v4159_v58 = vpop.eup %4158 }
 0xa7b   : > { %3571 = vperm.xlu0 %4112, %v4159_v58  }
 0xa7c   : > { %v3390_v13 = vpop.xlane.xlu1 %3389 }
 0xa7d   : > { %v3391_v14 = vadd.f32 %v3390_v13, %v3387_v9 }
 0xa7f   : > { %3392 = vst.msk [vmem:[#allocation3 + $0x38] sm:$0xff] %vm2017_vm10, %v3391_v14 }
 0xa80   : > { %v3487_v15 = vpop.permute.xlu1 %3486 }
 0xa81   : > { %v3489_v18 = vmul.f32 %v3487_v15, %v3481_v60 }
 0xa83   : > { %3490 = vst.msk [vmem:[%s4340_s17] sm:$0xff] %vm1916_vm6, %v3489_v18 }
 0xa86   : > { %v3582_v35 = vld [vmem:[#allocation3 + $0x38] sm:$0xff] }
 0xa87   : > { %4160 = vrcp.f32 %v3582_v35 }
 0xa94   : > { %v4161_v29 = vpop.eup %4160 }
 0xaa9   : > { %v3497_v22 = vpop.permute.xlu0 %3496 }
 0xaaa   : > { %v3499_v23 = vmul.f32 %v3497_v22, %v3491_v21 }
 0xaac   : > { %3501 = vrot.lane.b32.xlu0 %v3499_v23, %s4251_s13 }
 0xaad   : > { %v3512_v24 = vpop.permute.xlu0 %3511 }
 0xaae   : > { %v3514_v25 = vmul.f32 %v3512_v24, %v3506_v61 }
 0xab0   : > { %3516 = vrot.lane.b32.xlu0 %v3514_v25, %s4250_s12 }
 0xab1   : > { %v3527_v27 = vpop.permute.xlu0 %3526 }
 0xab2   : > { %v3529_v28 = vmul.f32 %v3527_v27, %v3521_v17 }
 0xab4   : > { %3586 = vperm.xlu0 %4112, %v4161_v29   ;;  %3531 = vrot.lane.b32.xlu1 %v3529_v28, %s4248_s26 }
 0xab5   : > { %v3542_v59 = vpop.permute.xlu0 %3541 }
 0xab6   : > { %v3544_v32 = vmul.f32 %v3542_v59, %v3536_v30 }
 0xab8   : > { %3546 = vrot.lane.b32.xlu1 %v3544_v32, %s4247_s25 }
 0xae3   : > { %v3080_v39 = vpop.f32.mrf.mxu0 }
 0xae4   : > { %v3084_v41 = vadd.f32 %v3080_v39, %v3006_v36 }
 0xae5   : > { %v3993_v43 = vpop.f32.mrf.mxu0 }
 0xae6   : > { %3085 = vst.msk [vmem:[#allocation4 + $0x28] sm:$0xff] %vm1916_vm6, %v3084_v41 }
 0xae7   : > { %v3277_v19 = vpop.f32.mrf.mxu0 }
 0xae8   : > { %v3281_v46 = vadd.f32 %v3277_v19, %v3203_v3 }
 0xae9   : > { %v4003_v16 = vpop.f32.mrf.mxu0 }
 0xaea   : > { %3282 = vst.msk [vmem:[#allocation4 + $0x30] sm:$0xff] %vm1916_vm6, %v3281_v46 }
 0xaeb   : > { %v3474_v31 = vpop.f32.mrf.mxu0 }
 0xaec   : > { %v3478_v37 = vadd.f32 %v3474_v31, %v3400_v49 }
 0xaed   : > { %v4013_v42 = vpop.f32.mrf.mxu0  ;;  %v3551_v48 = vld [vmem:[#allocation4 + $0x28] sm:$0xff] }
 0xaee   : > { %3479 = vst.msk [vmem:[#allocation4 + $0x38] sm:$0xff] %vm1916_vm6, %v3478_v37 }
 0xaf1   : > { %v3566_v54 = vld [vmem:[#allocation4 + $0x30] sm:$0xff] }
 0xaf2   : > { %v3557_v50 = vpop.permute.xlu0 %3556 }
 0xaf3   : > { %v3559_v52 = vmul.f32 %v3557_v50, %v3551_v48 }
 0xaf5   : > { %3561 = vrot.lane.b32.xlu1 %v3559_v52, %s4246_s24  ;;  %v3581_v1 = vld [vmem:[#allocation4 + $0x38] sm:$0xff] }
 0xaf6   : > { %v3572_v55 = vpop.permute.xlu0 %3571 }
 0xaf7   : > { %v3574_v57 = vmul.f32 %v3572_v55, %v3566_v54 }
 0xaf9   : > { %3576 = vrot.lane.b32.xlu1 %v3574_v57, %s4245_s20 }
 0xb1e   : > { %v3502_v33 = vpop.permute.xlu0 %3501 }
 0xb1f   : > { %3505 = vst.msk [vmem:[%s4340_s17] sm:$0xff] %vm3504_vm11, %v3502_v33 }
 0xb22   : > { %v3517_v62 = vpop.permute.xlu0 %3516 }
 0xb23   : > { %3520 = vst.msk [vmem:[%s4340_s17] sm:$0xff] %vm3519_vm12, %v3517_v62 }
 0xb26   : > { %v3532_v63 = vpop.permute.xlu1 %3531 }
 0xb27   : > { %3535 = vst.msk [vmem:[%s4340_s17] sm:$0xff] %vm3534_vm13, %v3532_v63 }
 0xb2a   : > { %v3547_v0 = vpop.permute.xlu1 %3546 }
 0xb2b   : > { %3550 = vst.msk [vmem:[%s4340_s17] sm:$0xff] %vm3549_vm14, %v3547_v0 }
 0xb2f   : > { %v3587_v2 = vpop.permute.xlu0 %3586 }
 0xb30   : > { %v3589_v4 = vmul.f32 %v3587_v2, %v3581_v1 }
 0xb32   : > { %3591 = vrot.lane.b32.xlu1 %v3589_v4, %s4244_s23 }
 0xb67   : > { %v3562_v51 = vpop.permute.xlu1 %3561 }
 0xb68   : > { %3565 = vst.msk [vmem:[%s4340_s17] sm:$0xff] %vm3564_vm15, %v3562_v51 }
 0xb6b   : > { %v3577_v5 = vpop.permute.xlu1 %3576 }
 0xb6c   : > { %3580 = vst.msk [vmem:[%s4340_s17] sm:$0xff] %vm3579_vm0, %v3577_v5 }
 0xba4   : > { %v3592_v6 = vpop.permute.xlu1 %3591 }
 0xba5   : > { %3595 = vst.msk [vmem:[%s4340_s17] sm:$0xff] %vm3594_vm1, %v3592_v6 }
 0xba6 PF: > { %s25_s30 = sadd.s32 1, %s4226_s30   ;;  %s4910_s1 = smov %s4218_s28 }
 0xba7   : > { %p22_p9 = scmp.ge.s32.totalorder %s25_s30, 8   ;;  %s4911_s27 = smov %s4222_s29 }
 0xba8   : > { %s4912_s28 = smov %s4915_s6  ;;  %s4913_s29 = smov %s4919_s7 }
 0xba9   :  { %24 = sbr.rel (!%p22_p9) target bundleno = 28 (0x1c), region = 122 }

</bundles_post_ra>
